<compile_context>
chip_gen: v7x
topology: tpu7x:2x2x1
jax: 0.10.0
libtpu: 0.0.40
codegen_flags: <defaults>
</compile_context>

<pallas_src>
import functools

import jax
import jax.numpy as jnp
from jax.experimental import pallas as pl
from jax.experimental.pallas import tpu as pltpu


LANE = 128


def _round_up(v, m):
    return ((v + m - 1) // m) * m


# ---------------------------------------------------------------------------
# Fused Conv2d + ReLU + (optional) MaxPool2d kernel
# ---------------------------------------------------------------------------
def _conv_relu_pool_kernel(x_ref, w_ref, b_ref, o_ref, *, k, Ho, Wo, ph, pw, halo):
    # x_ref : (1, Hp, Wp, Ci)  one sample, already spatially padded with a zero halo
    # w_ref : (k*k*Ci, Co)     host-preflattened weights (bf16)
    # b_ref : (1, Co)          bias (f32)
    # o_ref : (1, Hout, Wout, Co)  pooled output incl. the next layer's zero halo
    Ci = x_ref.shape[-1]
    Co = o_ref.shape[-1]

    # --- im2col: one big patch matrix, one MXU matmul -----------------------
    patches = []
    for kh in range(k):
        for kw in range(k):
            p = x_ref[0, kh:kh + Ho, kw:kw + Wo, :]          # (Ho, Wo, Ci)
            patches.append(p.reshape(Ho * Wo, Ci))
    lhs = jnp.concatenate(patches, axis=1).astype(jnp.bfloat16)   # (Ho*Wo, k*k*Ci)
    acc = jnp.dot(lhs, w_ref[...], preferred_element_type=jnp.float32)  # (Ho*Wo, Co)

    # --- bias + ReLU in f32 --------------------------------------------------
    acc = jnp.maximum(acc + b_ref[...], 0.0)

    # --- fused MaxPool (floor mode, like nn.MaxPool2d) -----------------------
    y = acc.reshape(Ho, Wo, Co)
    if ph > 1 or pw > 1:
        He, We = (Ho // ph) * ph, (Wo // pw) * pw
        if (He, We) != (Ho, Wo):
            y = y[:He, :We, :]
        if pw > 1:
            # merge W pairs into the lane dim, then max the Co-sized halves
            y = y.reshape(He, We // pw, pw * Co)
            m = y[:, :, :Co]
            for t in range(1, pw):
                m = jnp.maximum(m, y[:, :, t * Co:(t + 1) * Co])
            y = m
        if ph > 1:
            # split the leading H dim (layout-free reshape), max over the pair axis
            W2 = y.shape[1]
            y = y.reshape(He // ph, ph, W2, Co)
            m = y[:, 0]
            for t in range(1, ph):
                m = jnp.maximum(m, y[:, t])
            y = m

    H2, W2 = y.shape[0], y.shape[1]
    y = y[None].astype(o_ref.dtype)                           # (1, H2, W2, Co)
    if halo == 0:
        o_ref[...] = y
    else:
        # write the next conv's zero halo together with the activation
        o_ref[...] = jnp.zeros(o_ref.shape, o_ref.dtype)
        o_ref[:, halo:halo + H2, halo:halo + W2, :] = y


def conv_block_pallas(x, wflat, bias, *, k, pool, out_halo):
    """x: (N, Hp, Wp, Ci) f32, already padded by this conv's own padding.
    wflat: (k*k*Ci, Co) bf16, bias: (1, Co) f32.  Returns (N, H2+2*halo, W2+2*halo, Co)."""
    N, Hp, Wp, Ci = x.shape
    K, Co = wflat.shape
    assert K == k * k * Ci, (K, k, Ci)

    Ho, Wo = Hp - k + 1, Wp - k + 1
    ph, pw = pool if pool is not None else (1, 1)
    H2, W2 = Ho // ph, Wo // pw
    Hout, Wout = H2 + 2 * out_halo, W2 + 2 * out_halo

    kernel = functools.partial(_conv_relu_pool_kernel, k=k, Ho=Ho, Wo=Wo,
                               ph=ph, pw=pw, halo=out_halo)
    return pl.pallas_call(
        kernel,
        out_shape=jax.ShapeDtypeStruct((N, Hout, Wout, Co), jnp.float32),
        grid=(N,),
        in_specs=[
            pl.BlockSpec((1, Hp, Wp, Ci), lambda n: (n, 0, 0, 0)),
            pl.BlockSpec((K, Co), lambda n: (0, 0)),
            pl.BlockSpec((1, Co), lambda n: (0, 0)),
        ],
        out_specs=pl.BlockSpec((1, Hout, Wout, Co), lambda n: (n, 0, 0, 0)),
        compiler_params=pltpu.CompilerParams(
            dimension_semantics=("parallel",)),
    )(x, wflat, bias)


# ---------------------------------------------------------------------------
# Parameters (deterministic, synthetic) + inference-mode BN folding + packing
# ---------------------------------------------------------------------------
def init_params(key, in_ch=1, out_ch=64):
    """Raw (KH,KW,Cin,Cout) weights / (Cout,) biases, with BatchNorm folded (eval mode)."""
    oc = [out_ch // 8, out_ch // 4, out_ch // 2, out_ch]
    cfg = [  # (cin, cout, ksize, has_bias, has_bn)
        (in_ch, oc[0], 3, True, False),
        (oc[0], oc[1], 3, True, False),
        (oc[1], oc[2], 3, True, False),
        (oc[2], oc[2], 3, True, False),
        (oc[2], oc[3], 3, False, True),
        (oc[3], oc[3], 3, False, True),
        (oc[3], oc[3], 2, True, False),
    ]
    raw = []
    for i, (ci, co, k, has_bias, has_bn) in enumerate(cfg):
        kw_, kb, kg, kbt, km, kv = jax.random.split(jax.random.fold_in(key, i), 6)
        w = jax.random.normal(kw_, (k, k, ci, co), jnp.float32) / jnp.sqrt(k * k * ci)
        b = (0.01 * jax.random.normal(kb, (co,), jnp.float32)) if has_bias \
            else jnp.zeros((co,), jnp.float32)
        if has_bn:  # fold inference-mode BatchNorm into the bias-free conv
            gamma = 1.0 + 0.1 * jax.random.normal(kg, (co,), jnp.float32)
            beta = 0.05 * jax.random.normal(kbt, (co,), jnp.float32)
            mean = 0.05 * jax.random.normal(km, (co,), jnp.float32)
            var = jax.random.uniform(kv, (co,), jnp.float32, minval=0.5, maxval=1.5)
            scale = gamma / jnp.sqrt(var + 1e-5)
            w = w * scale[None, None, None, :]
            b = beta - mean * scale
        raw.append((w, b))
    return raw


def pack_params(raw_params):
    """Lane-pad channels to 128 and pre-flatten weights to (k*k*Ci_pad, Co_pad) bf16."""
    packed = []
    for w, b in raw_params:
        kh, kw, ci, co = w.shape
        ci_pad, co_pad = _round_up(ci, LANE), _round_up(co, LANE)
        wp = jnp.zeros((kh, kw, ci_pad, co_pad), jnp.float32)
        wp = wp.at[:, :, :ci, :co].set(jnp.asarray(w, jnp.float32))
        wflat = wp.reshape(kh * kw * ci_pad, co_pad).astype(jnp.bfloat16)
        bp = jnp.zeros((1, co_pad), jnp.float32).at[0, :co].set(jnp.asarray(b, jnp.float32))
        packed.append({"w": wflat, "b": bp, "k": kh, "co": co})
    return packed


# ---------------------------------------------------------------------------
# Forward pass (mirrors the PyTorch nn.Sequential exactly)
# ---------------------------------------------------------------------------
#            (pool,   halo written for the next conv's padding)
_LAYER_PLAN = [((2, 2), 1),   # conv1 + relu + maxpool(2,2)
               ((2, 2), 1),   # conv2 + relu + maxpool(2,2)
               (None,   1),   # conv3 + relu
               ((2, 1), 1),   # conv4 + relu + maxpool((2,1),(2,1))
               (None,   1),   # conv5 + BN(folded) + relu
               ((2, 1), 0),   # conv6 + BN(folded) + relu + maxpool((2,1),(2,1))
               (None,   0)]   # conv7 (2x2, pad 0) + relu


def vgg_feature_extractor(x_nchw, packed_params):
    x = jnp.transpose(x_nchw, (0, 2, 3, 1)).astype(jnp.float32)      # NCHW -> NHWC
    N, H, W, ci = x.shape
    ci_pad = _round_up(ci, LANE)
    # single host-side pad: channel lanes -> 128 and the first conv's 1-pixel halo
    x = jnp.pad(x, ((0, 0), (1, 1), (1, 1), (0, ci_pad - ci)))
    for layer, (pool, halo) in zip(packed_params, _LAYER_PLAN):
        x = conv_block_pallas(x, layer["w"], layer["b"], k=layer["k"],
                              pool=pool, out_halo=halo)
    x = x[..., :packed_params[-1]["co"]]                             # drop lane padding
    return jnp.transpose(x, (0, 3, 1, 2))                            # NHWC -> NCHW


if __name__ == "__main__":
    key = jax.random.PRNGKey(0)
    kx, kp = jax.random.split(key)

    in_ch, out_ch = 1, 64                      # small out_ch (oc = [8,16,32,64]) for the demo
    params = pack_params(init_params(kp, in_ch=in_ch, out_ch=out_ch))

    # CRNN-style input: batch=2, 1 channel, 32 x 16 image (NCHW, like PyTorch).
    x = jax.random.normal(kx, (2, in_ch, 32, 16), jnp.float32)

    out = jax.block_until_ready(vgg_feature_extractor(x, params))

    expected = (2, out_ch, 1, 3)               # H: 32->16->8->4->2->1, W: 16->8->4->4->4->3
    assert out.shape == expected, (out.shape, expected)
    assert bool(jnp.all(jnp.isfinite(out)))
    print("KERNEL_OK")
</pallas_src>

<mosaic_0001>
module attributes {stable_mosaic.version = 11 : i64} {
  func.func @_conv_relu_pool_kernel(%arg0: i32, %arg1: memref<1x34x18x128xf32, #tpu.memory_space<vmem>>, %arg2: memref<1152x128xbf16, #tpu.memory_space<vmem>>, %arg3: memref<1x128xf32, #tpu.memory_space<vmem>>, %arg4: memref<1x18x10x128xf32, #tpu.memory_space<vmem>>) attributes {dimension_semantics = [#tpu.dimension_semantics<parallel>], iteration_bounds = array<i64: 2>, scalar_prefetch = 0 : i64, scratch_operands = 0 : i64, tpu.core_type = #tpu.core_type<tc>, window_params = [{transform_indices = @transform_0, window_bounds = array<i64: 1, 34, 18, 128>}, {pipeline_mode = #tpu.pipeline_mode<synchronous>, transform_indices = @transform_1, window_bounds = array<i64: 1152, 128>}, {pipeline_mode = #tpu.pipeline_mode<synchronous>, transform_indices = @transform_2, window_bounds = array<i64: 1, 128>}, {transform_indices = @transform_3, window_bounds = array<i64: 1, 18, 10, 128>}]} {
    %c0 = arith.constant 0 : index
    %c0_0 = arith.constant 0 : index
    %c0_1 = arith.constant 0 : index
    %c0_2 = arith.constant 0 : index
    %0 = vector.load %arg1[%c0, %c0_0, %c0_1, %c0_2] : memref<1x34x18x128xf32, #tpu.memory_space<vmem>>, vector<1x32x16x128xf32>
    %1 = vector.shape_cast %0 : vector<1x32x16x128xf32> to vector<32x16x128xf32>
    %2 = vector.shape_cast %1 : vector<32x16x128xf32> to vector<512x128xf32>
    %c0_3 = arith.constant 0 : index
    %c0_4 = arith.constant 0 : index
    %c1 = arith.constant 1 : index
    %c0_5 = arith.constant 0 : index
    %3 = vector.load %arg1[%c0_3, %c0_4, %c1, %c0_5] : memref<1x34x18x128xf32, #tpu.memory_space<vmem>>, vector<1x32x16x128xf32>
    %4 = vector.shape_cast %3 : vector<1x32x16x128xf32> to vector<32x16x128xf32>
    %5 = vector.shape_cast %4 : vector<32x16x128xf32> to vector<512x128xf32>
    %c0_6 = arith.constant 0 : index
    %c0_7 = arith.constant 0 : index
    %c2 = arith.constant 2 : index
    %c0_8 = arith.constant 0 : index
    %6 = vector.load %arg1[%c0_6, %c0_7, %c2, %c0_8] : memref<1x34x18x128xf32, #tpu.memory_space<vmem>>, vector<1x32x16x128xf32>
    %7 = vector.shape_cast %6 : vector<1x32x16x128xf32> to vector<32x16x128xf32>
    %8 = vector.shape_cast %7 : vector<32x16x128xf32> to vector<512x128xf32>
    %c0_9 = arith.constant 0 : index
    %c1_10 = arith.constant 1 : index
    %c0_11 = arith.constant 0 : index
    %c0_12 = arith.constant 0 : index
    %9 = vector.load %arg1[%c0_9, %c1_10, %c0_11, %c0_12] : memref<1x34x18x128xf32, #tpu.memory_space<vmem>>, vector<1x32x16x128xf32>
    %10 = vector.shape_cast %9 : vector<1x32x16x128xf32> to vector<32x16x128xf32>
    %11 = vector.shape_cast %10 : vector<32x16x128xf32> to vector<512x128xf32>
    %c0_13 = arith.constant 0 : index
    %c1_14 = arith.constant 1 : index
    %c1_15 = arith.constant 1 : index
    %c0_16 = arith.constant 0 : index
    %12 = vector.load %arg1[%c0_13, %c1_14, %c1_15, %c0_16] : memref<1x34x18x128xf32, #tpu.memory_space<vmem>>, vector<1x32x16x128xf32>
    %13 = vector.shape_cast %12 : vector<1x32x16x128xf32> to vector<32x16x128xf32>
    %14 = vector.shape_cast %13 : vector<32x16x128xf32> to vector<512x128xf32>
    %c0_17 = arith.constant 0 : index
    %c1_18 = arith.constant 1 : index
    %c2_19 = arith.constant 2 : index
    %c0_20 = arith.constant 0 : index
    %15 = vector.load %arg1[%c0_17, %c1_18, %c2_19, %c0_20] : memref<1x34x18x128xf32, #tpu.memory_space<vmem>>, vector<1x32x16x128xf32>
    %16 = vector.shape_cast %15 : vector<1x32x16x128xf32> to vector<32x16x128xf32>
    %17 = vector.shape_cast %16 : vector<32x16x128xf32> to vector<512x128xf32>
    %c0_21 = arith.constant 0 : index
    %c2_22 = arith.constant 2 : index
    %c0_23 = arith.constant 0 : index
    %c0_24 = arith.constant 0 : index
    %18 = vector.load %arg1[%c0_21, %c2_22, %c0_23, %c0_24] : memref<1x34x18x128xf32, #tpu.memory_space<vmem>>, vector<1x32x16x128xf32>
    %19 = vector.shape_cast %18 : vector<1x32x16x128xf32> to vector<32x16x128xf32>
    %20 = vector.shape_cast %19 : vector<32x16x128xf32> to vector<512x128xf32>
    %c0_25 = arith.constant 0 : index
    %c2_26 = arith.constant 2 : index
    %c1_27 = arith.constant 1 : index
    %c0_28 = arith.constant 0 : index
    %21 = vector.load %arg1[%c0_25, %c2_26, %c1_27, %c0_28] : memref<1x34x18x128xf32, #tpu.memory_space<vmem>>, vector<1x32x16x128xf32>
    %22 = vector.shape_cast %21 : vector<1x32x16x128xf32> to vector<32x16x128xf32>
    %23 = vector.shape_cast %22 : vector<32x16x128xf32> to vector<512x128xf32>
    %c0_29 = arith.constant 0 : index
    %c2_30 = arith.constant 2 : index
    %c2_31 = arith.constant 2 : index
    %c0_32 = arith.constant 0 : index
    %24 = vector.load %arg1[%c0_29, %c2_30, %c2_31, %c0_32] : memref<1x34x18x128xf32, #tpu.memory_space<vmem>>, vector<1x32x16x128xf32>
    %25 = vector.shape_cast %24 : vector<1x32x16x128xf32> to vector<32x16x128xf32>
    %26 = vector.shape_cast %25 : vector<32x16x128xf32> to vector<512x128xf32>
    %27 = tpu.concatenate %2, %5, %8, %11, %14, %17, %20, %23, %26 in 1 : vector<512x128xf32>, vector<512x128xf32>, vector<512x128xf32>, vector<512x128xf32>, vector<512x128xf32>, vector<512x128xf32>, vector<512x128xf32>, vector<512x128xf32>, vector<512x128xf32> -> vector<512x1152xf32>
    %28 = arith.truncf %27 : vector<512x1152xf32> to vector<512x1152xbf16>
    %c0_33 = arith.constant 0 : index
    %c0_34 = arith.constant 0 : index
    %29 = vector.load %arg2[%c0_33, %c0_34] : memref<1152x128xbf16, #tpu.memory_space<vmem>>, vector<1152x128xbf16>
    %cst = arith.constant dense<0.000000e+00> : vector<512x128xf32>
    %30 = tpu.matmul %28, %29, %cst {dimension_numbers = #tpu.dot_dimension_numbers<[1], [0], [0], [1], [0, 0, 1, 1], [], []>} : vector<512x1152xbf16>, vector<1152x128xbf16>, vector<512x128xf32> -> vector<512x128xf32>
    %c0_35 = arith.constant 0 : index
    %c0_36 = arith.constant 0 : index
    %31 = vector.load %arg3[%c0_35, %c0_36] : memref<1x128xf32, #tpu.memory_space<vmem>>, vector<1x128xf32>
    %32 = vector.broadcast %31 : vector<1x128xf32> to vector<512x128xf32>
    %33 = arith.addf %30, %32 : vector<512x128xf32>
    %cst_37 = arith.constant 0.000000e+00 : f32
    %34 = vector.broadcast %cst_37 : f32 to vector<512x128xf32>
    %35 = arith.maximumf %33, %34 : vector<512x128xf32>
    %36 = vector.shape_cast %35 : vector<512x128xf32> to vector<32x16x128xf32>
    %37 = vector.shape_cast %36 : vector<32x16x128xf32> to vector<32x8x256xf32>
    %38 = vector.extract_strided_slice %37 {offsets = [0, 0, 0], sizes = [32, 8, 128], strides = [1, 1, 1]} : vector<32x8x256xf32> to vector<32x8x128xf32>
    %39 = vector.extract_strided_slice %37 {offsets = [0, 0, 128], sizes = [32, 8, 128], strides = [1, 1, 1]} : vector<32x8x256xf32> to vector<32x8x128xf32>
    %40 = arith.maximumf %38, %39 : vector<32x8x128xf32>
    %41 = vector.shape_cast %40 : vector<32x8x128xf32> to vector<16x2x8x128xf32>
    %42 = vector.extract_strided_slice %41 {offsets = [0, 0, 0, 0], sizes = [16, 1, 8, 128], strides = [1, 1, 1, 1]} : vector<16x2x8x128xf32> to vector<16x1x8x128xf32>
    %43 = vector.shape_cast %42 : vector<16x1x8x128xf32> to vector<16x8x128xf32>
    %44 = vector.extract_strided_slice %41 {offsets = [0, 1, 0, 0], sizes = [16, 1, 8, 128], strides = [1, 1, 1, 1]} : vector<16x2x8x128xf32> to vector<16x1x8x128xf32>
    %45 = vector.shape_cast %44 : vector<16x1x8x128xf32> to vector<16x8x128xf32>
    %46 = arith.maximumf %43, %45 : vector<16x8x128xf32>
    %47 = vector.shape_cast %46 : vector<16x8x128xf32> to vector<1x16x8x128xf32>
    %cst_38 = arith.constant 0.000000e+00 : f32
    %48 = vector.broadcast %cst_38 : f32 to vector<1x18x10x128xf32>
    %c0_39 = arith.constant 0 : index
    %c0_40 = arith.constant 0 : index
    %c0_41 = arith.constant 0 : index
    %c0_42 = arith.constant 0 : index
    %49 = vector.load %arg4[%c0_39, %c0_40, %c0_41, %c0_42] : memref<1x18x10x128xf32, #tpu.memory_space<vmem>>, vector<1x18x10x128xf32>
    tpu.vector_store %arg4[%c0_39, %c0_40, %c0_41, %c0_42], %48 {strides = array<i32>} : memref<1x18x10x128xf32, #tpu.memory_space<vmem>>, vector<1x18x10x128xf32>,
    %c0_43 = arith.constant 0 : index
    %c1_44 = arith.constant 1 : index
    %c1_45 = arith.constant 1 : index
    %c0_46 = arith.constant 0 : index
    %50 = vector.load %arg4[%c0_43, %c1_44, %c1_45, %c0_46] : memref<1x18x10x128xf32, #tpu.memory_space<vmem>>, vector<1x16x8x128xf32>
    tpu.vector_store %arg4[%c0_43, %c1_44, %c1_45, %c0_46], %47 {strides = array<i32>} : memref<1x18x10x128xf32, #tpu.memory_space<vmem>>, vector<1x16x8x128xf32>,
    return
  }
  func.func @transform_0(%arg0: i32) -> (i32, i32, i32, i32) {
    %c0_i32 = arith.constant 0 : i32
    %c0_i32_0 = arith.constant 0 : i32
    %c0_i32_1 = arith.constant 0 : i32
    %c0_i32_2 = arith.constant 0 : i32
    return %arg0, %c0_i32, %c0_i32_0, %c0_i32_1 : i32, i32, i32, i32
  }
  func.func @transform_1(%arg0: i32) -> (i32, i32) {
    %c0_i32 = arith.constant 0 : i32
    %c0_i32_0 = arith.constant 0 : i32
    %c0_i32_1 = arith.constant 0 : i32
    return %c0_i32, %c0_i32_0 : i32, i32
  }
  func.func @transform_2(%arg0: i32) -> (i32, i32) {
    %c0_i32 = arith.constant 0 : i32
    %c0_i32_0 = arith.constant 0 : i32
    %c0_i32_1 = arith.constant 0 : i32
    return %c0_i32, %c0_i32_0 : i32, i32
  }
  func.func @transform_3(%arg0: i32) -> (i32, i32, i32, i32) {
    %c0_i32 = arith.constant 0 : i32
    %c0_i32_0 = arith.constant 0 : i32
    %c0_i32_1 = arith.constant 0 : i32
    %c0_i32_2 = arith.constant 0 : i32
    return %arg0, %c0_i32, %c0_i32_0, %c0_i32_1 : i32, i32, i32, i32
  }
}

</mosaic_0001>

<bundles_post_ra>
// kernel: tpu_custom_call.1
= control target key start
LH: loop header
LB: loop body
LE: loop exit
PB: predicated region body
PF: predicated region fallthrough
CT: control target
= control target key end

     0   :  { %s5173_s12 = smov 0   ;;  %s6863_s0 = inlined_call_operand.vmem [shape: f32[2,34,18,128], index: 0, kind: input, shape index: {}]   ;;  %s6864_s1 = inlined_call_operand.vmem [shape: bf16[1152,128], index: 1, kind: input, shape index: {}]   ;;  %s6865_s2 = inlined_call_operand.vmem [shape: f32[1,128], index: 2, kind: input, shape index: {}]   ;;  %s6866_s3 = inlined_call_operand.vmem [shape: f32[2,18,10,128], index: 3, kind: output, shape index: {}]  }
   0x1 LB: > { %s4038_s13 = sadd.s32 4294967295, %s5148_s12   ;;  %p4042_p0 = scmp.ge.s32.totalorder %s5148_s12, 1  ;;  %s5148_s12 = sphi %s5173_s12, %s13_s12  }
   0x2   : > { %p137_p1 = scmp.lt.s32.totalorder %s5148_s12, 3 }
   0x4   : > { %p138_p2 = pnand %p4042_p0, %p137_p1 }
   0x6   : > { %141 = sbr.rel (%p138_p2) target bundleno = 879 (0x36f), region = 32 }
   0xd   : > { %v5069_v0 = vld [vmem:[%s6864_s1] sm:$0xff]   ;;  %v5150_v1 = vmov 0   ;;  %v5071_v3 = vld [vmem:[%s6864_s1 + $0x8] sm:$0xff]   ;;  %v5073_v5 = vld [vmem:[%s6864_s1 + $0x10] sm:$0xff]   ;;  %p161_p3 = scmp.lt.s32.totalorder %s4038_s13, 1 }
   0xe   : > { %1621 = vmatprep.subr.bf16.mxu1 %v5150_v1  ;;  %1910 = vmatprep.subr.bf16.mxu0 %v5150_v1  ;;  %v5189_v2 = vld [vmem:[%s6864_s1 + $0x80] sm:$0xff]   ;;  %v5199_v4 = vld [vmem:[%s6864_s1 + $0x88] sm:$0xff]   ;;  %v5210_v6 = vld [vmem:[%s6864_s1 + $0x90] sm:$0xff]  }
   0xf   : > { %1622 = vmatpush1.bf16.msra.mxu1 %v5069_v0  ;;  %1911 = vmatpush1.bf16.msra.mxu0 %v5189_v2  ;;  %v5075_v7 = vld [vmem:[%s6864_s1 + $0x18] sm:$0xff]   ;;  %v5077_v9 = vld [vmem:[%s6864_s1 + $0x20] sm:$0xff]   ;;  %v5079_v11 = vld [vmem:[%s6864_s1 + $0x28] sm:$0xff]   ;;  %s6922_s13 = smov (!%p161_p3, %s4038_s13), 1 }
  0x10   : > { %1623 = vmatprep.subr.bf16.mxu1 %v5150_v1  ;;  %1912 = vmatprep.subr.bf16.mxu0 %v5150_v1  ;;  %v5221_v8 = vld [vmem:[%s6864_s1 + $0x98] sm:$0xff]   ;;  %v5232_v10 = vld [vmem:[%s6864_s1 + $0xa0] sm:$0xff]   ;;  %v5245_v12 = vld [vmem:[%s6864_s1 + $0xa8] sm:$0xff]   ;;  %s5056_s17 = smul.u32 816, %s6922_s13 }
  0x11   : > { %v5081_v13 = vld [vmem:[%s6864_s1 + $0x30] sm:$0xff]   ;;  %v5083_v15 = vld [vmem:[%s6864_s1 + $0x38] sm:$0xff]   ;;  %v5085_v17 = vld [vmem:[%s6864_s1 + $0x40] sm:$0xff]   ;;  %s5057_s18 = smul.u32 288, %s6922_s13 }
  0x12   : > { %v5260_v14 = vld [vmem:[%s6864_s1 + $0xb0] sm:$0xff]   ;;  %v5272_v16 = vld [vmem:[%s6864_s1 + $0xb8] sm:$0xff]   ;;  %s5278_s24 = scalar_lea.vmem %s6863_s0, %s5056_s17  ;;  %v5288_v18 = vld [vmem:[%s6864_s1 + $0xc0] sm:$0xff]  }
  0x13   : > { %1624 = vmatpush1.bf16.msra.mxu1 %v5071_v3  ;;  %1913 = vmatpush1.bf16.msra.mxu0 %v5199_v4  ;;  %v236_v19 = vld [vmem:[%s5278_s24 + $0x1] sm:$0xff]  ;;  %v237_v20 = vld [vmem:[%s5278_s24 + $0x9] sm:$0xff]  ;;  %v4045_v21 = vld [vmem:[%s5278_s24 + $0x18] sm:$0xff]  ;;  %s6376_s21 = scalar_lea.vmem %s6866_s3, %s5057_s18 }
  0x14   : > { %1625 = vmatprep.subr.bf16.mxu1 %v5150_v1  ;;  %1914 = vmatprep.subr.bf16.mxu0 %v5150_v1  ;;  %v751_v22 = vpack.c.bf16 %v237_v20, %v236_v19  ;;  %v4046_v23 = vld [vmem:[%s5278_s24 + $0x20] sm:$0xff]  ;;  %v5087_v24 = vld [vmem:[%s6864_s1 + $0x48] sm:$0xff]   ;;  %v5089_v27 = vld [vmem:[%s6864_s1 + $0x50] sm:$0xff]  }
  0x15   : > { %v5298_v25 = vpack.c.bf16 %v4046_v23, %v4045_v21  ;;  %v5305_v26 = vld [vmem:[%s6864_s1 + $0xc8] sm:$0xff]   ;;  %v5317_v28 = vld [vmem:[%s6864_s1 + $0xd0] sm:$0xff]   ;;  %v5091_v29 = vld [vmem:[%s6864_s1 + $0x58] sm:$0xff]  }
  0x16   : > { %1653 = vmatprep.mubr.bf16.mxu1 %v751_v22  ;;  %v5328_v30 = vld [vmem:[%s6864_s1 + $0xd8] sm:$0xff]   ;;  %v5093_v31 = vld [vmem:[%s6864_s1 + $0x60] sm:$0xff]   ;;  %v5095_v33 = vld [vmem:[%s6864_s1 + $0x68] sm:$0xff]  }
  0x17   : > { %1626 = vmatpush1.bf16.msra.mxu1 %v5073_v5  ;;  %1915 = vmatpush1.bf16.msra.mxu0 %v5210_v6  ;;  %v5339_v32 = vld [vmem:[%s6864_s1 + $0xe0] sm:$0xff]   ;;  %v5350_v34 = vld [vmem:[%s6864_s1 + $0xe8] sm:$0xff]   ;;  %v5097_v35 = vld [vmem:[%s6864_s1 + $0x70] sm:$0xff]  }
  0x18   : > { %1627 = vmatprep.subr.bf16.mxu1 %v5150_v1  ;;  %1916 = vmatprep.subr.bf16.mxu0 %v5150_v1  ;;  %v5361_v36 = vld [vmem:[%s6864_s1 + $0xf0] sm:$0xff]   ;;  %v5099_v37 = vld [vmem:[%s6864_s1 + $0x78] sm:$0xff]   ;;  %v172_v39 = vld [vmem:[%s5278_s24] sm:$0xff] }
  0x19   : > { %1942 = vmatprep.mubr.bf16.mxu0 %v5298_v25  ;;  %v5370_v38 = vld [vmem:[%s6864_s1 + $0xf8] sm:$0xff]   ;;  %v173_v40 = vld [vmem:[%s5278_s24 + $0x8] sm:$0xff]  ;;  %v4047_v46 = vld [vmem:[%s5278_s24 + $0x30] sm:$0xff] }
  0x1a   : > { %v300_v41 = vld [vmem:[%s5278_s24 + $0x2] sm:$0xff]  ;;  %v301_v42 = vld [vmem:[%s5278_s24 + $0xa] sm:$0xff]  ;;  %v238_v43 = vld [vmem:[%s5278_s24 + $0x19] sm:$0xff]  ;;  %v750_v45 = vpack.c.bf16 %v173_v40, %v172_v39 }
  0x1b   : > { %1628 = vmatpush1.bf16.msra.mxu1 %v5075_v7  ;;  %1917 = vmatpush1.bf16.msra.mxu0 %v5221_v8  ;;  %v239_v44 = vld [vmem:[%s5278_s24 + $0x21] sm:$0xff]  ;;  %v4048_v47 = vld [vmem:[%s5278_s24 + $0x38] sm:$0xff]  ;;  %v752_v48 = vpack.c.bf16 %v301_v42, %v300_v41  ;;  %v4050_v58 = vld [vmem:[%s5278_s24 + $0x50] sm:$0xff] }
  0x1c   : > { %1629 = vmatprep.subr.bf16.mxu1 %v5150_v1  ;;  %1918 = vmatprep.subr.bf16.mxu0 %v5150_v1  ;;  %v5101_v49 = vld [vmem:[%s6864_s1 + $0x100] sm:$0xff]   ;;  %v5388_v50 = vpack.c.bf16 %v239_v44, %v238_v43  ;;  %v762_v51 = vpack.c.bf16 %v4048_v47, %v4047_v46  ;;  %v5102_v52 = vld [vmem:[%s6864_s1 + $0x108] sm:$0xff]   ;;  %v240_v55 = vld [vmem:[%s5278_s24 + $0x31] sm:$0xff] }
  0x1d   : > { %v302_v53 = vld [vmem:[%s5278_s24 + $0x1a] sm:$0xff]  ;;  %v303_v54 = vld [vmem:[%s5278_s24 + $0x22] sm:$0xff]  ;;  %v5103_v61 = vld [vmem:[%s6864_s1 + $0x110] sm:$0xff]  }
  0x1e   : > { %v241_v56 = vld [vmem:[%s5278_s24 + $0x39] sm:$0xff]  ;;  %v4049_v57 = vld [vmem:[%s5278_s24 + $0x48] sm:$0xff]  ;;  %v5404_v59 = vpack.c.bf16 %v303_v54, %v302_v53 }
  0x1f   : > { %1630 = vmatpush1.bf16.msra.mxu1 %v5077_v9  ;;  %1919 = vmatpush1.bf16.msra.mxu0 %v5232_v10  ;;  %v5406_v60 = vpack.c.bf16 %v241_v56, %v240_v55  ;;  %v771_v62 = vpack.c.bf16 %v4050_v58, %v4049_v57  ;;  %v5104_v63 = vld [vmem:[%s6864_s1 + $0x118] sm:$0xff]   ;;  %v242_v3 = vld [vmem:[%s5278_s24 + $0x49] sm:$0xff]  ;;  %v4051_v5 = vld [vmem:[%s5278_s24 + $0x60] sm:$0xff] }
  0x20   : > { %1631 = vmatprep.subr.bf16.mxu1 %v5150_v1  ;;  %1920 = vmatprep.subr.bf16.mxu0 %v5150_v1  ;;  %v304_v0 = vld [vmem:[%s5278_s24 + $0x32] sm:$0xff]  ;;  %v4052_v7 = vld [vmem:[%s5278_s24 + $0x68] sm:$0xff]  ;;  %v4054_v22 = vld [vmem:[%s5278_s24 + $0x80] sm:$0xff] }
  0x21   : > { %v307_v19 = vld [vmem:[%s5278_s24 + $0x52] sm:$0xff]  ;;  %v244_v20 = vld [vmem:[%s5278_s24 + $0x61] sm:$0xff]  ;;  %v245_v21 = vld [vmem:[%s5278_s24 + $0x69] sm:$0xff] }
  0x22   : > { %v4056_v39 = vld [vmem:[%s5278_s24 + $0x98] sm:$0xff]  ;;  %v311_v44 = vld [vmem:[%s5278_s24 + $0x82] sm:$0xff] }
  0x23   : > { %1632 = vmatpush1.bf16.msra.mxu1 %v5079_v11  ;;  %1921 = vmatpush1.bf16.msra.mxu0 %v5245_v12  ;;  %v310_v43 = vld [vmem:[%s5278_s24 + $0x7a] sm:$0xff]  ;;  %v4057_v47 = vld [vmem:[%s5278_s24 + $0xa8] sm:$0xff]  ;;  %v312_v53 = vld [vmem:[%s5278_s24 + $0x92] sm:$0xff] }
  0x24   : > { %1633 = vmatprep.subr.bf16.mxu1 %v5150_v1  ;;  %1922 = vmatprep.subr.bf16.mxu0 %v5150_v1  ;;  %v249_v46 = vld [vmem:[%s5278_s24 + $0x99] sm:$0xff]  ;;  %v250_v55 = vld [vmem:[%s5278_s24 + $0xa9] sm:$0xff]  ;;  %v251_v56 = vld [vmem:[%s5278_s24 + $0xb1] sm:$0xff] }
  0x25   : > { %v313_v54 = vld [vmem:[%s5278_s24 + $0x9a] sm:$0xff]  ;;  %v4060_v57 = vld [vmem:[%s5278_s24 + $0xc8] sm:$0xff] }
  0x26   : > { %v5525_v58 = vpack.c.bf16 %v313_v54, %v312_v53  ;;  %v5127_v53 = vld [vmem:[%s6864_s1 + $0x1d0] sm:$0xff]  }
  0x27   : > { %1634 = vmatpush1.bf16.msra.mxu1 %v5081_v13  ;;  %1923 = vmatpush1.bf16.msra.mxu0 %v5260_v14  ;;  %v5105_v13 = vld [vmem:[%s6864_s1 + $0x120] sm:$0xff]   ;;  %v200_v54 = vld [vmem:[%s5278_s24 + $0x150] sm:$0xff] }
  0x28   : > { %1635 = vmatprep.subr.bf16.mxu1 %v5150_v1  ;;  %1924 = vmatprep.subr.bf16.mxu0 %v5150_v1 }
  0x2b   : > { %1636 = vmatpush1.bf16.msra.mxu1 %v5083_v15  ;;  %1925 = vmatpush1.bf16.msra.mxu0 %v5272_v16  ;;  %v780_v15 = vpack.c.bf16 %v4052_v7, %v4051_v5  ;;  %v5115_v7 = vld [vmem:[%s6864_s1 + $0x170] sm:$0xff]  }
  0x2c   : > { %1637 = vmatprep.subr.bf16.mxu1 %v5150_v1  ;;  %1926 = vmatprep.subr.bf16.mxu0 %v5150_v1 }
  0x2f   : > { %1638 = vmatpush1.bf16.msra.mxu1 %v5085_v17  ;;  %1927 = vmatpush1.bf16.msra.mxu0 %v5288_v18  ;;  %v306_v17 = vld [vmem:[%s5278_s24 + $0x4a] sm:$0xff] }
  0x30   : > { %1639 = vmatprep.subr.bf16.mxu1 %v5150_v1  ;;  %1928 = vmatprep.subr.bf16.mxu0 %v5150_v1  ;;  %v5453_v23 = vpack.c.bf16 %v307_v19, %v306_v17  ;;  %v256_v17 = vld [vmem:[%s5278_s24 + $0xf1] sm:$0xff]  ;;  %v257_v19 = vld [vmem:[%s5278_s24 + $0xf9] sm:$0xff] }
  0x33   : > { %1640 = vmatpush1.bf16.msra.mxu1 %v5087_v24  ;;  %1929 = vmatpush1.bf16.msra.mxu0 %v5305_v26  ;;  %v5455_v24 = vpack.c.bf16 %v245_v21, %v244_v20  ;;  %v5588_v20 = vpack.c.bf16 %v257_v19, %v256_v17  ;;  %v5119_v21 = vld [vmem:[%s6864_s1 + $0x190] sm:$0xff]   ;;  %v4192_v19 = vld [vmem:[%s5278_s24 + $0xfa] sm:$0xff] }
  0x34   : > { %1641 = vmatprep.subr.bf16.mxu1 %v5150_v1  ;;  %1930 = vmatprep.subr.bf16.mxu0 %v5150_v1  ;;  %v4191_v17 = vld [vmem:[%s5278_s24 + $0xf2] sm:$0xff] }
  0x37   : > { %1642 = vmatpush1.bf16.msra.mxu1 %v5089_v27  ;;  %1931 = vmatpush1.bf16.msra.mxu0 %v5317_v28 }
  0x38   : > { %1643 = vmatprep.subr.bf16.mxu1 %v5150_v1  ;;  %1932 = vmatprep.subr.bf16.mxu0 %v5150_v1 }
  0x3b   : > { %1644 = vmatpush1.bf16.msra.mxu1 %v5091_v29  ;;  %1933 = vmatpush1.bf16.msra.mxu0 %v5328_v30  ;;  %v308_v29 = vld [vmem:[%s5278_s24 + $0x62] sm:$0xff] }
  0x3c   : > { %1645 = vmatprep.subr.bf16.mxu1 %v5150_v1  ;;  %1934 = vmatprep.subr.bf16.mxu0 %v5150_v1 }
  0x3f   : > { %1646 = vmatpush1.bf16.msra.mxu1 %v5093_v31  ;;  %1935 = vmatpush1.bf16.msra.mxu0 %v5339_v32  ;;  %v309_v31 = vld [vmem:[%s5278_s24 + $0x6a] sm:$0xff] }
  0x40   : > { %1647 = vmatprep.subr.bf16.mxu1 %v5150_v1  ;;  %1936 = vmatprep.subr.bf16.mxu0 %v5150_v1  ;;  %v5480_v40 = vpack.c.bf16 %v309_v31, %v308_v29  ;;  %v194_v29 = vld [vmem:[%s5278_s24 + $0x108] sm:$0xff]  ;;  %v195_v31 = vld [vmem:[%s5278_s24 + $0x110] sm:$0xff] }
  0x43   : > { %1648 = vmatpush1.bf16.msra.mxu1 %v5095_v33  ;;  %1937 = vmatpush1.bf16.msra.mxu0 %v5350_v34  ;;  %v246_v33 = vld [vmem:[%s5278_s24 + $0x79] sm:$0xff] }
  0x44   : > { %1649 = vmatprep.subr.bf16.mxu1 %v5150_v1  ;;  %1938 = vmatprep.subr.bf16.mxu0 %v5150_v1 }
  0x47   : > { %1650 = vmatpush1.bf16.msra.mxu1 %v5097_v35  ;;  %1939 = vmatpush1.bf16.msra.mxu0 %v5361_v36  ;;  %v247_v35 = vld [vmem:[%s5278_s24 + $0x81] sm:$0xff] }
  0x48   : > { %1651 = vmatprep.subr.bf16.mxu1 %v5150_v1  ;;  %1940 = vmatprep.subr.bf16.mxu0 %v5150_v1  ;;  %v5482_v41 = vpack.c.bf16 %v247_v35, %v246_v33  ;;  %v260_v33 = vld [vmem:[%s5278_s24 + $0x121] sm:$0xff]  ;;  %v261_v35 = vld [vmem:[%s5278_s24 + $0x129] sm:$0xff] }
  0x4b   : > { %1652 = vmatpush1.bf16.msra.mxu1 %v5099_v37  ;;  %1941 = vmatpush1.bf16.msra.mxu0 %v5370_v38  ;;  %v4055_v37 = vld [vmem:[%s5278_s24 + $0x90] sm:$0xff] }
  0x4c   : > { %4640 = vmatprep.subr.bf16.mxu1 %v5150_v1  ;;  %2199 = vmatprep.subr.bf16.mxu0 %v5150_v1  ;;  %v798_v42 = vpack.c.bf16 %v4056_v39, %v4055_v37  ;;  %v5122_v37 = vld [vmem:[%s6864_s1 + $0x1a8] sm:$0xff]   ;;  %v5628_v39 = vpack.c.bf16 %v261_v35, %v260_v33 }
  0x4e   : > { %1654 = vmatmul.mubr.bf16.vlgmr.msra.gmra.mrb[0].mxu1 %v750_v45  ;;  %1943 = vmatmul.mubr.bf16.vlgmr.msra.gmra.mrb[0].mxu0 %v752_v48  ;;  %v248_v45 = vld [vmem:[%s5278_s24 + $0x91] sm:$0xff] }
  0x4f   : > { %4656 = vmatpush1.bf16.msra.mxu1 %v5189_v2  ;;  %2200 = vmatpush1.bf16.msra.mxu0 %v5101_v49  ;;  %v305_v2 = vld [vmem:[%s5278_s24 + $0x3a] sm:$0xff]  ;;  %v5111_v48 = vld [vmem:[%s6864_s1 + $0x150] sm:$0xff]   ;;  %v5504_v49 = vpack.c.bf16 %v311_v44, %v310_v43 }
  0x50   : > { %1661 = vmatprep.mubr.bf16.mxu1 %v5388_v50  ;;  %2201 = vmatprep.subr.bf16.mxu0 %v5150_v1  ;;  %v5429_v9 = vpack.c.bf16 %v305_v2, %v304_v0  ;;  %v314_v0 = vld [vmem:[%s5278_s24 + $0xaa] sm:$0xff]  ;;  %v315_v2 = vld [vmem:[%s5278_s24 + $0xb2] sm:$0xff]  ;;  %v263_v43 = vld [vmem:[%s5278_s24 + $0x141] sm:$0xff] }
  0x51   : > { %1950 = vmatprep.mubr.bf16.mxu0 %v762_v51  ;;  %4641 = vmatprep.subr.bf16.mxu1 %v5150_v1  ;;  %v5124_v44 = vld [vmem:[%s6864_s1 + $0x1b8] sm:$0xff]  }
  0x53   : > { %4657 = vmatpush1.bf16.msra.mxu1 %v5199_v4  ;;  %2202 = vmatpush1.bf16.msra.mxu0 %v5102_v52  ;;  %v243_v4 = vld [vmem:[%s5278_s24 + $0x51] sm:$0xff] }
  0x54   : > { %4642 = vmatprep.subr.bf16.mxu1 %v5150_v1  ;;  %2203 = vmatprep.subr.bf16.mxu0 %v5150_v1  ;;  %v5431_v11 = vpack.c.bf16 %v243_v4, %v242_v3  ;;  %v252_v3 = vld [vmem:[%s5278_s24 + $0xc1] sm:$0xff]  ;;  %v253_v4 = vld [vmem:[%s5278_s24 + $0xc9] sm:$0xff] }
  0x55   : > { %v5549_v5 = vpack.c.bf16 %v253_v4, %v252_v3  ;;  %v268_v3 = vld [vmem:[%s5278_s24 + $0x181] sm:$0xff]  ;;  %v269_v4 = vld [vmem:[%s5278_s24 + $0x189] sm:$0xff] }
  0x56   : > { %1662 = vmatmul.mubr.bf16.gmra.mrb[4].mxu1 %v5298_v25  ;;  %1951 = vmatmul.mubr.bf16.gmra.mrb[4].mxu0 %v5404_v59  ;;  %v5107_v25 = vld [vmem:[%s6864_s1 + $0x130] sm:$0xff]  }
  0x57   : > { %1669 = vmatprep.mubr.bf16.mxu1 %v5406_v60  ;;  %2204 = vmatpush1.bf16.msra.mxu0 %v5103_v61  ;;  %v5527_v61 = vpack.c.bf16 %v251_v56, %v250_v55  ;;  %v201_v55 = vld [vmem:[%s5278_s24 + $0x158] sm:$0xff]  ;;  %v266_v56 = vld [vmem:[%s5278_s24 + $0x169] sm:$0xff] }
  0x58   : > { %1958 = vmatprep.mubr.bf16.mxu0 %v771_v62  ;;  %2205 = vmatprep.subr.bf16.mxu0 %v5150_v1 }
  0x59   : > { %4658 = vmatpush1.bf16.msra.mxu1 %v5210_v6  ;;  %v5106_v6 = vld [vmem:[%s6864_s1 + $0x128] sm:$0xff]  }
  0x5a   : > { %4643 = vmatprep.subr.bf16.mxu1 %v5150_v1 }
  0x5b   : > { %2206 = vmatpush1.bf16.msra.mxu0 %v5104_v63 }
  0x5c   : > { %2207 = vmatprep.subr.bf16.mxu0 %v5150_v1 }
  0x5d   : > { %4659 = vmatpush1.bf16.msra.mxu1 %v5221_v8  ;;  %v4053_v8 = vld [vmem:[%s5278_s24 + $0x78] sm:$0xff] }
  0x5e   : > { %1670 = vmatmul.mubr.bf16.gmra.mrb[8].mxu1 %v762_v51  ;;  %4644 = vmatprep.subr.bf16.mxu1 %v5150_v1  ;;  %v789_v27 = vpack.c.bf16 %v4054_v22, %v4053_v8  ;;  %v5506_v51 = vpack.c.bf16 %v249_v46, %v248_v45  ;;  %v193_v8 = vld [vmem:[%s5278_s24 + $0xf8] sm:$0xff]  ;;  %v258_v22 = vld [vmem:[%s5278_s24 + $0x109] sm:$0xff]  ;;  %v5125_v46 = vld [vmem:[%s6864_s1 + $0x1c0] sm:$0xff]  }
  0x5f   : > { %1959 = vmatmul.mubr.bf16.gmra.mrb[8].mxu0 %v5429_v9  ;;  %1677 = vmatprep.mubr.bf16.mxu1 %v5431_v11 }
  0x60   : > { %2208 = vmatpush1.bf16.msra.mxu0 %v5105_v13  ;;  %1966 = vmatprep.mubr.bf16.mxu0 %v780_v15  ;;  %v254_v13 = vld [vmem:[%s5278_s24 + $0xd9] sm:$0xff] }
  0x61   : > { %2209 = vmatprep.subr.bf16.mxu0 %v5150_v1  ;;  %4660 = vmatpush1.bf16.msra.mxu1 %v5232_v10  ;;  %v5108_v10 = vld [vmem:[%s6864_s1 + $0x138] sm:$0xff]  }
  0x62   : > { %4645 = vmatprep.subr.bf16.mxu1 %v5150_v1 }
  0x64   : > { %2210 = vmatpush1.bf16.msra.mxu0 %v5106_v6  ;;  %v5117_v6 = vld [vmem:[%s6864_s1 + $0x180] sm:$0xff]  }
  0x65   : > { %2211 = vmatprep.subr.bf16.mxu0 %v5150_v1  ;;  %4661 = vmatpush1.bf16.msra.mxu1 %v5245_v12  ;;  %v5109_v12 = vld [vmem:[%s6864_s1 + $0x140] sm:$0xff]  }
  0x66   : > { %1678 = vmatmul.mubr.bf16.gmra.mrb[12].mxu1 %v771_v62  ;;  %4646 = vmatprep.subr.bf16.mxu1 %v5150_v1  ;;  %v5113_v62 = vld [vmem:[%s6864_s1 + $0x160] sm:$0xff]  }
  0x67   : > { %1967 = vmatmul.mubr.bf16.gmra.mrb[12].mxu0 %v5453_v23  ;;  %1685 = vmatprep.mubr.bf16.mxu1 %v5455_v24 }
  0x68   : > { %2212 = vmatpush1.bf16.msra.mxu0 %v5107_v25  ;;  %1974 = vmatprep.mubr.bf16.mxu0 %v789_v27  ;;  %v259_v25 = vld [vmem:[%s5278_s24 + $0x111] sm:$0xff] }
  0x69   : > { %2213 = vmatprep.subr.bf16.mxu0 %v5150_v1  ;;  %4662 = vmatpush1.bf16.msra.mxu1 %v5260_v14  ;;  %v5110_v14 = vld [vmem:[%s6864_s1 + $0x148] sm:$0xff]  }
  0x6a   : > { %4647 = vmatprep.subr.bf16.mxu1 %v5150_v1 }
  0x6c   : > { %2214 = vmatpush1.bf16.msra.mxu0 %v5108_v10  ;;  %v5608_v10 = vpack.c.bf16 %v259_v25, %v258_v22  ;;  %v5129_v22 = vld [vmem:[%s6864_s1 + $0x1e0] sm:$0xff]  }
  0x6d   : > { %2215 = vmatprep.subr.bf16.mxu0 %v5150_v1  ;;  %4663 = vmatpush1.bf16.msra.mxu1 %v5272_v16  ;;  %v4058_v16 = vld [vmem:[%s5278_s24 + $0xb0] sm:$0xff]  ;;  %v5738_v25 = vld [vmem:[%s6864_s1 + $0x200] sm:$0xff]  }
  0x6e   : > { %1686 = vmatmul.mubr.bf16.gmra.mrb[16].mxu1 %v780_v15  ;;  %4648 = vmatprep.subr.bf16.mxu1 %v5150_v1  ;;  %v807_v52 = vpack.c.bf16 %v4058_v16, %v4057_v47  ;;  %v255_v15 = vld [vmem:[%s5278_s24 + $0xe1] sm:$0xff]  ;;  %v198_v47 = vld [vmem:[%s5278_s24 + $0x138] sm:$0xff] }
  0x6f   : > { %1975 = vmatmul.mubr.bf16.gmra.mrb[16].mxu0 %v5480_v40  ;;  %1693 = vmatprep.mubr.bf16.mxu1 %v5482_v41  ;;  %v199_v16 = vld [vmem:[%s5278_s24 + $0x140] sm:$0xff] }
  0x70   : > { %2216 = vmatpush1.bf16.msra.mxu0 %v5109_v12  ;;  %1982 = vmatprep.mubr.bf16.mxu0 %v798_v42  ;;  %v5123_v12 = vld [vmem:[%s6864_s1 + $0x1b0] sm:$0xff]  }
  0x71   : > { %2217 = vmatprep.subr.bf16.mxu0 %v5150_v1  ;;  %4664 = vmatpush1.bf16.msra.mxu1 %v5288_v18  ;;  %v5112_v18 = vld [vmem:[%s6864_s1 + $0x158] sm:$0xff]  }
  0x72   : > { %4649 = vmatprep.subr.bf16.mxu1 %v5150_v1 }
  0x74   : > { %2218 = vmatpush1.bf16.msra.mxu0 %v5110_v14  ;;  %v262_v14 = vld [vmem:[%s5278_s24 + $0x139] sm:$0xff] }
  0x75   : > { %2219 = vmatprep.subr.bf16.mxu0 %v5150_v1  ;;  %4665 = vmatpush1.bf16.msra.mxu1 %v5305_v26  ;;  %v4059_v26 = vld [vmem:[%s5278_s24 + $0xc0] sm:$0xff]  ;;  %v5648_v45 = vpack.c.bf16 %v263_v43, %v262_v14  ;;  %v4196_v43 = vld [vmem:[%s5278_s24 + $0x12a] sm:$0xff] }
  0x76   : > { %1694 = vmatmul.mubr.bf16.gmra.mrb[20].mxu1 %v789_v27  ;;  %4650 = vmatprep.subr.bf16.mxu1 %v5150_v1  ;;  %v816_v63 = vpack.c.bf16 %v4060_v57, %v4059_v26  ;;  %v5120_v27 = vld [vmem:[%s6864_s1 + $0x198] sm:$0xff]   ;;  %v4187_v57 = vld [vmem:[%s5278_s24 + $0xc2] sm:$0xff] }
  0x77   : > { %1983 = vmatmul.mubr.bf16.gmra.mrb[20].mxu0 %v5504_v49  ;;  %1701 = vmatprep.mubr.bf16.mxu1 %v5506_v51  ;;  %v267_v26 = vld [vmem:[%s5278_s24 + $0x171] sm:$0xff]  ;;  %v4195_v14 = vld [vmem:[%s5278_s24 + $0x122] sm:$0xff] }
  0x78   : > { %2220 = vmatpush1.bf16.msra.mxu0 %v5111_v48  ;;  %1990 = vmatprep.mubr.bf16.mxu0 %v807_v52  ;;  %v264_v48 = vld [vmem:[%s5278_s24 + $0x151] sm:$0xff] }
  0x79   : > { %2221 = vmatprep.subr.bf16.mxu0 %v5150_v1  ;;  %4666 = vmatpush1.bf16.msra.mxu1 %v5317_v28  ;;  %v5114_v28 = vld [vmem:[%s6864_s1 + $0x168] sm:$0xff]  }
  0x7a   : > { %4651 = vmatprep.subr.bf16.mxu1 %v5150_v1 }
  0x7c   : > { %2222 = vmatpush1.bf16.msra.mxu0 %v5112_v18 }
  0x7d   : > { %2223 = vmatprep.subr.bf16.mxu0 %v5150_v1  ;;  %4667 = vmatpush1.bf16.msra.mxu1 %v5328_v30  ;;  %v5547_v30 = vpack.c.bf16 %v315_v2, %v314_v0  ;;  %v203_v0 = vld [vmem:[%s5278_s24 + $0x170] sm:$0xff]  ;;  %v5128_v2 = vld [vmem:[%s6864_s1 + $0x1d8] sm:$0xff]  }
  0x7e   : > { %1702 = vmatmul.mubr.bf16.gmra.mrb[24].mxu1 %v798_v42  ;;  %4652 = vmatprep.subr.bf16.mxu1 %v5150_v1  ;;  %v197_v42 = vld [vmem:[%s5278_s24 + $0x128] sm:$0xff] }
  0x7f   : > { %1991 = vmatmul.mubr.bf16.gmra.mrb[24].mxu0 %v5525_v58  ;;  %1709 = vmatprep.mubr.bf16.mxu1 %v5527_v61 }
  0x80   : > { %2224 = vmatpush1.bf16.msra.mxu0 %v5113_v62  ;;  %1998 = vmatprep.mubr.bf16.mxu0 %v816_v63  ;;  %v5687_v62 = vpack.c.bf16 %v267_v26, %v266_v56  ;;  %v212_v26 = vld [vmem:[%s5278_s24 + $0x1e0] sm:$0xff] }
  0x81   : > { %2225 = vmatprep.subr.bf16.mxu0 %v5150_v1  ;;  %4668 = vmatpush1.bf16.msra.mxu1 %v5339_v32  ;;  %v5116_v32 = vld [vmem:[%s6864_s1 + $0x178] sm:$0xff]  }
  0x82   : > { %4653 = vmatprep.subr.bf16.mxu1 %v5150_v1 }
  0x84   : > { %2226 = vmatpush1.bf16.msra.mxu0 %v5114_v28  ;;  %v202_v28 = vld [vmem:[%s5278_s24 + $0x168] sm:$0xff] }
  0x85   : > { %2227 = vmatprep.subr.bf16.mxu0 %v5150_v1  ;;  %4669 = vmatpush1.bf16.msra.mxu1 %v5350_v34  ;;  %v5568_v34 = vpack.c.bf16 %v255_v15, %v254_v13  ;;  %v204_v15 = vld [vmem:[%s5278_s24 + $0x180] sm:$0xff] }
  0x86   : > { %1710 = vmatmul.mubr.bf16.gmra.mrb[28].mxu1 %v807_v52  ;;  %4654 = vmatprep.subr.bf16.mxu1 %v5150_v1  ;;  %v5126_v52 = vld [vmem:[%s6864_s1 + $0x1c8] sm:$0xff]  }
  0x87   : > { %1999 = vmatmul.mubr.bf16.gmra.mrb[28].mxu0 %v5547_v30  ;;  %1717 = vmatprep.mubr.bf16.mxu1 %v5549_v5 }
  0x88   : > { %2228 = vmatpush1.bf16.msra.mxu0 %v5115_v7  ;;  %2231 = vmatprep.mubr.bf16.mxu0 %v5404_v59  ;;  %v190_v59 = vld [vmem:[%s5278_s24 + $0xd8] sm:$0xff]  ;;  %v5704_v7 = vpack.c.bf16 %v203_v0, %v202_v28  ;;  %v279_v28 = vld [vmem:[%s5278_s24 + $0x201] sm:$0xff] }
  0x89   : > { %2229 = vmatprep.subr.bf16.mxu0 %v5150_v1  ;;  %4670 = vmatpush1.bf16.msra.mxu1 %v5361_v36  ;;  %v191_v36 = vld [vmem:[%s5278_s24 + $0xe0] sm:$0xff]  ;;  %v4199_v0 = vld [vmem:[%s5278_s24 + $0x152] sm:$0xff] }
  0x8a   : > { %4655 = vmatprep.subr.bf16.mxu1 %v5150_v1 }
  0x8c   : > { %2230 = vmatpush1.bf16.msra.mxu0 %v5116_v32  ;;  %v5707_v32 = vpack.c.bf16 %v269_v4, %v268_v3 }
  0x8d   : > { %2488 = vmatprep.subr.bf16.mxu0 %v5150_v1  ;;  %4671 = vmatpush1.bf16.msra.mxu1 %v5370_v38  ;;  %v5118_v38 = vld [vmem:[%s6864_s1 + $0x188] sm:$0xff]  }
  0x8e   : > { %1718 = vmatmul.mubr.bf16.gmra.mrb[32].mxu1 %v816_v63  ;;  %4560 = vmatprep.subr.bf16.mxu1 %v5738_v25 }
  0x8f   : > { %2232 = vmatmul.mubr.bf16.vlgmr.msra.gmra.mrb[0].mxu0 %v5388_v50  ;;  %1725 = vmatprep.mubr.bf16.mxu1 %v5568_v34  ;;  %v5586_v50 = vpack.c.bf16 %v191_v36, %v190_v59  ;;  %v270_v59 = vld [vmem:[%s5278_s24 + $0x199] sm:$0xff]  ;;  %v271_v36 = vld [vmem:[%s5278_s24 + $0x1a1] sm:$0xff] }
  0x90   : > { %2489 = vmatpush1.bf16.msra.mxu0 %v5117_v6  ;;  %2239 = vmatprep.mubr.bf16.mxu0 %v5429_v9  ;;  %v192_v9 = vld [vmem:[%s5278_s24 + $0xf0] sm:$0xff]  ;;  %v205_v6 = vld [vmem:[%s5278_s24 + $0x188] sm:$0xff] }
  0x91   : > { %2490 = vmatprep.subr.bf16.mxu0 %v5150_v1 }
  0x94   : > { %2491 = vmatpush1.bf16.msra.mxu0 %v5118_v38  ;;  %v5721_v38 = vpack.c.bf16 %v205_v6, %v204_v15  ;;  %v5133_v15 = vld [vmem:[%s6864_s1 + $0x1f0] sm:$0xff]  }
  0x95   : > { %2492 = vmatprep.subr.bf16.mxu0 %v5150_v1  ;;  %v280_v6 = vld [vmem:[%s5278_s24 + $0x211] sm:$0xff] }
  0x96   : > { %1726 = vmatmul.mubr.bf16.gmra.mrb[36].mxu1 %v5586_v50 }
  0x97   : > { %2240 = vmatmul.mubr.bf16.gmra.mrb[4].mxu0 %v5406_v60  ;;  %1733 = vmatprep.mubr.bf16.mxu1 %v5588_v20  ;;  %v5606_v60 = vpack.c.bf16 %v193_v8, %v192_v9  ;;  %v206_v9 = vld [vmem:[%s5278_s24 + $0x198] sm:$0xff]  ;;  %v207_v8 = vld [vmem:[%s5278_s24 + $0x1a0] sm:$0xff] }
  0x98   : > { %2247 = vmatprep.mubr.bf16.mxu0 %v5453_v23  ;;  %2493 = vmatpush1.bf16.msra.mxu0 %v5119_v21  ;;  %v5121_v23 = vld [vmem:[%s6864_s1 + $0x1a0] sm:$0xff]   ;;  %v5723_v21 = vpack.c.bf16 %v271_v36, %v270_v59  ;;  %v4201_v36 = vld [vmem:[%s5278_s24 + $0x16a] sm:$0xff] }
  0x99   : > { %2494 = vmatprep.subr.bf16.mxu0 %v5150_v1  ;;  %v281_v59 = vld [vmem:[%s5278_s24 + $0x219] sm:$0xff] }
  0x9c   : > { %2495 = vmatpush1.bf16.msra.mxu0 %v5120_v27  ;;  %v272_v27 = vld [vmem:[%s5278_s24 + $0x1b1] sm:$0xff] }
  0x9d   : > { %2496 = vmatprep.subr.bf16.mxu0 %v5150_v1 }
  0x9e   : > { %1734 = vmatmul.mubr.bf16.gmra.mrb[40].mxu1 %v5606_v60 }
  0x9f   : > { %2248 = vmatmul.mubr.bf16.gmra.mrb[8].mxu0 %v5431_v11  ;;  %1741 = vmatprep.mubr.bf16.mxu1 %v5608_v10  ;;  %v5626_v11 = vpack.c.bf16 %v195_v31, %v194_v29  ;;  %v4194_v29 = vld [vmem:[%s5278_s24 + $0x112] sm:$0xff]  ;;  %v5746_v31 = vpack.c.bf16 %v207_v8, %v206_v9 }
  0xa0   : > { %2255 = vmatprep.mubr.bf16.mxu0 %v5480_v40  ;;  %2497 = vmatpush1.bf16.msra.mxu0 %v5121_v23  ;;  %v196_v40 = vld [vmem:[%s5278_s24 + $0x120] sm:$0xff]  ;;  %v216_v8 = vld [vmem:[%s5278_s24 + $0x210] sm:$0xff] }
  0xa1   : > { %2498 = vmatprep.subr.bf16.mxu0 %v5150_v1  ;;  %v273_v23 = vld [vmem:[%s5278_s24 + $0x1b9] sm:$0xff] }
  0xa2   : > { %v5749_v33 = vpack.c.bf16 %v273_v23, %v272_v27  ;;  %v282_v27 = vld [vmem:[%s5278_s24 + $0x229] sm:$0xff] }
  0xa3   : > { %v4203_v23 = vld [vmem:[%s5278_s24 + $0x182] sm:$0xff] }
  0xa4   : > { %2499 = vmatpush1.bf16.msra.mxu0 %v5122_v37  ;;  %v208_v37 = vld [vmem:[%s5278_s24 + $0x1b0] sm:$0xff] }
  0xa5   : > { %2500 = vmatprep.subr.bf16.mxu0 %v5150_v1 }
  0xa6   : > { %1742 = vmatmul.mubr.bf16.gmra.mrb[44].mxu1 %v5626_v11 }
  0xa7   : > { %2256 = vmatmul.mubr.bf16.gmra.mrb[12].mxu0 %v5455_v24  ;;  %1749 = vmatprep.mubr.bf16.mxu1 %v5628_v39  ;;  %v5646_v24 = vpack.c.bf16 %v197_v42, %v196_v40  ;;  %v274_v40 = vld [vmem:[%s5278_s24 + $0x1c9] sm:$0xff]  ;;  %v275_v42 = vld [vmem:[%s5278_s24 + $0x1d1] sm:$0xff] }
  0xa8   : > { %2263 = vmatprep.mubr.bf16.mxu0 %v5504_v49  ;;  %2501 = vmatpush1.bf16.msra.mxu0 %v5123_v12  ;;  %v265_v49 = vld [vmem:[%s5278_s24 + $0x159] sm:$0xff] }
  0xa9   : > { %2502 = vmatprep.subr.bf16.mxu0 %v5150_v1  ;;  %v5668_v18 = vpack.c.bf16 %v265_v49, %v264_v48  ;;  %v209_v12 = vld [vmem:[%s5278_s24 + $0x1b8] sm:$0xff]  ;;  %v5131_v48 = vld [vmem:[%s6864_s1 + $0x1e8] sm:$0xff]  }
  0xaa   : > { %v276_v49 = vld [vmem:[%s5278_s24 + $0x1e1] sm:$0xff] }
  0xac   : > { %2503 = vmatpush1.bf16.msra.mxu0 %v5124_v44  ;;  %v5763_v44 = vpack.c.bf16 %v209_v12, %v208_v37  ;;  %v218_v12 = vld [vmem:[%s5278_s24 + $0x228] sm:$0xff] }
  0xad   : > { %2504 = vmatprep.subr.bf16.mxu0 %v5150_v1 }
  0xae   : > { %1750 = vmatmul.mubr.bf16.gmra.mrb[48].mxu1 %v5646_v24 }
  0xaf   : > { %2264 = vmatmul.mubr.bf16.gmra.mrb[16].mxu0 %v5482_v41  ;;  %1757 = vmatprep.mubr.bf16.mxu1 %v5648_v45  ;;  %v5666_v41 = vpack.c.bf16 %v199_v16, %v198_v47  ;;  %v210_v47 = vld [vmem:[%s5278_s24 + $0x1c8] sm:$0xff]  ;;  %v211_v16 = vld [vmem:[%s5278_s24 + $0x1d0] sm:$0xff] }
  0xb0   : > { %2271 = vmatprep.mubr.bf16.mxu0 %v5525_v58  ;;  %2505 = vmatpush1.bf16.msra.mxu0 %v5125_v46  ;;  %v4188_v58 = vld [vmem:[%s5278_s24 + $0xca] sm:$0xff]  ;;  %v5765_v46 = vpack.c.bf16 %v275_v42, %v274_v40  ;;  %v5134_v42 = vld [vmem:[%s6864_s1 + $0x1f8] sm:$0xff]  }
  0xb1   : > { %2506 = vmatprep.subr.bf16.mxu0 %v5150_v1  ;;  %v5689_v63 = vpack.c.bf16 %v4188_v58, %v4187_v57  ;;  %v213_v57 = vld [vmem:[%s5278_s24 + $0x1e8] sm:$0xff]  ;;  %v278_v58 = vld [vmem:[%s5278_s24 + $0x1f9] sm:$0xff]  ;;  %v219_v40 = vld [vmem:[%s5278_s24 + $0x230] sm:$0xff] }
  0xb2   : > { %v5799_v3 = vpack.c.bf16 %v213_v57, %v212_v26  ;;  %v5801_v4 = vpack.c.bf16 %v279_v28, %v278_v58  ;;  %v287_v26 = vld [vmem:[%s5278_s24 + $0x261] sm:$0xff]  ;;  %v4207_v57 = vld [vmem:[%s5278_s24 + $0x1b2] sm:$0xff] }
  0xb3   : > { %v4208_v58 = vld [vmem:[%s5278_s24 + $0x1ba] sm:$0xff] }
  0xb4   : > { %2507 = vmatpush1.bf16.msra.mxu0 %v5126_v52  ;;  %v277_v52 = vld [vmem:[%s5278_s24 + $0x1e9] sm:$0xff] }
  0xb5   : > { %2508 = vmatprep.subr.bf16.mxu0 %v5150_v1 }
  0xb6   : > { %1758 = vmatmul.mubr.bf16.gmra.mrb[52].mxu1 %v5666_v41 }
  0xb7   : > { %2272 = vmatmul.mubr.bf16.gmra.mrb[20].mxu0 %v5506_v51  ;;  %1765 = vmatprep.mubr.bf16.mxu1 %v5668_v18  ;;  %v5685_v51 = vpack.c.bf16 %v201_v55, %v200_v54  ;;  %v5782_v54 = vpack.c.bf16 %v211_v16, %v210_v47  ;;  %v5785_v55 = vpack.c.bf16 %v277_v52, %v276_v49  ;;  %v4205_v47 = vld [vmem:[%s5278_s24 + $0x19a] sm:$0xff] }
  0xb8   : > { %2279 = vmatprep.mubr.bf16.mxu0 %v5547_v30  ;;  %2509 = vmatpush1.bf16.msra.mxu0 %v5127_v53  ;;  %v4189_v30 = vld [vmem:[%s5278_s24 + $0xda] sm:$0xff]  ;;  %v5854_v16 = vpack.c.bf16 %v219_v40, %v218_v12 }
  0xb9   : > { %2510 = vmatprep.subr.bf16.mxu0 %v5150_v1  ;;  %v4197_v53 = vld [vmem:[%s5278_s24 + $0x13a] sm:$0xff] }
  0xba   : > { %v220_v52 = vld [vmem:[%s5278_s24 + $0x240] sm:$0xff] }
  0xbc   : > { %2511 = vmatpush1.bf16.msra.mxu0 %v5128_v2  ;;  %v4200_v2 = vld [vmem:[%s5278_s24 + $0x15a] sm:$0xff] }
  0xbd   : > { %2512 = vmatprep.subr.bf16.mxu0 %v5150_v1 }
  0xbe   : > { %1766 = vmatmul.mubr.bf16.gmra.mrb[56].mxu1 %v5685_v51 }
  0xbf   : > { %2280 = vmatmul.mubr.bf16.gmra.mrb[24].mxu0 %v5527_v61  ;;  %1773 = vmatprep.mubr.bf16.mxu1 %v5687_v62  ;;  %v4190_v61 = vld [vmem:[%s5278_s24 + $0xe2] sm:$0xff] }
  0xc0   : > { %2287 = vmatprep.mubr.bf16.mxu0 %v5689_v63  ;;  %v5709_v13 = vpack.c.bf16 %v4190_v61, %v4189_v30  ;;  %2513 = vmatpush1.bf16.msra.mxu0 %v5129_v22  ;;  %v214_v30 = vld [vmem:[%s5278_s24 + $0x1f8] sm:$0xff]  ;;  %v215_v61 = vld [vmem:[%s5278_s24 + $0x200] sm:$0xff] }
  0xc1   : > { %2514 = vmatprep.subr.bf16.mxu0 %v5150_v1  ;;  %v217_v22 = vld [vmem:[%s5278_s24 + $0x218] sm:$0xff] }
  0xc4   : > { %2515 = vmatpush1.bf16.msra.mxu0 %v5131_v48 }
  0xc5   : > { %2516 = vmatprep.subr.bf16.mxu0 %v5150_v1 }
  0xc6   : > { %1774 = vmatmul.mubr.bf16.gmra.mrb[60].mxu1 %v5704_v7 }
  0xc7   : > { %2288 = vmatmul.mubr.bf16.gmra.mrb[28].mxu0 %v5549_v5  ;;  %1781 = vmatprep.mubr.bf16.mxu1 %v5707_v32  ;;  %v5725_v5 = vpack.c.bf16 %v4192_v19, %v4191_v17  ;;  %v5818_v17 = vpack.c.bf16 %v215_v61, %v214_v30  ;;  %v5821_v19 = vpack.c.bf16 %v281_v59, %v280_v6  ;;  %v223_v30 = vld [vmem:[%s5278_s24 + $0x260] sm:$0xff]  ;;  %v288_v61 = vld [vmem:[%s5278_s24 + $0x271] sm:$0xff] }
  0xc8   : > { %2295 = vmatprep.mubr.bf16.mxu0 %v5709_v13  ;;  %2517 = vmatpush1.bf16.msra.mxu0 %v5133_v15  ;;  %v289_v15 = vld [vmem:[%s5278_s24 + $0x279] sm:$0xff]  ;;  %v4209_v6 = vld [vmem:[%s5278_s24 + $0x1ca] sm:$0xff] }
  0xc9   : > { %2518 = vmatprep.subr.bf16.mxu0 %v5150_v1  ;;  %v283_v1 = vld [vmem:[%s5278_s24 + $0x231] sm:$0xff] }
  0xca   : > { %v5837_v37 = vpack.c.bf16 %v283_v1, %v282_v27  ;;  %v4210_v59 = vld [vmem:[%s5278_s24 + $0x1d2] sm:$0xff]  ;;  %v290_v27 = vld [vmem:[%s5278_s24 + $0x289] sm:$0xff] }
  0xcb   : > { %v291_v1 = vld [vmem:[%s5278_s24 + $0x291] sm:$0xff] }
  0xcc   : > { %2519 = vmatpush1.bf16.msra.mxu0 %v5134_v42  ;;  %v5904_v40 = vpack.c.bf16 %v291_v1, %v290_v27  ;;  %v226_v42 = vld [vmem:[%s5278_s24 + $0x288] sm:$0xff] }
  0xce   : > { %1782 = vmatmul.mubr.bf16.gmra.mrb[64].mxu1 %v5721_v38 }
  0xcf   : > { %2296 = vmatmul.mubr.bf16.gmra.mrb[32].mxu0 %v5568_v34  ;;  %1789 = vmatprep.mubr.bf16.mxu1 %v5723_v21  ;;  %v4193_v34 = vld [vmem:[%s5278_s24 + $0x10a] sm:$0xff] }
  0xd0   : > { %2303 = vmatprep.mubr.bf16.mxu0 %v5725_v5  ;;  %v5751_v35 = vpack.c.bf16 %v4194_v29, %v4193_v34  ;;  %v4204_v34 = vld [vmem:[%s5278_s24 + $0x18a] sm:$0xff]  ;;  %v5835_v29 = vpack.c.bf16 %v217_v22, %v216_v8  ;;  %v225_v22 = vld [vmem:[%s5278_s24 + $0x278] sm:$0xff] }
  0xd1   : > { %v224_v8 = vld [vmem:[%s5278_s24 + $0x270] sm:$0xff] }
  0xd2   : > { %v5902_v12 = vpack.c.bf16 %v225_v22, %v224_v8  ;;  %v4215_v8 = vld [vmem:[%s5278_s24 + $0x212] sm:$0xff]  ;;  %v4216_v22 = vld [vmem:[%s5278_s24 + $0x21a] sm:$0xff] }
  0xd6   : > { %1790 = vmatmul.mubr.bf16.gmra.mrb[68].mxu1 %v5746_v31 }
  0xd7   : > { %2304 = vmatmul.mubr.bf16.gmra.mrb[36].mxu0 %v5588_v20  ;;  %1797 = vmatprep.mubr.bf16.mxu1 %v5749_v33  ;;  %v5767_v20 = vpack.c.bf16 %v4196_v43, %v4195_v14  ;;  %v284_v14 = vld [vmem:[%s5278_s24 + $0x241] sm:$0xff]  ;;  %v285_v43 = vld [vmem:[%s5278_s24 + $0x249] sm:$0xff] }
  0xd8   : > { %2311 = vmatprep.mubr.bf16.mxu0 %v5751_v35  ;;  %v5856_v48 = vpack.c.bf16 %v285_v43, %v284_v14  ;;  %v227_v14 = vld [vmem:[%s5278_s24 + $0x290] sm:$0xff]  ;;  %v292_v43 = vld [vmem:[%s5278_s24 + $0x2a1] sm:$0xff] }
  0xde   : > { %1798 = vmatmul.mubr.bf16.gmra.mrb[72].mxu1 %v5763_v44 }
  0xdf   : > { %2312 = vmatmul.mubr.bf16.gmra.mrb[40].mxu0 %v5608_v10  ;;  %1805 = vmatprep.mubr.bf16.mxu1 %v5765_v46  ;;  %v4198_v10 = vld [vmem:[%s5278_s24 + $0x142] sm:$0xff] }
  0xe0   : > { %2319 = vmatprep.mubr.bf16.mxu0 %v5767_v20  ;;  %v5787_v56 = vpack.c.bf16 %v4198_v10, %v4197_v53  ;;  %v221_v53 = vld [vmem:[%s5278_s24 + $0x248] sm:$0xff]  ;;  %v286_v10 = vld [vmem:[%s5278_s24 + $0x259] sm:$0xff] }
  0xe1   : > { %v5870_v28 = vpack.c.bf16 %v221_v53, %v220_v52  ;;  %v4213_v52 = vld [vmem:[%s5278_s24 + $0x1fa] sm:$0xff]  ;;  %v4214_v53 = vld [vmem:[%s5278_s24 + $0x202] sm:$0xff] }
  0xe6   : > { %1806 = vmatmul.mubr.bf16.gmra.mrb[76].mxu1 %v5782_v54 }
  0xe7   : > { %2320 = vmatmul.mubr.bf16.gmra.mrb[44].mxu0 %v5628_v39  ;;  %1813 = vmatprep.mubr.bf16.mxu1 %v5785_v55  ;;  %v5803_v39 = vpack.c.bf16 %v4200_v2, %v4199_v0  ;;  %v5872_v0 = vpack.c.bf16 %v287_v26, %v286_v10  ;;  %v222_v2 = vld [vmem:[%s5278_s24 + $0x258] sm:$0xff] }
  0xe8   : > { %2327 = vmatprep.mubr.bf16.mxu0 %v5787_v56 }
  0xee   : > { %1814 = vmatmul.mubr.bf16.gmra.mrb[80].mxu1 %v5799_v3 }
  0xef   : > { %2328 = vmatmul.mubr.bf16.gmra.mrb[48].mxu0 %v5648_v45  ;;  %1821 = vmatprep.mubr.bf16.mxu1 %v5801_v4  ;;  %v4202_v45 = vld [vmem:[%s5278_s24 + $0x172] sm:$0xff] }
  0xf0   : > { %2335 = vmatprep.mubr.bf16.mxu0 %v5803_v39  ;;  %v5823_v9 = vpack.c.bf16 %v4202_v45, %v4201_v36  ;;  %v5886_v36 = vpack.c.bf16 %v223_v30, %v222_v2  ;;  %v5888_v45 = vpack.c.bf16 %v289_v15, %v288_v61  ;;  %v5926_v2 = vpack.c.bf16 %v4214_v53, %v4213_v52  ;;  %v228_v30 = vld [vmem:[%s5278_s24 + $0x2a0] sm:$0xff]  ;;  %v229_v61 = vld [vmem:[%s5278_s24 + $0x2a8] sm:$0xff] }
  0xf1   : > { %v294_v15 = vld [vmem:[%s5278_s24 + $0x2b9] sm:$0xff] }
  0xf2   : > { %v297_v52 = vld [vmem:[%s5278_s24 + $0x2d9] sm:$0xff] }
  0xf6   : > { %1822 = vmatmul.mubr.bf16.gmra.mrb[84].mxu1 %v5818_v17 }
  0xf7   : > { %2336 = vmatmul.mubr.bf16.gmra.mrb[52].mxu0 %v5668_v18  ;;  %1829 = vmatprep.mubr.bf16.mxu1 %v5821_v19  ;;  %v5839_v18 = vpack.c.bf16 %v4204_v34, %v4203_v23  ;;  %v4211_v23 = vld [vmem:[%s5278_s24 + $0x1e2] sm:$0xff]  ;;  %v4212_v34 = vld [vmem:[%s5278_s24 + $0x1ea] sm:$0xff] }
  0xf8   : > { %2343 = vmatprep.mubr.bf16.mxu0 %v5823_v9 }
  0xfe   : > { %1830 = vmatmul.mubr.bf16.gmra.mrb[88].mxu1 %v5835_v29 }
  0xff   : > { %2344 = vmatmul.mubr.bf16.gmra.mrb[56].mxu0 %v5687_v62  ;;  %1837 = vmatprep.mubr.bf16.mxu1 %v5837_v37  ;;  %v4206_v62 = vld [vmem:[%s5278_s24 + $0x1a2] sm:$0xff] }
 0x100   : > { %2351 = vmatprep.mubr.bf16.mxu0 %v5839_v18  ;;  %v5858_v49 = vpack.c.bf16 %v4206_v62, %v4205_v47  ;;  %v293_v47 = vld [vmem:[%s5278_s24 + $0x2a9] sm:$0xff] }
 0x106   : > { %1838 = vmatmul.mubr.bf16.gmra.mrb[92].mxu1 %v5854_v16 }
 0x107   : > { %2352 = vmatmul.mubr.bf16.gmra.mrb[60].mxu0 %v5707_v32  ;;  %1845 = vmatprep.mubr.bf16.mxu1 %v5856_v48  ;;  %v5874_v32 = vpack.c.bf16 %v4208_v58, %v4207_v57  ;;  %v5924_v57 = vpack.c.bf16 %v293_v47, %v292_v43  ;;  %v231_v43 = vld [vmem:[%s5278_s24 + $0x2c0] sm:$0xff]  ;;  %v296_v47 = vld [vmem:[%s5278_s24 + $0x2d1] sm:$0xff] }
 0x108   : > { %2359 = vmatprep.mubr.bf16.mxu0 %v5858_v49 }
 0x10e   : > { %1846 = vmatmul.mubr.bf16.gmra.mrb[96].mxu1 %v5870_v28 }
 0x10f   : > { %2360 = vmatmul.mubr.bf16.gmra.mrb[64].mxu0 %v5723_v21  ;;  %1853 = vmatprep.mubr.bf16.mxu1 %v5872_v0  ;;  %v5890_v21 = vpack.c.bf16 %v4210_v59, %v4209_v6  ;;  %v295_v6 = vld [vmem:[%s5278_s24 + $0x2c1] sm:$0xff] }
 0x110   : > { %2367 = vmatprep.mubr.bf16.mxu0 %v5874_v32 }
 0x116   : > { %1854 = vmatmul.mubr.bf16.gmra.mrb[100].mxu1 %v5886_v36 }
 0x117   : > { %2368 = vmatmul.mubr.bf16.gmra.mrb[68].mxu0 %v5749_v33  ;;  %1861 = vmatprep.mubr.bf16.mxu1 %v5888_v45  ;;  %v5906_v33 = vpack.c.bf16 %v4212_v34, %v4211_v23  ;;  %v5944_v23 = vpack.c.bf16 %v295_v6, %v294_v15  ;;  %v5964_v15 = vpack.c.bf16 %v297_v52, %v296_v47  ;;  %v4219_v47 = vld [vmem:[%s5278_s24 + $0x242] sm:$0xff]  ;;  %v4220_v52 = vld [vmem:[%s5278_s24 + $0x24a] sm:$0xff] }
 0x118   : > { %2375 = vmatprep.mubr.bf16.mxu0 %v5890_v21 }
 0x11e   : > { %1862 = vmatmul.mubr.bf16.gmra.mrb[104].mxu1 %v5902_v12 }
 0x11f   : > { %2376 = vmatmul.mubr.bf16.gmra.mrb[72].mxu0 %v5765_v46  ;;  %1869 = vmatprep.mubr.bf16.mxu1 %v5904_v40  ;;  %v5920_v46 = vpack.c.bf16 %v227_v14, %v226_v42  ;;  %v5946_v42 = vpack.c.bf16 %v4216_v22, %v4215_v8  ;;  %v230_v14 = vld [vmem:[%s5278_s24 + $0x2b8] sm:$0xff]  ;;  %v232_v22 = vld [vmem:[%s5278_s24 + $0x2d0] sm:$0xff] }
 0x120   : > { %2383 = vmatprep.mubr.bf16.mxu0 %v5906_v33 }
 0x121   : > { %v5916_v62 = vpop.f32.mrb[0].mxu1 }
 0x122   : > { %v1657_v10 = vpop.f32.mrb[1].mxu1 }
 0x123   : > { %v5922_v26 = vpop.f32.mrb[2].mxu1  ;;  %v4217_v10 = vld [vmem:[%s5278_s24 + $0x22a] sm:$0xff] }
 0x124   : > { %v1660_v58 = vpop.f32.mrb[3].mxu1 }
 0x125   : > { %v4218_v58 = vld [vmem:[%s5278_s24 + $0x232] sm:$0xff] }
 0x126   : > { %1870 = vmatmul.mubr.bf16.gmra.mrb[108].mxu1 %v5920_v46  ;;  %v5966_v8 = vpack.c.bf16 %v4218_v58, %v4217_v10 }
 0x127   : > { %2384 = vmatmul.mubr.bf16.gmra.mrb[76].mxu0 %v5785_v55  ;;  %1877 = vmatprep.mubr.bf16.mxu1 %v5924_v57  ;;  %v5940_v55 = vpack.c.bf16 %v229_v61, %v228_v30 }
 0x128   : > { %2391 = vmatprep.mubr.bf16.mxu0 %v5926_v2 }
 0x129   : > { %v5936_v59 = vpop.f32.mrb[4].mxu1 }
 0x12a   : > { %v1665_v27 = vpop.f32.mrb[5].mxu1 }
 0x12b   : > { %v5942_v1 = vpop.f32.mrb[6].mxu1  ;;  %v233_v27 = vld [vmem:[%s5278_s24 + $0x2d8] sm:$0xff] }
 0x12c   : > { %v1668_v34 = vpop.f32.mrb[7].mxu1  ;;  %v5980_v58 = vpack.c.bf16 %v233_v27, %v232_v22  ;;  %v4221_v27 = vld [vmem:[%s5278_s24 + $0x25a] sm:$0xff] }
 0x12d   : > { %v298_v34 = vld [vmem:[%s5278_s24 + $0x2e9] sm:$0xff] }
 0x12e   : > { %1878 = vmatmul.mubr.bf16.gmra.mrb[112].mxu1 %v5940_v55 }
 0x12f   : > { %2392 = vmatmul.mubr.bf16.gmra.mrb[80].mxu0 %v5801_v4  ;;  %1885 = vmatprep.mubr.bf16.mxu1 %v5944_v23  ;;  %v5960_v4 = vpack.c.bf16 %v231_v43, %v230_v14  ;;  %v299_v14 = vld [vmem:[%s5278_s24 + $0x2f1] sm:$0xff] }
 0x130   : > { %2399 = vmatprep.mubr.bf16.mxu0 %v5946_v42 }
 0x131   : > { %v5956_v53 = vpop.f32.mrb[8].mxu1 }
 0x132   : > { %6867 = vst [vmem:[#allocation2_spill] sm:$0xff] %v5956_v53  ;;  %v1673_v30 = vpop.f32.mrb[9].mxu1  ;;  %v235_v53 = vld [vmem:[%s5278_s24 + $0x2f0] sm:$0xff] }
 0x133   : > { %v5962_v61 = vpop.f32.mrb[10].mxu1  ;;  %v5984_v30 = vpack.c.bf16 %v299_v14, %v298_v34  ;;  %v4222_v34 = vld [vmem:[%s5278_s24 + $0x262] sm:$0xff] }
 0x134   : > { %6868 = vst [vmem:[#allocation3_spill] sm:$0xff] %v5962_v61  ;;  %v1676_v6 = vpop.f32.mrb[11].mxu1  ;;  %v5986_v61 = vpack.c.bf16 %v4220_v52, %v4219_v47 }
 0x136   : > { %1886 = vmatmul.mubr.bf16.gmra.mrb[116].mxu1 %v5960_v4 }
 0x137   : > { %2400 = vmatmul.mubr.bf16.gmra.mrb[84].mxu0 %v5821_v19  ;;  %1893 = vmatprep.mubr.bf16.mxu1 %v5964_v15 }
 0x138   : > { %2407 = vmatprep.mubr.bf16.mxu0 %v5966_v8 }
 0x139   : > { %v5976_v43 = vpop.f32.mrb[12].mxu1 }
 0x13a   : > { %6869 = vst [vmem:[#allocation4_spill] sm:$0xff] %v5976_v43  ;;  %v1681_v10 = vpop.f32.mrb[13].mxu1  ;;  %v234_v43 = vld [vmem:[%s5278_s24 + $0x2e8] sm:$0xff] }
 0x13b   : > { %v5982_v19 = vpop.f32.mrb[14].mxu1  ;;  %v5998_v10 = vpack.c.bf16 %v235_v53, %v234_v43  ;;  %v4224_v53 = vld [vmem:[%s5278_s24 + $0x27a] sm:$0xff] }
 0x13c   : > { %v1684_v6 = vpop.f32.mrb[15].mxu1 }
 0x13d   : > { %v6002_v6 = vpack.c.bf16 %v4222_v34, %v4221_v27 }
 0x13e   : > { %1894 = vmatmul.mubr.bf16.gmra.mrb[120].mxu1 %v5980_v58 }
 0x13f   : > { %2408 = vmatmul.mubr.bf16.gmra.mrb[88].mxu0 %v5837_v37  ;;  %1901 = vmatprep.mubr.bf16.mxu1 %v5984_v30 }
 0x140   : > { %2415 = vmatprep.mubr.bf16.mxu0 %v5986_v61 }
 0x141   : > { %v5994_v22 = vpop.f32.mrb[16].mxu1 }
 0x142   : > { %6870 = vst [vmem:[#allocation5_spill] sm:$0xff] %v5994_v22  ;;  %v1689_v14 = vpop.f32.mrb[17].mxu1 }
 0x143   : > { %v6000_v47 = vpop.f32.mrb[18].mxu1  ;;  %v4223_v14 = vld [vmem:[%s5278_s24 + $0x272] sm:$0xff] }
 0x144   : > { %v1692_v52 = vpop.f32.mrb[19].mxu1  ;;  %v6014_v27 = vpack.c.bf16 %v4224_v53, %v4223_v14  ;;  %v4225_v14 = vld [vmem:[%s5278_s24 + $0x28a] sm:$0xff]  ;;  %v4226_v53 = vld [vmem:[%s5278_s24 + $0x292] sm:$0xff] }
 0x146   : > { %1902 = vmatmul.mubr.bf16.gmra.mrb[124].mxu1 %v5998_v10 }
 0x147   : > { %2416 = vmatmul.mubr.bf16.gmra.mrb[92].mxu0 %v5856_v48  ;;  %2006 = vmatprep.mubr.bf16.mxu1 %v5586_v50  ;;  %v5132_v48 = vld [vmem:[%s6864_s1 + $0x208] sm:$0xff]   ;;  %v5135_v50 = vld [vmem:[%s6864_s1 + $0x210] sm:$0xff]  }
 0x148   : > { %2423 = vmatprep.mubr.bf16.mxu0 %v6002_v6 }
 0x149   : > { %v6008_v37 = vpop.f32.mrb[20].mxu1 }
 0x14a   : > { %v1697_v43 = vpop.f32.mrb[21].mxu1 }
 0x14b   : > { %v6012_v22 = vpop.f32.mrb[22].mxu1 }
 0x14c   : > { %v1700_v52 = vpop.f32.mrb[23].mxu1 }
 0x14e   : > { %2007 = vmatmul.mubr.bf16.vlgmr.msra.gmra.mrb[32].mxu1 %v5689_v63 }
 0x14f   : > { %2424 = vmatmul.mubr.bf16.gmra.mrb[96].mxu0 %v5872_v0  ;;  %4561 = vmatpush3.bf16.msra.mxu1 %v5738_v25  ;;  %v6033_v0 = vpack.c.bf16 %v4226_v53, %v4225_v14  ;;  %v4228_v14 = vld [vmem:[%s5278_s24 + $0x2aa] sm:$0xff]  ;;  %v5137_v53 = vld [vmem:[%s6864_s1 + $0x220] sm:$0xff]  }
 0x150   : > { %2014 = vmatprep.mubr.bf16.mxu1 %v5606_v60  ;;  %2431 = vmatprep.mubr.bf16.mxu0 %v6014_v27  ;;  %v5136_v60 = vld [vmem:[%s6864_s1 + $0x218] sm:$0xff]  }
 0x151   : > { %v6027_v34 = vpop.f32.mrb[24].mxu1  ;;  %4562 = vmatprep.subr.bf16.mxu1 %v5132_v48 }
 0x152   : > { %v1705_v63 = vpop.f32.mrb[25].mxu1 }
 0x153   : > { %v6031_v43 = vpop.f32.mrb[26].mxu1  ;;  %4563 = vmatpush3.bf16.msra.mxu1 %v5132_v48  ;;  %v4227_v48 = vld [vmem:[%s5278_s24 + $0x2a2] sm:$0xff] }
 0x154   : > { %v1708_v25 = vpop.f32.mrb[27].mxu1  ;;  %4564 = vmatprep.subr.bf16.mxu1 %v5135_v50 }
 0x155   : > { %v6051_v25 = vpack.c.bf16 %v4228_v14, %v4227_v48  ;;  %v4230_v48 = vld [vmem:[%s5278_s24 + $0x2c2] sm:$0xff] }
 0x156   : > { %2015 = vmatmul.mubr.bf16.gmra.mrb[36].mxu1 %v5709_v13 }
 0x157   : > { %2432 = vmatmul.mubr.bf16.gmra.mrb[100].mxu0 %v5888_v45  ;;  %2022 = vmatprep.mubr.bf16.mxu1 %v5626_v11  ;;  %v5138_v11 = vld [vmem:[%s6864_s1 + $0x228] sm:$0xff]  }
 0x158   : > { %2439 = vmatprep.mubr.bf16.mxu0 %v6033_v0  ;;  %4565 = vmatpush3.bf16.msra.mxu1 %v5135_v50  ;;  %v4229_v50 = vld [vmem:[%s5278_s24 + $0x2ba] sm:$0xff] }
 0x159   : > { %v6042_v52 = vpop.f32.mrb[28].mxu1  ;;  %4566 = vmatprep.subr.bf16.mxu1 %v5136_v60  ;;  %v6065_v14 = vpack.c.bf16 %v4230_v48, %v4229_v50  ;;  %v4304_v50 = vld [vmem:[%s5278_s24 + $0x51] sm:$0xff] }
 0x15a   : > { %v1713_v63 = vpop.f32.mrb[29].mxu1 }
 0x15b   : > { %v6049_v13 = vpop.f32.mrb[30].mxu1  ;;  %v4302_v63 = vld [vmem:[%s5278_s24 + $0x39] sm:$0xff] }
 0x15c   : > { %v1716_v45 = vpop.f32.mrb[31].mxu1  ;;  %4567 = vmatpush3.bf16.msra.mxu1 %v5136_v60  ;;  %v5139_v60 = vld [vmem:[%s6864_s1 + $0x230] sm:$0xff]  }
 0x15d   : > { %4568 = vmatprep.subr.bf16.mxu1 %v5137_v53 }
 0x15e   : > { %2023 = vmatmul.mubr.bf16.gmra.mrb[40].mxu1 %v5725_v5  ;;  %v4232_v5 = vld [vmem:[%s5278_s24 + $0x2da] sm:$0xff] }
 0x15f   : > { %2440 = vmatmul.mubr.bf16.gmra.mrb[104].mxu0 %v5904_v40  ;;  %2030 = vmatprep.mubr.bf16.mxu1 %v5646_v24  ;;  %v4231_v24 = vld [vmem:[%s5278_s24 + $0x2d2] sm:$0xff] }
 0x160   : > { %2447 = vmatprep.mubr.bf16.mxu0 %v6051_v25  ;;  %4569 = vmatpush3.bf16.msra.mxu1 %v5137_v53  ;;  %v6073_v40 = vpack.c.bf16 %v4232_v5, %v4231_v24  ;;  %v4240_v24 = vld [vmem:[%s5278_s24 + $0x50] sm:$0xff] }
 0x161   : > { %4570 = vmatprep.subr.bf16.mxu1 %v5138_v11  ;;  %v4306_v5 = vld [vmem:[%s5278_s24 + $0x69] sm:$0xff] }
 0x164   : > { %4571 = vmatpush3.bf16.msra.mxu1 %v5138_v11 }
 0x165   : > { %4572 = vmatprep.subr.bf16.mxu1 %v5139_v60 }
 0x166   : > { %2031 = vmatmul.mubr.bf16.gmra.mrb[44].mxu1 %v5751_v35  ;;  %v4233_v35 = vld [vmem:[%s5278_s24 + $0x2ea] sm:$0xff] }
 0x167   : > { %2448 = vmatmul.mubr.bf16.gmra.mrb[108].mxu0 %v5924_v57  ;;  %2038 = vmatprep.mubr.bf16.mxu1 %v5666_v41  ;;  %v4234_v57 = vld [vmem:[%s5278_s24 + $0x2f2] sm:$0xff] }
 0x168   : > { %2455 = vmatprep.mubr.bf16.mxu0 %v6065_v14  ;;  %4573 = vmatpush3.bf16.msra.mxu1 %v5139_v60  ;;  %v6081_v41 = vpack.c.bf16 %v4234_v57, %v4233_v35 }
 0x16e   : > { %2039 = vmatmul.mubr.bf16.gmra.mrb[48].mxu1 %v5767_v20  ;;  %v4235_v20 = vld [vmem:[%s5278_s24 + $0x302] sm:$0xff] }
 0x16f   : > { %2456 = vmatmul.mubr.bf16.gmra.mrb[112].mxu0 %v5944_v23  ;;  %2046 = vmatprep.mubr.bf16.mxu1 %v5685_v51  ;;  %v5140_v51 = vld [vmem:[%s6864_s1 + $0x238] sm:$0xff]   ;;  %v4236_v23 = vld [vmem:[%s5278_s24 + $0x30a] sm:$0xff] }
 0x170   : > { %2463 = vmatprep.mubr.bf16.mxu0 %v6073_v40  ;;  %4574 = vmatprep.subr.bf16.mxu1 %v5140_v51  ;;  %v1034_v53 = vpack.c.bf16 %v4236_v23, %v4235_v20  ;;  %v4308_v20 = vld [vmem:[%s5278_s24 + $0x81] sm:$0xff] }
 0x171   : > { %4575 = vmatpush3.bf16.msra.mxu1 %v5140_v51  ;;  %v4242_v51 = vld [vmem:[%s5278_s24 + $0x68] sm:$0xff] }
 0x176   : > { %2047 = vmatmul.mubr.bf16.gmra.mrb[52].mxu1 %v5787_v56  ;;  %v4172_v56 = vld [vmem:[%s5278_s24 + $0x309] sm:$0xff] }
 0x177   : > { %2464 = vmatmul.mubr.bf16.gmra.mrb[116].mxu0 %v5964_v15  ;;  %2054 = vmatprep.mubr.bf16.mxu1 %v5704_v7  ;;  %v4171_v7 = vld [vmem:[%s5278_s24 + $0x301] sm:$0xff]  ;;  %v4301_v15 = vld [vmem:[%s5278_s24 + $0x31] sm:$0xff] }
 0x178   : > { %2471 = vmatprep.mubr.bf16.mxu0 %v6081_v41  ;;  %v1033_v45 = vpack.c.bf16 %v4172_v56, %v4171_v7  ;;  %v757_v11 = vpack.c.bf16 %v4302_v63, %v4301_v15  ;;  %v4244_v7 = vld [vmem:[%s5278_s24 + $0x80] sm:$0xff] }
 0x179   : > { %v4310_v56 = vld [vmem:[%s5278_s24 + $0x99] sm:$0xff] }
 0x17e   : > { %2055 = vmatmul.mubr.bf16.gmra.mrb[56].mxu1 %v5803_v39  ;;  %v4237_v39 = vld [vmem:[%s5278_s24 + $0x30] sm:$0xff] }
 0x17f   : > { %2472 = vmatmul.mubr.bf16.gmra.mrb[120].mxu0 %v5984_v30  ;;  %2062 = vmatprep.mubr.bf16.mxu1 %v5721_v38  ;;  %v4238_v30 = vld [vmem:[%s5278_s24 + $0x38] sm:$0xff]  ;;  %v4303_v38 = vld [vmem:[%s5278_s24 + $0x49] sm:$0xff] }
 0x180   : > { %2479 = vmatprep.mubr.bf16.mxu0 %v1034_v53  ;;  %v756_v48 = vpack.c.bf16 %v4238_v30, %v4237_v39  ;;  %v766_v60 = vpack.c.bf16 %v4304_v50, %v4303_v38  ;;  %v4248_v38 = vld [vmem:[%s5278_s24 + $0xb0] sm:$0xff] }
 0x181   : > { %v4314_v50 = vld [vmem:[%s5278_s24 + $0xc9] sm:$0xff] }
 0x186   : > { %2063 = vmatmul.mubr.bf16.gmra.mrb[60].mxu1 %v5823_v9  ;;  %v4239_v9 = vld [vmem:[%s5278_s24 + $0x48] sm:$0xff] }
 0x187   : > { %2480 = vmatmul.mubr.bf16.gmra.mrb[124].mxu0 %v1033_v45  ;;  %2070 = vmatprep.mubr.bf16.mxu1 %v5746_v31  ;;  %v4305_v31 = vld [vmem:[%s5278_s24 + $0x61] sm:$0xff]  ;;  %v765_v35 = vpack.c.bf16 %v4240_v24, %v4239_v9  ;;  %v4246_v45 = vld [vmem:[%s5278_s24 + $0x98] sm:$0xff] }
 0x188   : > { %2520 = vmatprep.mubr.bf16.mxu0 %v757_v11  ;;  %v775_v57 = vpack.c.bf16 %v4306_v5, %v4305_v31  ;;  %v4312_v11 = vld [vmem:[%s5278_s24 + $0xb1] sm:$0xff]  ;;  %v4250_v9 = vld [vmem:[%s5278_s24 + $0xc8] sm:$0xff] }
 0x189   : > { %v4316_v24 = vld [vmem:[%s5278_s24 + $0xe1] sm:$0xff] }
 0x18e   : > { %2071 = vmatmul.mubr.bf16.gmra.mrb[64].mxu1 %v5839_v18  ;;  %v4241_v18 = vld [vmem:[%s5278_s24 + $0x60] sm:$0xff] }
 0x18f   : > { %2521 = vmatmul.mubr.bf16.vlgmr.msra.gmra.mrb[0].mxu0 %v756_v48  ;;  %2078 = vmatprep.mubr.bf16.mxu1 %v5763_v44  ;;  %v4307_v44 = vld [vmem:[%s5278_s24 + $0x79] sm:$0xff]  ;;  %v774_v23 = vpack.c.bf16 %v4242_v51, %v4241_v18 }
 0x190   : > { %2528 = vmatprep.mubr.bf16.mxu0 %v766_v60  ;;  %v784_v53 = vpack.c.bf16 %v4308_v20, %v4307_v44  ;;  %v4254_v44 = vld [vmem:[%s5278_s24 + $0xf8] sm:$0xff] }
 0x191   : > { %v4320_v20 = vld [vmem:[%s5278_s24 + $0x111] sm:$0xff] }
 0x196   : > { %2079 = vmatmul.mubr.bf16.gmra.mrb[68].mxu1 %v5858_v49  ;;  %v4243_v49 = vld [vmem:[%s5278_s24 + $0x78] sm:$0xff] }
 0x197   : > { %2529 = vmatmul.mubr.bf16.gmra.mrb[4].mxu0 %v765_v35  ;;  %2086 = vmatprep.mubr.bf16.mxu1 %v5782_v54  ;;  %v4309_v54 = vld [vmem:[%s5278_s24 + $0x91] sm:$0xff]  ;;  %v783_v15 = vpack.c.bf16 %v4244_v7, %v4243_v49  ;;  %v4252_v35 = vld [vmem:[%s5278_s24 + $0xe0] sm:$0xff]  ;;  %v4322_v7 = vld [vmem:[%s5278_s24 + $0x129] sm:$0xff] }
 0x198   : > { %2536 = vmatprep.mubr.bf16.mxu0 %v775_v57  ;;  %v793_v63 = vpack.c.bf16 %v4310_v56, %v4309_v54  ;;  %v4318_v57 = vld [vmem:[%s5278_s24 + $0xf9] sm:$0xff]  ;;  %v4256_v49 = vld [vmem:[%s5278_s24 + $0x110] sm:$0xff] }
 0x19e   : > { %2087 = vmatmul.mubr.bf16.gmra.mrb[72].mxu1 %v5874_v32  ;;  %v4245_v32 = vld [vmem:[%s5278_s24 + $0x90] sm:$0xff] }
 0x19f   : > { %2537 = vmatmul.mubr.bf16.gmra.mrb[8].mxu0 %v774_v23  ;;  %2094 = vmatprep.mubr.bf16.mxu1 %v5799_v3  ;;  %v4311_v3 = vld [vmem:[%s5278_s24 + $0xa9] sm:$0xff]  ;;  %v792_v39 = vpack.c.bf16 %v4246_v45, %v4245_v32 }
 0x1a0   : > { %2544 = vmatprep.mubr.bf16.mxu0 %v784_v53  ;;  %v802_v30 = vpack.c.bf16 %v4312_v11, %v4311_v3  ;;  %v4260_v3 = vld [vmem:[%s5278_s24 + $0x140] sm:$0xff] }
 0x1a1   : > { %v4326_v11 = vld [vmem:[%s5278_s24 + $0x159] sm:$0xff] }
 0x1a6   : > { %2095 = vmatmul.mubr.bf16.gmra.mrb[76].mxu1 %v5890_v21  ;;  %v4247_v21 = vld [vmem:[%s5278_s24 + $0xa8] sm:$0xff] }
 0x1a7   : > { %2545 = vmatmul.mubr.bf16.gmra.mrb[12].mxu0 %v783_v15  ;;  %2102 = vmatprep.mubr.bf16.mxu1 %v5818_v17  ;;  %v4313_v17 = vld [vmem:[%s5278_s24 + $0xc1] sm:$0xff]  ;;  %v801_v48 = vpack.c.bf16 %v4248_v38, %v4247_v21  ;;  %v4262_v21 = vld [vmem:[%s5278_s24 + $0x158] sm:$0xff] }
 0x1a8   : > { %2552 = vmatprep.mubr.bf16.mxu0 %v793_v63  ;;  %v811_v60 = vpack.c.bf16 %v4314_v50, %v4313_v17  ;;  %v4258_v15 = vld [vmem:[%s5278_s24 + $0x128] sm:$0xff]  ;;  %v4328_v38 = vld [vmem:[%s5278_s24 + $0x171] sm:$0xff] }
 0x1a9   : > { %v4324_v63 = vld [vmem:[%s5278_s24 + $0x141] sm:$0xff] }
 0x1ae   : > { %2103 = vmatmul.mubr.bf16.gmra.mrb[80].mxu1 %v5906_v33  ;;  %v4249_v33 = vld [vmem:[%s5278_s24 + $0xc0] sm:$0xff] }
 0x1af   : > { %2553 = vmatmul.mubr.bf16.gmra.mrb[16].mxu0 %v792_v39  ;;  %2110 = vmatprep.mubr.bf16.mxu1 %v5835_v29  ;;  %v4315_v29 = vld [vmem:[%s5278_s24 + $0xd9] sm:$0xff]  ;;  %v810_v31 = vpack.c.bf16 %v4250_v9, %v4249_v33 }
 0x1b0   : > { %2560 = vmatprep.mubr.bf16.mxu0 %v802_v30  ;;  %v820_v5 = vpack.c.bf16 %v4316_v24, %v4315_v29  ;;  %v4107_v29 = vld [vmem:[%s5278_s24 + $0x300] sm:$0xff]  ;;  %v4108_v24 = vld [vmem:[%s5278_s24 + $0x308] sm:$0xff] }
 0x1b6   : > { %2111 = vmatmul.mubr.bf16.gmra.mrb[84].mxu1 %v5926_v2  ;;  %v4251_v2 = vld [vmem:[%s5278_s24 + $0xd8] sm:$0xff] }
 0x1b7   : > { %2561 = vmatmul.mubr.bf16.gmra.mrb[20].mxu0 %v801_v48  ;;  %2118 = vmatprep.mubr.bf16.mxu1 %v5854_v16  ;;  %v4317_v16 = vld [vmem:[%s5278_s24 + $0xf1] sm:$0xff]  ;;  %v819_v18 = vpack.c.bf16 %v4252_v35, %v4251_v2  ;;  %v4329_v48 = vld [vmem:[%s5278_s24 + $0x181] sm:$0xff]  ;;  %v6191_v35 = vpack.c.bf16 %v4108_v24, %v4107_v29 }
 0x1b8   : > { %2568 = vmatprep.mubr.bf16.mxu0 %v811_v60  ;;  %v829_v51 = vpack.c.bf16 %v4318_v57, %v4317_v16  ;;  %v4330_v60 = vld [vmem:[%s5278_s24 + $0x189] sm:$0xff]  ;;  %v4268_v16 = vld [vmem:[%s5278_s24 + $0x1a0] sm:$0xff]  ;;  %v4365_v57 = vld [vmem:[%s5278_s24 + $0x32] sm:$0xff] }
 0x1b9   : > { %v883_v9 = vpack.c.bf16 %v4330_v60, %v4329_v48  ;;  %v4339_v48 = vld [vmem:[%s5278_s24 + $0x1f9] sm:$0xff]  ;;  %v4340_v60 = vld [vmem:[%s5278_s24 + $0x201] sm:$0xff] }
 0x1ba   : > { %v4275_v29 = vld [vmem:[%s5278_s24 + $0x1f8] sm:$0xff] }
 0x1bb   : > { %v4379_v24 = vld [vmem:[%s5278_s24 + $0xda] sm:$0xff] }
 0x1be   : > { %2119 = vmatmul.mubr.bf16.gmra.mrb[88].mxu1 %v5946_v42  ;;  %v4253_v42 = vld [vmem:[%s5278_s24 + $0xf0] sm:$0xff] }
 0x1bf   : > { %2569 = vmatmul.mubr.bf16.gmra.mrb[24].mxu0 %v810_v31  ;;  %2126 = vmatprep.mubr.bf16.mxu1 %v5870_v28  ;;  %v4319_v28 = vld [vmem:[%s5278_s24 + $0x109] sm:$0xff]  ;;  %v828_v23 = vpack.c.bf16 %v4254_v44, %v4253_v42  ;;  %v4331_v31 = vld [vmem:[%s5278_s24 + $0x199] sm:$0xff] }
 0x1c0   : > { %2576 = vmatprep.mubr.bf16.mxu0 %v820_v5  ;;  %v838_v53 = vpack.c.bf16 %v4320_v20, %v4319_v28  ;;  %v4332_v5 = vld [vmem:[%s5278_s24 + $0x1a1] sm:$0xff]  ;;  %v4334_v42 = vld [vmem:[%s5278_s24 + $0x1b9] sm:$0xff]  ;;  %v4269_v20 = vld [vmem:[%s5278_s24 + $0x1b0] sm:$0xff] }
 0x1c6   : > { %2127 = vmatmul.mubr.bf16.gmra.mrb[92].mxu1 %v5966_v8  ;;  %v4255_v8 = vld [vmem:[%s5278_s24 + $0x108] sm:$0xff] }
 0x1c7   : > { %2577 = vmatmul.mubr.bf16.gmra.mrb[28].mxu0 %v819_v18  ;;  %2134 = vmatprep.mubr.bf16.mxu1 %v5886_v36  ;;  %v4321_v36 = vld [vmem:[%s5278_s24 + $0x121] sm:$0xff]  ;;  %v837_v54 = vpack.c.bf16 %v4256_v49, %v4255_v8  ;;  %v4270_v8 = vld [vmem:[%s5278_s24 + $0x1b8] sm:$0xff] }
 0x1c8   : > { %2584 = vmatprep.mubr.bf16.mxu0 %v829_v51  ;;  %v847_v56 = vpack.c.bf16 %v4322_v7, %v4321_v36  ;;  %v4366_v18 = vld [vmem:[%s5278_s24 + $0x3a] sm:$0xff]  ;;  %v4333_v51 = vld [vmem:[%s5278_s24 + $0x1b1] sm:$0xff]  ;;  %v4369_v49 = vld [vmem:[%s5278_s24 + $0x62] sm:$0xff] }
 0x1c9   : > { %v901_v28 = vpack.c.bf16 %v4334_v42, %v4333_v51  ;;  %v4370_v36 = vld [vmem:[%s5278_s24 + $0x6a] sm:$0xff] }
 0x1ca   : > { %v4335_v7 = vld [vmem:[%s5278_s24 + $0x1c9] sm:$0xff] }
 0x1ce   : > { %2135 = vmatmul.mubr.bf16.gmra.mrb[96].mxu1 %v5986_v61  ;;  %v4257_v61 = vld [vmem:[%s5278_s24 + $0x120] sm:$0xff] }
 0x1cf   : > { %2585 = vmatmul.mubr.bf16.gmra.mrb[32].mxu0 %v828_v23  ;;  %2142 = vmatprep.mubr.bf16.mxu1 %v5902_v12  ;;  %v4323_v12 = vld [vmem:[%s5278_s24 + $0x139] sm:$0xff]  ;;  %v846_v32 = vpack.c.bf16 %v4258_v15, %v4257_v61  ;;  %v4367_v23 = vld [vmem:[%s5278_s24 + $0x4a] sm:$0xff]  ;;  %v776_v61 = vpack.c.bf16 %v4370_v36, %v4369_v49  ;;  %v4385_v36 = vld [vmem:[%s5278_s24 + $0x122] sm:$0xff] }
 0x1d0   : > { %2592 = vmatprep.mubr.bf16.mxu0 %v838_v53  ;;  %v856_v45 = vpack.c.bf16 %v4324_v63, %v4323_v12  ;;  %v4368_v53 = vld [vmem:[%s5278_s24 + $0x52] sm:$0xff]  ;;  %v4271_v12 = vld [vmem:[%s5278_s24 + $0x1c8] sm:$0xff]  ;;  %v4371_v63 = vld [vmem:[%s5278_s24 + $0x7a] sm:$0xff] }
 0x1d1   : > { %v4278_v49 = vld [vmem:[%s5278_s24 + $0x218] sm:$0xff] }
 0x1d6   : > { %2143 = vmatmul.mubr.bf16.gmra.mrb[100].mxu1 %v6002_v6  ;;  %v4259_v6 = vld [vmem:[%s5278_s24 + $0x138] sm:$0xff] }
 0x1d7   : > { %2593 = vmatmul.mubr.bf16.gmra.mrb[36].mxu0 %v837_v54  ;;  %2150 = vmatprep.mubr.bf16.mxu1 %v5920_v46  ;;  %v4325_v46 = vld [vmem:[%s5278_s24 + $0x151] sm:$0xff]  ;;  %v855_v39 = vpack.c.bf16 %v4260_v3, %v4259_v6  ;;  %v4374_v3 = vld [vmem:[%s5278_s24 + $0x9a] sm:$0xff] }
 0x1d8   : > { %2600 = vmatprep.mubr.bf16.mxu0 %v847_v56  ;;  %v865_v30 = vpack.c.bf16 %v4326_v11, %v4325_v46  ;;  %v4336_v54 = vld [vmem:[%s5278_s24 + $0x1d1] sm:$0xff]  ;;  %v900_v56 = vpack.c.bf16 %v4270_v8, %v4269_v20  ;;  %v4337_v46 = vld [vmem:[%s5278_s24 + $0x1e1] sm:$0xff]  ;;  %v4338_v11 = vld [vmem:[%s5278_s24 + $0x1e9] sm:$0xff] }
 0x1d9   : > { %v910_v15 = vpack.c.bf16 %v4336_v54, %v4335_v7  ;;  %v4373_v6 = vld [vmem:[%s5278_s24 + $0x92] sm:$0xff]  ;;  %v4386_v7 = vld [vmem:[%s5278_s24 + $0x12a] sm:$0xff] }
 0x1da   : > { %v4384_v8 = vld [vmem:[%s5278_s24 + $0x112] sm:$0xff] }
 0x1de   : > { %2151 = vmatmul.mubr.bf16.gmra.mrb[104].mxu1 %v6014_v27  ;;  %v4261_v27 = vld [vmem:[%s5278_s24 + $0x150] sm:$0xff] }
 0x1df   : > { %2601 = vmatmul.mubr.bf16.gmra.mrb[40].mxu0 %v846_v32  ;;  %2158 = vmatprep.mubr.bf16.mxu1 %v5940_v55  ;;  %v4327_v55 = vld [vmem:[%s5278_s24 + $0x169] sm:$0xff]  ;;  %v864_v17 = vpack.c.bf16 %v4262_v21, %v4261_v27  ;;  %v794_v27 = vpack.c.bf16 %v4374_v3, %v4373_v6  ;;  %v919_v21 = vpack.c.bf16 %v4338_v11, %v4337_v46  ;;  %v4387_v46 = vld [vmem:[%s5278_s24 + $0x13a] sm:$0xff] }
 0x1e0   : > { %2608 = vmatprep.mubr.bf16.mxu0 %v856_v45  ;;  %v874_v50 = vpack.c.bf16 %v4328_v38, %v4327_v55  ;;  %v4372_v32 = vld [vmem:[%s5278_s24 + $0x82] sm:$0xff]  ;;  %v4272_v45 = vld [vmem:[%s5278_s24 + $0x1d0] sm:$0xff] }
 0x1e1   : > { %v4273_v55 = vld [vmem:[%s5278_s24 + $0x1e0] sm:$0xff]  ;;  %v4375_v38 = vld [vmem:[%s5278_s24 + $0xaa] sm:$0xff] }
 0x1e2   : > { %v4279_v3 = vld [vmem:[%s5278_s24 + $0x228] sm:$0xff] }
 0x1e3   : > { %v4388_v11 = vld [vmem:[%s5278_s24 + $0x142] sm:$0xff] }
 0x1e6   : > { %2159 = vmatmul.mubr.bf16.gmra.mrb[108].mxu1 %v6033_v0  ;;  %v4264_v0 = vld [vmem:[%s5278_s24 + $0x170] sm:$0xff] }
 0x1e7   : > { %2609 = vmatmul.mubr.bf16.gmra.mrb[44].mxu0 %v855_v39  ;;  %2166 = vmatprep.mubr.bf16.mxu1 %v5960_v4  ;;  %v4263_v4 = vld [vmem:[%s5278_s24 + $0x168] sm:$0xff]  ;;  %v785_v39 = vpack.c.bf16 %v4372_v32, %v4371_v63  ;;  %v848_v32 = vpack.c.bf16 %v4386_v7, %v4385_v36  ;;  %v4398_v36 = vld [vmem:[%s5278_s24 + $0x1ba] sm:$0xff] }
 0x1e8   : > { %2616 = vmatprep.mubr.bf16.mxu0 %v865_v30  ;;  %v873_v33 = vpack.c.bf16 %v4264_v0, %v4263_v4  ;;  %v909_v30 = vpack.c.bf16 %v4272_v45, %v4271_v12  ;;  %v4377_v4 = vld [vmem:[%s5278_s24 + $0xc2] sm:$0xff]  ;;  %v4378_v0 = vld [vmem:[%s5278_s24 + $0xca] sm:$0xff] }
 0x1ee   : > { %2167 = vmatmul.mubr.bf16.gmra.mrb[112].mxu1 %v6051_v25  ;;  %v4265_v25 = vld [vmem:[%s5278_s24 + $0x180] sm:$0xff] }
 0x1ef   : > { %2617 = vmatmul.mubr.bf16.gmra.mrb[48].mxu0 %v864_v17  ;;  %2174 = vmatprep.mubr.bf16.mxu1 %v5980_v58  ;;  %v4266_v58 = vld [vmem:[%s5278_s24 + $0x188] sm:$0xff]  ;;  %v4376_v17 = vld [vmem:[%s5278_s24 + $0xb2] sm:$0xff] }
 0x1f0   : > { %2624 = vmatprep.mubr.bf16.mxu0 %v874_v50  ;;  %v882_v2 = vpack.c.bf16 %v4266_v58, %v4265_v25  ;;  %v4274_v50 = vld [vmem:[%s5278_s24 + $0x1e8] sm:$0xff]  ;;  %v812_v25 = vpack.c.bf16 %v4378_v0, %v4377_v4  ;;  %v928_v58 = vpack.c.bf16 %v4340_v60, %v4339_v48 }
 0x1f6   : > { %2175 = vmatmul.mubr.bf16.gmra.mrb[116].mxu1 %v6065_v14  ;;  %v892_v14 = vpack.c.bf16 %v4332_v5, %v4331_v31  ;;  %v4380_v31 = vld [vmem:[%s5278_s24 + $0xe2] sm:$0xff] }
 0x1f7   : > { %2625 = vmatmul.mubr.bf16.gmra.mrb[52].mxu0 %v873_v33  ;;  %2182 = vmatprep.mubr.bf16.mxu1 %v5998_v10  ;;  %v4267_v10 = vld [vmem:[%s5278_s24 + $0x198] sm:$0xff]  ;;  %v803_v33 = vpack.c.bf16 %v4376_v17, %v4375_v38  ;;  %v4276_v5 = vld [vmem:[%s5278_s24 + $0x200] sm:$0xff]  ;;  %v821_v51 = vpack.c.bf16 %v4380_v31, %v4379_v24  ;;  %v4346_v38 = vld [vmem:[%s5278_s24 + $0x249] sm:$0xff] }
 0x1f8   : > { %2632 = vmatprep.mubr.bf16.mxu0 %v883_v9  ;;  %v891_v44 = vpack.c.bf16 %v4268_v16, %v4267_v10  ;;  %v918_v9 = vpack.c.bf16 %v4274_v50, %v4273_v55  ;;  %v4341_v16 = vld [vmem:[%s5278_s24 + $0x211] sm:$0xff]  ;;  %v4345_v55 = vld [vmem:[%s5278_s24 + $0x241] sm:$0xff]  ;;  %v857_v50 = vpack.c.bf16 %v4388_v11, %v4387_v46 }
 0x1f9   : > { %v4393_v24 = vld [vmem:[%s5278_s24 + $0x182] sm:$0xff]  ;;  %v4394_v31 = vld [vmem:[%s5278_s24 + $0x18a] sm:$0xff] }
 0x1fa   : > { %v4285_v46 = vld [vmem:[%s5278_s24 + $0x270] sm:$0xff] }
 0x1fb   : > { %v4399_v11 = vld [vmem:[%s5278_s24 + $0x1ca] sm:$0xff] }
 0x1fe   : > { %2183 = vmatmul.mubr.bf16.gmra.mrb[120].mxu1 %v6073_v40  ;;  %v758_v40 = vpack.c.bf16 %v4366_v18, %v4365_v57  ;;  %v4342_v57 = vld [vmem:[%s5278_s24 + $0x219] sm:$0xff] }
 0x1ff   : > { %2633 = vmatmul.mubr.bf16.gmra.mrb[56].mxu0 %v882_v2  ;;  %2190 = vmatprep.mubr.bf16.mxu1 %v6191_v35  ;;  %v4381_v2 = vld [vmem:[%s5278_s24 + $0xf2] sm:$0xff]  ;;  %v937_v20 = vpack.c.bf16 %v4342_v57, %v4341_v16 }
 0x200   : > { %2640 = vmatprep.mubr.bf16.mxu0 %v892_v14  ;;  %v4382_v14 = vld [vmem:[%s5278_s24 + $0xfa] sm:$0xff] }
 0x206   : > { %2191 = vmatmul.mubr.bf16.gmra.mrb[124].mxu1 %v6081_v41  ;;  %v767_v41 = vpack.c.bf16 %v4368_v53, %v4367_v23  ;;  %v4277_v23 = vld [vmem:[%s5278_s24 + $0x210] sm:$0xff] }
 0x207   : > { %2641 = vmatmul.mubr.bf16.gmra.mrb[60].mxu0 %v891_v44  ;;  %4576 = vmatprep.mubr.bf16.mxu1 %v758_v40  ;;  %v927_v44 = vpack.c.bf16 %v4276_v5, %v4275_v29  ;;  %v830_v40 = vpack.c.bf16 %v4382_v14, %v4381_v2  ;;  %v4383_v53 = vld [vmem:[%s5278_s24 + $0x10a] sm:$0xff]  ;;  %v936_v63 = vpack.c.bf16 %v4278_v49, %v4277_v23  ;;  %v4347_v2 = vld [vmem:[%s5278_s24 + $0x259] sm:$0xff]  ;;  %v4348_v14 = vld [vmem:[%s5278_s24 + $0x261] sm:$0xff] }
 0x208   : > { %2648 = vmatprep.mubr.bf16.mxu0 %v901_v28  ;;  %v4282_v29 = vld [vmem:[%s5278_s24 + $0x248] sm:$0xff]  ;;  %v4395_v23 = vld [vmem:[%s5278_s24 + $0x19a] sm:$0xff]  ;;  %v4397_v49 = vld [vmem:[%s5278_s24 + $0x1b2] sm:$0xff] }
 0x20e   : > { %4577 = vmatmul.mubr.bf16.vlgmr.msra.gmra.mrb[128].mxu1 %v767_v41  ;;  %v4343_v41 = vld [vmem:[%s5278_s24 + $0x229] sm:$0xff] }
 0x20f   : > { %2649 = vmatmul.mubr.bf16.gmra.mrb[64].mxu0 %v900_v56  ;;  %4580 = vmatprep.mubr.bf16.mxu1 %v776_v61  ;;  %v4344_v56 = vld [vmem:[%s5278_s24 + $0x231] sm:$0xff] }
 0x210   : > { %2656 = vmatprep.mubr.bf16.mxu0 %v910_v15  ;;  %v839_v15 = vpack.c.bf16 %v4384_v8, %v4383_v53  ;;  %v946_v6 = vpack.c.bf16 %v4344_v56, %v4343_v41  ;;  %v4396_v53 = vld [vmem:[%s5278_s24 + $0x1a2] sm:$0xff]  ;;  %v4349_v41 = vld [vmem:[%s5278_s24 + $0x271] sm:$0xff]  ;;  %v4350_v56 = vld [vmem:[%s5278_s24 + $0x279] sm:$0xff] }
 0x211   : > { %v4284_v8 = vld [vmem:[%s5278_s24 + $0x260] sm:$0xff] }
 0x216   : > { %4581 = vmatmul.mubr.bf16.gmra.mrb[132].mxu1 %v785_v39  ;;  %v4280_v39 = vld [vmem:[%s5278_s24 + $0x230] sm:$0xff] }
 0x217   : > { %2657 = vmatmul.mubr.bf16.gmra.mrb[68].mxu0 %v909_v30  ;;  %4584 = vmatprep.mubr.bf16.mxu1 %v794_v27  ;;  %v4389_v30 = vld [vmem:[%s5278_s24 + $0x152] sm:$0xff]  ;;  %v4390_v27 = vld [vmem:[%s5278_s24 + $0x15a] sm:$0xff]  ;;  %v945_v0 = vpack.c.bf16 %v4280_v39, %v4279_v3  ;;  %v973_v3 = vpack.c.bf16 %v4350_v56, %v4349_v41  ;;  %v4407_v41 = vld [vmem:[%s5278_s24 + $0x22a] sm:$0xff] }
 0x218   : > { %2664 = vmatprep.mubr.bf16.mxu0 %v919_v21  ;;  %v866_v48 = vpack.c.bf16 %v4390_v27, %v4389_v30  ;;  %v4400_v39 = vld [vmem:[%s5278_s24 + $0x1d2] sm:$0xff]  ;;  %v4401_v27 = vld [vmem:[%s5278_s24 + $0x1e2] sm:$0xff] }
 0x219   : > { %v4286_v30 = vld [vmem:[%s5278_s24 + $0x278] sm:$0xff] }
 0x21a   : > { %v4408_v56 = vld [vmem:[%s5278_s24 + $0x232] sm:$0xff] }
 0x21e   : > { %4585 = vmatmul.mubr.bf16.gmra.mrb[136].mxu1 %v803_v33  ;;  %v955_v33 = vpack.c.bf16 %v4346_v38, %v4345_v55  ;;  %v4402_v55 = vld [vmem:[%s5278_s24 + $0x1ea] sm:$0xff] }
 0x21f   : > { %2665 = vmatmul.mubr.bf16.gmra.mrb[72].mxu0 %v918_v9  ;;  %4588 = vmatprep.mubr.bf16.mxu1 %v812_v25  ;;  %v4281_v9 = vld [vmem:[%s5278_s24 + $0x240] sm:$0xff]  ;;  %v4391_v25 = vld [vmem:[%s5278_s24 + $0x16a] sm:$0xff] }
 0x220   : > { %2672 = vmatprep.mubr.bf16.mxu0 %v928_v58  ;;  %v4392_v58 = vld [vmem:[%s5278_s24 + $0x172] sm:$0xff] }
 0x221   : > { %v6232_v10 = vpop.f32.mrb[32].mxu1  ;;  %v875_v57 = vpack.c.bf16 %v4392_v58, %v4391_v25 }
 0x222   : > { %v2010_v18 = vpop.f32.mrb[33].mxu1 }
 0x223   : > { %v6236_v42 = vpop.f32.mrb[34].mxu1 }
 0x224   : > { %v2013_v28 = vpop.f32.mrb[35].mxu1 }
 0x225   : > { %v964_v28 = vpack.c.bf16 %v4348_v14, %v4347_v2  ;;  %v4288_v2 = vld [vmem:[%s5278_s24 + $0x290] sm:$0xff] }
 0x226   : > { %4589 = vmatmul.mubr.bf16.gmra.mrb[140].mxu1 %v821_v51  ;;  %v954_v51 = vpack.c.bf16 %v4282_v29, %v4281_v9  ;;  %v920_v9 = vpack.c.bf16 %v4402_v55, %v4401_v27  ;;  %v4287_v29 = vld [vmem:[%s5278_s24 + $0x288] sm:$0xff]  ;;  %v4405_v14 = vld [vmem:[%s5278_s24 + $0x212] sm:$0xff] }
 0x227   : > { %2673 = vmatmul.mubr.bf16.gmra.mrb[76].mxu0 %v927_v44  ;;  %4592 = vmatprep.mubr.bf16.mxu1 %v830_v40  ;;  %v884_v44 = vpack.c.bf16 %v4394_v31, %v4393_v24  ;;  %v4403_v24 = vld [vmem:[%s5278_s24 + $0x1fa] sm:$0xff]  ;;  %v4404_v31 = vld [vmem:[%s5278_s24 + $0x202] sm:$0xff] }
 0x228   : > { %2680 = vmatprep.mubr.bf16.mxu0 %v937_v20  ;;  %v4283_v20 = vld [vmem:[%s5278_s24 + $0x258] sm:$0xff] }
 0x229   : > { %v6244_v54 = vpop.f32.mrb[36].mxu1 }
 0x22a   : > { %v2018_v61 = vpop.f32.mrb[37].mxu1 }
 0x22b   : > { %v6248_v12 = vpop.f32.mrb[38].mxu1 }
 0x22c   : > { %v2021_v45 = vpop.f32.mrb[39].mxu1 }
 0x22d   : > { %v902_v45 = vpack.c.bf16 %v4398_v36, %v4397_v49  ;;  %v4289_v36 = vld [vmem:[%s5278_s24 + $0x2a0] sm:$0xff] }
 0x22e   : > { %4593 = vmatmul.mubr.bf16.gmra.mrb[144].mxu1 %v839_v15  ;;  %v893_v15 = vpack.c.bf16 %v4396_v53, %v4395_v23  ;;  %v981_v23 = vpack.c.bf16 %v4288_v2, %v4287_v29  ;;  %v4358_v2 = vld [vmem:[%s5278_s24 + $0x2d9] sm:$0xff] }
 0x22f   : > { %2681 = vmatmul.mubr.bf16.gmra.mrb[80].mxu0 %v936_v63  ;;  %4596 = vmatprep.mubr.bf16.mxu1 %v848_v32  ;;  %v963_v32 = vpack.c.bf16 %v4284_v8, %v4283_v20 }
 0x230   : > { %2688 = vmatprep.mubr.bf16.mxu0 %v946_v6 }
 0x231   : > { %v6256_v21 = vpop.f32.mrb[40].mxu1 }
 0x232   : > { %v2026_v17 = vpop.f32.mrb[41].mxu1 }
 0x233   : > { %v6260_v4 = vpop.f32.mrb[42].mxu1  ;;  %v4351_v17 = vld [vmem:[%s5278_s24 + $0x289] sm:$0xff] }
 0x234   : > { %v2029_v60 = vpop.f32.mrb[43].mxu1 }
 0x236   : > { %4597 = vmatmul.mubr.bf16.gmra.mrb[148].mxu1 %v857_v50  ;;  %v4352_v50 = vld [vmem:[%s5278_s24 + $0x291] sm:$0xff] }
 0x237   : > { %2689 = vmatmul.mubr.bf16.gmra.mrb[84].mxu0 %v945_v0  ;;  %4600 = vmatprep.mubr.bf16.mxu1 %v866_v48  ;;  %v911_v48 = vpack.c.bf16 %v4400_v39, %v4399_v11  ;;  %v982_v58 = vpack.c.bf16 %v4352_v50, %v4351_v17  ;;  %v947_v11 = vpack.c.bf16 %v4408_v56, %v4407_v41  ;;  %v6325_v50 = vld [vmem:[%s6865_s2] ss:$0 sm:$0xff] }
 0x238   : > { %2696 = vmatprep.mubr.bf16.mxu0 %v955_v33  ;;  %v972_v33 = vpack.c.bf16 %v4286_v30, %v4285_v46  ;;  %v1656_v29 = vadd.f32 %v6325_v50, %v5916_v62 }
 0x239   : > { %v6268_v5 = vpop.f32.mrb[44].mxu1 }
 0x23a   : > { %v2034_v16 = vpop.f32.mrb[45].mxu1 }
 0x23b   : > { %v6272_v18 = vpop.f32.mrb[46].mxu1  ;;  %v4406_v16 = vld [vmem:[%s5278_s24 + $0x21a] sm:$0xff] }
 0x23c   : > { %v2037_v40 = vpop.f32.mrb[47].mxu1  ;;  %v938_v53 = vpack.c.bf16 %v4406_v16, %v4405_v14 }
 0x23e   : > { %4601 = vmatmul.mubr.bf16.gmra.mrb[152].mxu1 %v875_v57 }
 0x23f   : > { %2697 = vmatmul.mubr.bf16.gmra.mrb[88].mxu0 %v954_v51  ;;  %4604 = vmatprep.mubr.bf16.mxu1 %v884_v44  ;;  %v4353_v51 = vld [vmem:[%s5278_s24 + $0x2a1] sm:$0xff]  ;;  %v4354_v44 = vld [vmem:[%s5278_s24 + $0x2a9] sm:$0xff] }
 0x240   : > { %2704 = vmatprep.mubr.bf16.mxu0 %v964_v28  ;;  %v929_v28 = vpack.c.bf16 %v4404_v31, %v4403_v24  ;;  %v991_v49 = vpack.c.bf16 %v4354_v44, %v4353_v51  ;;  %v4357_v31 = vld [vmem:[%s5278_s24 + $0x2d1] sm:$0xff]  ;;  %v1659_v44 = vadd.f32 %v6325_v50, %v5922_v26 }
 0x241   : > { %v6280_v7 = vpop.f32.mrb[48].mxu1  ;;  %v4293_v26 = vld [vmem:[%s5278_s24 + $0x2d0] sm:$0xff] }
 0x242   : > { %v2042_v61 = vpop.f32.mrb[49].mxu1 }
 0x243   : > { %v6284_v63 = vpop.f32.mrb[50].mxu1  ;;  %v4290_v61 = vld [vmem:[%s5278_s24 + $0x2a8] sm:$0xff] }
 0x244   : > { %v2045_v6 = vpop.f32.mrb[51].mxu1  ;;  %v990_v30 = vpack.c.bf16 %v4290_v61, %v4289_v36  ;;  %v1009_v36 = vpack.c.bf16 %v4358_v2, %v4357_v31  ;;  %v4415_v61 = vld [vmem:[%s5278_s24 + $0x28a] sm:$0xff] }
 0x245   : > { %v4355_v6 = vld [vmem:[%s5278_s24 + $0x2b9] sm:$0xff] }
 0x246   : > { %4605 = vmatmul.mubr.bf16.gmra.mrb[156].mxu1 %v893_v15  ;;  %v4409_v15 = vld [vmem:[%s5278_s24 + $0x242] sm:$0xff] }
 0x247   : > { %2705 = vmatmul.mubr.bf16.gmra.mrb[92].mxu0 %v963_v32  ;;  %4608 = vmatprep.mubr.bf16.mxu1 %v902_v45  ;;  %v4410_v32 = vld [vmem:[%s5278_s24 + $0x24a] sm:$0xff] }
 0x248   : > { %2712 = vmatprep.mubr.bf16.mxu0 %v973_v3  ;;  %v4356_v3 = vld [vmem:[%s5278_s24 + $0x2c1] sm:$0xff]  ;;  %v956_v27 = vpack.c.bf16 %v4410_v32, %v4409_v15  ;;  %v4416_v15 = vld [vmem:[%s5278_s24 + $0x292] sm:$0xff] }
 0x249   : > { %v6292_v38 = vpop.f32.mrb[52].mxu1  ;;  %v1000_v17 = vpack.c.bf16 %v4356_v3, %v4355_v6  ;;  %v4294_v32 = vld [vmem:[%s5278_s24 + $0x2d8] sm:$0xff]  ;;  %v4417_v6 = vld [vmem:[%s5278_s24 + $0x2a2] sm:$0xff]  ;;  %v4418_v3 = vld [vmem:[%s5278_s24 + $0x2aa] sm:$0xff] }
 0x24a   : > { %v2050_v0 = vpop.f32.mrb[53].mxu1 }
 0x24b   : > { %v6296_v60 = vpop.f32.mrb[54].mxu1  ;;  %v4291_v0 = vld [vmem:[%s5278_s24 + $0x2b8] sm:$0xff] }
 0x24c   : > { %v2053_v25 = vpop.f32.mrb[55].mxu1 }
 0x24d   : > { %v4413_v25 = vld [vmem:[%s5278_s24 + $0x272] sm:$0xff] }
 0x24e   : > { %4609 = vmatmul.mubr.bf16.gmra.mrb[160].mxu1 %v911_v48  ;;  %v4411_v48 = vld [vmem:[%s5278_s24 + $0x25a] sm:$0xff] }
 0x24f   : > { %2713 = vmatmul.mubr.bf16.gmra.mrb[96].mxu0 %v972_v33  ;;  %4612 = vmatprep.mubr.bf16.mxu1 %v920_v9  ;;  %v4412_v33 = vld [vmem:[%s5278_s24 + $0x262] sm:$0xff] }
 0x250   : > { %2720 = vmatprep.mubr.bf16.mxu0 %v982_v58  ;;  %v4292_v9 = vld [vmem:[%s5278_s24 + $0x2c0] sm:$0xff]  ;;  %v965_v51 = vpack.c.bf16 %v4412_v33, %v4411_v48  ;;  %v1667_v48 = vadd.f32 %v6325_v50, %v5942_v1  ;;  %v6369_v1 = vld [vmem:[%s5278_s24 + $0x2e8] sm:$0xff] }
 0x251   : > { %v6304_v57 = vpop.f32.mrb[56].mxu1  ;;  %v4414_v58 = vld [vmem:[%s5278_s24 + $0x27a] sm:$0xff]  ;;  %v999_v62 = vpack.c.bf16 %v4292_v9, %v4291_v0  ;;  %v983_v0 = vpack.c.bf16 %v4416_v15, %v4415_v61  ;;  %v4362_v61 = vld [vmem:[%s5278_s24 + $0x309] sm:$0xff] }
 0x252   : > { %v2058_v40 = vpop.f32.mrb[57].mxu1 }
 0x253   : > { %v6308_v20 = vpop.f32.mrb[58].mxu1 }
 0x254   : > { %v2061_v8 = vpop.f32.mrb[59].mxu1 }
 0x256   : > { %4613 = vmatmul.mubr.bf16.gmra.mrb[164].mxu1 %v929_v28 }
 0x257   : > { %2721 = vmatmul.mubr.bf16.gmra.mrb[100].mxu0 %v981_v23  ;;  %4616 = vmatprep.mubr.bf16.mxu1 %v938_v53  ;;  %v974_v53 = vpack.c.bf16 %v4414_v58, %v4413_v25  ;;  %v992_v58 = vpack.c.bf16 %v4418_v3, %v4417_v6  ;;  %v6872_v3 = vld [vmem:[#allocation3_spill] sm:$0xff] }
 0x258   : > { %2728 = vmatprep.mubr.bf16.mxu0 %v991_v49 }
 0x259   : > { %v6316_v45 = vpop.f32.mrb[60].mxu1 }
 0x25a   : > { %v2066_v46 = vpop.f32.mrb[61].mxu1 }
 0x25b   : > { %v6320_v39 = vpop.f32.mrb[62].mxu1  ;;  %v1664_v46 = vadd.f32 %v6325_v50, %v5936_v59  ;;  %v1008_v59 = vpack.c.bf16 %v4294_v32, %v4293_v26  ;;  %v4361_v26 = vld [vmem:[%s5278_s24 + $0x301] sm:$0xff] }
 0x25c   : > { %v2069_v55 = vpop.f32.mrb[63].mxu1 }
 0x25e   : > { %4617 = vmatmul.mubr.bf16.gmra.mrb[168].mxu1 %v947_v11 }
 0x25f   : > { %2729 = vmatmul.mubr.bf16.gmra.mrb[104].mxu0 %v990_v30  ;;  %4620 = vmatprep.mubr.bf16.mxu1 %v956_v27  ;;  %v4359_v30 = vld [vmem:[%s5278_s24 + $0x2e9] sm:$0xff]  ;;  %v4360_v27 = vld [vmem:[%s5278_s24 + $0x2f1] sm:$0xff] }
 0x260   : > { %2736 = vmatprep.mubr.bf16.mxu0 %v1000_v17  ;;  %v1018_v2 = vpack.c.bf16 %v4360_v27, %v4359_v30 }
 0x261   : > { %v6335_v24 = vpop.f32.mrb[64].mxu1 }
 0x262   : > { %v2522_v14 = vpop.f32.mrb[0].mxu0  ;;  %v2074_v16 = vpop.f32.mrb[65].mxu1 }
 0x263   : > { %v6341_v40 = vadd.f32 %v2522_v14, %v1656_v29  ;;  %v2524_v28 = vpop.f32.mrb[1].mxu0  ;;  %v6343_v23 = vpop.f32.mrb[66].mxu1 }
 0x264   : > { %v2525_v8 = vpop.f32.mrb[2].mxu0  ;;  %v2077_v49 = vpop.f32.mrb[67].mxu1  ;;  %v4296_v28 = vld [vmem:[%s5278_s24 + $0x2f0] sm:$0xff] }
 0x265   : > { %v6345_v41 = vadd.f32 %v2525_v8, %v1659_v44  ;;  %v2527_v56 = vpop.f32.mrb[3].mxu0  ;;  %v4420_v44 = vld [vmem:[%s5278_s24 + $0x2c2] sm:$0xff]  ;;  %v5151_v8 = vmov 0.0  }
 0x266   : > { %4621 = vmatmul.mubr.bf16.gmra.mrb[172].mxu1 %v965_v51  ;;  %v4419_v51 = vld [vmem:[%s5278_s24 + $0x2ba] sm:$0xff]  ;;  %3868 = vst [vmem:[%s6376_s21 + $0x10] sm:$0xff] %v5151_v8  ;;  %3869 = vst [vmem:[%s6376_s21 + $0x18] sm:$0x3] %v5151_v8 }
 0x267   : > { %2737 = vmatmul.mubr.bf16.gmra.mrb[108].mxu0 %v999_v62  ;;  %4624 = vmatprep.mubr.bf16.mxu1 %v974_v53  ;;  %v4421_v62 = vld [vmem:[%s5278_s24 + $0x2d2] sm:$0xff]  ;;  %v4422_v53 = vld [vmem:[%s5278_s24 + $0x2da] sm:$0xff]  ;;  %3866 = vst [vmem:[%s6376_s21] sm:$0xff] %v5151_v8  ;;  %3867 = vst [vmem:[%s6376_s21 + $0x8] sm:$0x3] %v5151_v8  ;;  %v1001_v6 = vpack.c.bf16 %v4420_v44, %v4419_v51 }
 0x268   : > { %2744 = vmatprep.mubr.bf16.mxu0 %v1009_v36  ;;  %3870 = vst [vmem:[%s6376_s21 + $0x20] sm:$0xff] %v5151_v8  ;;  %3871 = vst [vmem:[%s6376_s21 + $0x28] sm:$0x3] %v5151_v8  ;;  %v6871_v49 = vld [vmem:[#allocation2_spill] sm:$0xff]  ;;  %v4426_v51 = vld [vmem:[%s5278_s24 + $0x30a] sm:$0xff] }
 0x269   : > { %v6355_v11 = vpop.f32.mrb[68].mxu1  ;;  %3872 = vst [vmem:[%s6376_s21 + $0x30] sm:$0xff] %v5151_v8  ;;  %3873 = vst [vmem:[%s6376_s21 + $0x38] sm:$0x3] %v5151_v8  ;;  %v1672_v36 = vadd.f32 %v6325_v50, %v6871_v49  ;;  %v6873_v44 = vld [vmem:[#allocation4_spill] sm:$0xff] }
 0x26a   : > { %v2530_v55 = vpop.f32.mrb[4].mxu0  ;;  %v2082_v17 = vpop.f32.mrb[69].mxu1  ;;  %3874 = vst [vmem:[%s6376_s21 + $0x40] sm:$0xff] %v5151_v8  ;;  %3875 = vst [vmem:[%s6376_s21 + $0x48] sm:$0x3] %v5151_v8 }
 0x26b   : > { %v6361_v33 = vadd.f32 %v2530_v55, %v1664_v46  ;;  %v2532_v9 = vpop.f32.mrb[5].mxu0  ;;  %v6363_v25 = vpop.f32.mrb[70].mxu1  ;;  %3876 = vst [vmem:[%s6376_s21 + $0x50] sm:$0xff] %v5151_v8  ;;  %3877 = vst [vmem:[%s6376_s21 + $0x58] sm:$0x3] %v5151_v8  ;;  %v1675_v46 = vadd.f32 %v6325_v50, %v6872_v3  ;;  %v1017_v17 = vpack.c.bf16 %v4296_v28, %v6369_v1 }
 0x26c   : > { %v2533_v29 = vpop.f32.mrb[6].mxu0  ;;  %v2085_v31 = vpop.f32.mrb[71].mxu1  ;;  %3878 = vst [vmem:[%s6376_s21 + $0x60] sm:$0xff] %v5151_v8  ;;  %3879 = vst [vmem:[%s6376_s21 + $0x68] sm:$0x3] %v5151_v8  ;;  %v1680_v1 = vadd.f32 %v6325_v50, %v6873_v44 }
 0x26d   : > { %v6365_v14 = vadd.f32 %v2533_v29, %v1667_v48  ;;  %v2535_v16 = vpop.f32.mrb[7].mxu0  ;;  %3880 = vst [vmem:[%s6376_s21 + $0x70] sm:$0xff] %v5151_v8  ;;  %3881 = vst [vmem:[%s6376_s21 + $0x78] sm:$0x3] %v5151_v8  ;;  %v4423_v31 = vld [vmem:[%s5278_s24 + $0x2ea] sm:$0xff] }
 0x26e   : > { %4625 = vmatmul.mubr.bf16.gmra.mrb[176].mxu1 %v983_v0  ;;  %3882 = vst [vmem:[%s6376_s21 + $0x80] sm:$0xff] %v5151_v8  ;;  %3883 = vst [vmem:[%s6376_s21 + $0x88] sm:$0x3] %v5151_v8  ;;  %v1010_v0 = vpack.c.bf16 %v4422_v53, %v4421_v62  ;;  %v4425_v16 = vld [vmem:[%s5278_s24 + $0x302] sm:$0xff]  ;;  %v4363_v62 = vld [vmem:[%s5278_s24 + $0x319] sm:$0xff] }
 0x26f   : > { %2745 = vmatmul.mubr.bf16.gmra.mrb[112].mxu0 %v1008_v59  ;;  %4628 = vmatprep.mubr.bf16.mxu1 %v992_v58  ;;  %3884 = vst [vmem:[%s6376_s21 + $0x90] sm:$0xff] %v5151_v8  ;;  %3885 = vst [vmem:[%s6376_s21 + $0x98] sm:$0x3] %v5151_v8  ;;  %v1027_v59 = vpack.c.bf16 %v4362_v61, %v4361_v26  ;;  %v4364_v53 = vld [vmem:[%s5278_s24 + $0x321] sm:$0xff]  ;;  %v1683_v26 = vadd.f32 %v6325_v50, %v5982_v19 }
 0x270   : > { %2752 = vmatprep.mubr.bf16.mxu0 %v1018_v2  ;;  %3886 = vst [vmem:[%s6376_s21 + $0xa0] sm:$0xff] %v5151_v8  ;;  %3887 = vst [vmem:[%s6376_s21 + $0xa8] sm:$0x3] %v5151_v8  ;;  %v4424_v2 = vld [vmem:[%s5278_s24 + $0x2f2] sm:$0xff]  ;;  %v4428_v19 = vld [vmem:[%s5278_s24 + $0x322] sm:$0xff] }
 0x271   : > { %3888 = vst [vmem:[%s6376_s21 + $0xb0] sm:$0xff] %v5151_v8  ;;  %3889 = vst [vmem:[%s6376_s21 + $0xb8] sm:$0x3] %v5151_v8  ;;  %v6419_v56 = vpop.f32.mrb[72].mxu1 }
 0x272   : > { %3890 = vst [vmem:[%s6376_s21 + $0xc0] sm:$0xff] %v5151_v8  ;;  %3891 = vst [vmem:[%s6376_s21 + $0xc8] sm:$0x3] %v5151_v8  ;;  %v2538_v15 = vpop.f32.mrb[8].mxu0  ;;  %v2090_v32 = vpop.f32.mrb[73].mxu1 }
 0x273   : > { %3892 = vst [vmem:[%s6376_s21 + $0xd0] sm:$0xff] %v5151_v8  ;;  %3893 = vst [vmem:[%s6376_s21 + $0xd8] sm:$0x3] %v5151_v8  ;;  %v6425_v30 = vadd.f32 %v2538_v15, %v1672_v36  ;;  %v2540_v27 = vpop.f32.mrb[9].mxu0  ;;  %v6427_v55 = vpop.f32.mrb[74].mxu1  ;;  %v1019_v36 = vpack.c.bf16 %v4424_v2, %v4423_v31 }
 0x274   : > { %3894 = vst [vmem:[%s6376_s21 + $0xe0] sm:$0xff] %v5151_v8  ;;  %3895 = vst [vmem:[%s6376_s21 + $0xe8] sm:$0x3] %v5151_v8  ;;  %v2541_v48 = vpop.f32.mrb[10].mxu0  ;;  %v2093_v9 = vpop.f32.mrb[75].mxu1  ;;  %v1036_v27 = vpack.c.bf16 %v4364_v53, %v4363_v62 }
 0x275   : > { %3896 = vst [vmem:[%s6376_s21 + $0xf0] sm:$0xff] %v5151_v8  ;;  %3897 = vst [vmem:[%s6376_s21 + $0xf8] sm:$0x3] %v5151_v8  ;;  %v6430_v58 = vadd.f32 %v2541_v48, %v1675_v46  ;;  %v2543_v29 = vpop.f32.mrb[11].mxu0  ;;  %v4427_v48 = vld [vmem:[%s5278_s24 + $0x31a] sm:$0xff] }
 0x276   : > { %3898 = vst [vmem:[%s6376_s21 + $0x100] sm:$0xff] %v5151_v8  ;;  %3899 = vst [vmem:[%s6376_s21 + $0x108] sm:$0x3] %v5151_v8  ;;  %4629 = vmatmul.mubr.bf16.gmra.mrb[180].mxu1 %v1001_v6  ;;  %v1028_v6 = vpack.c.bf16 %v4426_v51, %v4425_v16  ;;  %v4299_v9 = vld [vmem:[%s5278_s24 + $0x318] sm:$0xff]  ;;  %v1037_v44 = vpack.c.bf16 %v4428_v19, %v4427_v48 }
 0x277   : > { %3900 = vst [vmem:[%s6376_s21 + $0x110] sm:$0xff] %v5151_v8  ;;  %3901 = vst [vmem:[%s6376_s21 + $0x118] sm:$0x3] %v5151_v8  ;;  %2753 = vmatmul.mubr.bf16.gmra.mrb[116].mxu0 %v1017_v17  ;;  %4632 = vmatprep.mubr.bf16.mxu1 %v1010_v0  ;;  %v6874_v29 = vld [vmem:[#allocation5_spill] sm:$0xff] }
 0x278   : > { %2760 = vmatprep.mubr.bf16.mxu0 %v1027_v59  ;;  %v4300_v59 = vld [vmem:[%s5278_s24 + $0x320] sm:$0xff]  ;;  %v1688_v31 = vadd.f32 %v6325_v50, %v6874_v29 }
 0x279   : > { %v6438_v28 = vpop.f32.mrb[76].mxu1 }
 0x27a   : > { %v2546_v8 = vpop.f32.mrb[12].mxu0  ;;  %v2098_v49 = vpop.f32.mrb[77].mxu1 }
 0x27b   : > { %v6444_v61 = vadd.f32 %v2546_v8, %v1680_v1  ;;  %v2548_v15 = vpop.f32.mrb[13].mxu0  ;;  %v6446_v32 = vpop.f32.mrb[78].mxu1  ;;  %v1691_v1 = vadd.f32 %v6325_v50, %v6000_v47  ;;  %v1035_v8 = vpack.c.bf16 %v4300_v59, %v4299_v9 }
 0x27c   : > { %v2549_v3 = vpop.f32.mrb[14].mxu0  ;;  %v2101_v46 = vpop.f32.mrb[79].mxu1 }
 0x27d   : > { %v6448_v17 = vadd.f32 %v2549_v3, %v1683_v26  ;;  %v2551_v0 = vpop.f32.mrb[15].mxu0 }
 0x27e   : > { %4633 = vmatmul.mubr.bf16.gmra.mrb[184].mxu1 %v1019_v36 }
 0x27f   : > { %2761 = vmatmul.mubr.bf16.gmra.mrb[120].mxu0 %v6191_v35  ;;  %4636 = vmatprep.mubr.bf16.mxu1 %v1028_v6  ;;  %v1696_v6 = vadd.f32 %v6325_v50, %v6008_v37  ;;  %v1704_v37 = vadd.f32 %v6325_v50, %v6027_v34  ;;  %v1712_v34 = vadd.f32 %v6325_v50, %v6042_v52 }
 0x280   : > { %2768 = vmatprep.mubr.bf16.mxu0 %v1036_v27  ;;  %v1699_v27 = vadd.f32 %v6325_v50, %v6012_v22  ;;  %v1707_v22 = vadd.f32 %v6325_v50, %v6031_v43  ;;  %v1715_v43 = vadd.f32 %v6325_v50, %v6049_v13  ;;  %v4704_v52 = vadd.f32 %v6325_v50, %v6232_v10 }
 0x281   : > { %v6457_v2 = vpop.f32.mrb[80].mxu1  ;;  %v4706_v13 = vadd.f32 %v6325_v50, %v6236_v42  ;;  %v4708_v10 = vadd.f32 %v6325_v50, %v6244_v54  ;;  %v4710_v42 = vadd.f32 %v6325_v50, %v6248_v12  ;;  %v4712_v54 = vadd.f32 %v6325_v50, %v6256_v21 }
 0x282   : > { %v2554_v16 = vpop.f32.mrb[16].mxu0  ;;  %v2106_v51 = vpop.f32.mrb[81].mxu1  ;;  %v4714_v12 = vadd.f32 %v6325_v50, %v6260_v4  ;;  %v4716_v21 = vadd.f32 %v6325_v50, %v6268_v5  ;;  %v4718_v4 = vadd.f32 %v6325_v50, %v6272_v18  ;;  %v4720_v5 = vadd.f32 %v6325_v50, %v6280_v7 }
 0x283   : > { %v6461_v62 = vadd.f32 %v2554_v16, %v1688_v31  ;;  %v2556_v35 = vpop.f32.mrb[17].mxu0  ;;  %v6463_v53 = vpop.f32.mrb[82].mxu1  ;;  %v4722_v18 = vadd.f32 %v6325_v50, %v6284_v63  ;;  %v4724_v7 = vadd.f32 %v6325_v50, %v6292_v38  ;;  %v4726_v63 = vadd.f32 %v6325_v50, %v6296_v60 }
 0x284   : > { %v2557_v49 = vpop.f32.mrb[18].mxu0  ;;  %v2109_v36 = vpop.f32.mrb[83].mxu1  ;;  %v4728_v38 = vadd.f32 %v6325_v50, %v6304_v57  ;;  %v4730_v60 = vadd.f32 %v6325_v50, %v6308_v20  ;;  %v4732_v57 = vadd.f32 %v6325_v50, %v6316_v45  ;;  %v3133_v20 = vlaneseq }
 0x285   : > { %v6465_v26 = vadd.f32 %v2557_v49, %v1691_v1  ;;  %v2559_v15 = vpop.f32.mrb[19].mxu0 }
 0x286   : > { %4637 = vmatmul.mubr.bf16.gmra.mrb[188].mxu1 %v1037_v44 }
 0x287   : > { %2769 = vmatmul.mubr.bf16.gmra.mrb[124].mxu0 %v1035_v8 }
 0x289   : > { %v6469_v3 = vpop.f32.mrb[84].mxu1 }
 0x28a   : > { %v2562_v46 = vpop.f32.mrb[20].mxu0  ;;  %v2114_v47 = vpop.f32.mrb[85].mxu1 }
 0x28b   : > { %v6473_v0 = vadd.f32 %v2562_v46, %v1696_v6  ;;  %v2564_v48 = vpop.f32.mrb[21].mxu0  ;;  %v6475_v19 = vpop.f32.mrb[86].mxu1 }
 0x28c   : > { %v2565_v9 = vpop.f32.mrb[22].mxu0  ;;  %v2117_v59 = vpop.f32.mrb[87].mxu1 }
 0x28d   : > { %v6477_v29 = vadd.f32 %v2565_v9, %v1699_v27  ;;  %v2567_v31 = vpop.f32.mrb[23].mxu0 }
 0x291   : > { %v6481_v16 = vpop.f32.mrb[88].mxu1 }
 0x292   : > { %v2570_v51 = vpop.f32.mrb[24].mxu0  ;;  %v2122_v44 = vpop.f32.mrb[89].mxu1 }
 0x293   : > { %v6485_v1 = vadd.f32 %v2570_v51, %v1704_v37  ;;  %v2572_v35 = vpop.f32.mrb[25].mxu0  ;;  %v6487_v8 = vpop.f32.mrb[90].mxu1 }
 0x294   : > { %v2573_v49 = vpop.f32.mrb[26].mxu0  ;;  %v2125_v36 = vpop.f32.mrb[91].mxu1 }
 0x295   : > { %v6489_v15 = vadd.f32 %v2573_v49, %v1707_v22  ;;  %v2575_v6 = vpop.f32.mrb[27].mxu0 }
 0x299   : > { %v6493_v46 = vpop.f32.mrb[92].mxu1 }
 0x29a   : > { %v2578_v47 = vpop.f32.mrb[28].mxu0  ;;  %v2130_v27 = vpop.f32.mrb[93].mxu1 }
 0x29b   : > { %v6497_v48 = vadd.f32 %v2578_v47, %v1712_v34  ;;  %v2580_v9 = vpop.f32.mrb[29].mxu0  ;;  %v6499_v59 = vpop.f32.mrb[94].mxu1 }
 0x29c   : > { %6875 = vst [vmem:[#allocation2_spill] sm:$0xff] %v6499_v59  ;;  %v2581_v31 = vpop.f32.mrb[30].mxu0  ;;  %v2133_v37 = vpop.f32.mrb[95].mxu1 }
 0x29d   : > { %v6501_v51 = vadd.f32 %v2581_v31, %v1715_v43  ;;  %v2583_v44 = vpop.f32.mrb[31].mxu0 }
 0x2a1   : > { %v6505_v22 = vpop.f32.mrb[96].mxu1 }
 0x2a2   : > { %6876 = vst [vmem:[#allocation3_spill] sm:$0xff] %v6505_v22  ;;  %v2586_v35 = vpop.f32.mrb[32].mxu0  ;;  %v2138_v49 = vpop.f32.mrb[97].mxu1 }
 0x2a3   : > { %v6509_v36 = vadd.f32 %v4704_v52, %v2586_v35  ;;  %v2588_v6 = vpop.f32.mrb[33].mxu0  ;;  %v6511_v34 = vpop.f32.mrb[98].mxu1 }
 0x2a4   : > { %6877 = vst [vmem:[#allocation4_spill] sm:$0xff] %v6511_v34  ;;  %v2589_v47 = vpop.f32.mrb[34].mxu0  ;;  %v2141_v27 = vpop.f32.mrb[99].mxu1  ;;  %v5152_v34 = vmov 1966171168  }
 0x2a5   : > { %v6513_v43 = vadd.f32 %v4706_v13, %v2589_v47  ;;  %v2591_v9 = vpop.f32.mrb[35].mxu0  ;;  %v3131_v22 = vunpack.c.l.s4 %v5152_v34 }
 0x2a9   : > { %v6517_v31 = vpop.f32.mrb[100].mxu1 }
 0x2aa   : > { %6878 = vst [vmem:[#allocation5_spill] sm:$0xff] %v6517_v31  ;;  %v2594_v37 = vpop.f32.mrb[36].mxu0  ;;  %v2146_v44 = vpop.f32.mrb[101].mxu1 }
 0x2ab   : > { %v6521_v52 = vadd.f32 %v4708_v10, %v2594_v37  ;;  %v2596_v35 = vpop.f32.mrb[37].mxu0  ;;  %v6523_v49 = vpop.f32.mrb[102].mxu1 }
 0x2ac   : > { %6879 = vst [vmem:[#allocation6_spill] sm:$0xff] %v6523_v49  ;;  %v2597_v6 = vpop.f32.mrb[38].mxu0  ;;  %v2149_v27 = vpop.f32.mrb[103].mxu1 }
 0x2ad   : > { %v6525_v13 = vadd.f32 %v4710_v42, %v2597_v6  ;;  %v2599_v47 = vpop.f32.mrb[39].mxu0 }
 0x2b1   : > { %v6529_v9 = vpop.f32.mrb[104].mxu1 }
 0x2b2   : > { %6880 = vst [vmem:[#allocation7_spill] sm:$0xff] %v6529_v9  ;;  %v2602_v31 = vpop.f32.mrb[40].mxu0  ;;  %v2154_v44 = vpop.f32.mrb[105].mxu1 }
 0x2b3   : > { %v6533_v10 = vadd.f32 %v4712_v54, %v2602_v31  ;;  %v2604_v37 = vpop.f32.mrb[41].mxu0  ;;  %v6535_v35 = vpop.f32.mrb[106].mxu1 }
 0x2b4   : > { %6881 = vst [vmem:[#allocation8_spill] sm:$0xff] %v6535_v35  ;;  %v2605_v49 = vpop.f32.mrb[42].mxu0  ;;  %v2157_v27 = vpop.f32.mrb[107].mxu1 }
 0x2b5   : > { %v6537_v42 = vadd.f32 %v4714_v12, %v2605_v49  ;;  %v2607_v6 = vpop.f32.mrb[43].mxu0 }
 0x2b9   : > { %v6541_v47 = vpop.f32.mrb[108].mxu1 }
 0x2ba   : > { %6882 = vst [vmem:[#allocation9_spill] sm:$0xff] %v6541_v47  ;;  %v2610_v9 = vpop.f32.mrb[44].mxu0  ;;  %v2162_v44 = vpop.f32.mrb[109].mxu1 }
 0x2bb   : > { %v6545_v31 = vadd.f32 %v4716_v21, %v2610_v9  ;;  %v2612_v54 = vpop.f32.mrb[45].mxu0  ;;  %v6547_v37 = vpop.f32.mrb[110].mxu1 }
 0x2bc   : > { %6883 = vst [vmem:[#allocation10_spill] sm:$0xff] %v6547_v37  ;;  %v2613_v35 = vpop.f32.mrb[46].mxu0  ;;  %v2165_v27 = vpop.f32.mrb[111].mxu1 }
 0x2bd   : > { %v6549_v49 = vadd.f32 %v4718_v4, %v2613_v35  ;;  %v2615_v12 = vpop.f32.mrb[47].mxu0 }
 0x2c1   : > { %v6553_v6 = vpop.f32.mrb[112].mxu1 }
 0x2c2   : > { %6884 = vst [vmem:[#allocation11_spill] sm:$0xff] %v6553_v6  ;;  %v2618_v47 = vpop.f32.mrb[48].mxu0  ;;  %v2170_v44 = vpop.f32.mrb[113].mxu1 }
 0x2c3   : > { %v6557_v9 = vadd.f32 %v4720_v5, %v2618_v47  ;;  %v2620_v21 = vpop.f32.mrb[49].mxu0  ;;  %v6559_v54 = vpop.f32.mrb[114].mxu1 }
 0x2c4   : > { %6885 = vst [vmem:[#allocation12_spill] sm:$0xff] %v6559_v54  ;;  %v2621_v37 = vpop.f32.mrb[50].mxu0  ;;  %v2173_v27 = vpop.f32.mrb[115].mxu1 }
 0x2c5   : > { %v6561_v35 = vadd.f32 %v4722_v18, %v2621_v37  ;;  %v2623_v4 = vpop.f32.mrb[51].mxu0 }
 0x2c9   : > { %v6565_v12 = vpop.f32.mrb[116].mxu1 }
 0x2ca   : > { %6886 = vst [vmem:[#allocation13_spill] sm:$0xff] %v6565_v12  ;;  %v2626_v6 = vpop.f32.mrb[52].mxu0  ;;  %v2178_v44 = vpop.f32.mrb[117].mxu1 }
 0x2cb   : > { %v6569_v47 = vadd.f32 %v4724_v7, %v2626_v6  ;;  %v2628_v5 = vpop.f32.mrb[53].mxu0  ;;  %v6571_v21 = vpop.f32.mrb[118].mxu1 }
 0x2cc   : > { %6887 = vst [vmem:[#allocation14_spill] sm:$0xff] %v6571_v21  ;;  %v2629_v54 = vpop.f32.mrb[54].mxu0  ;;  %v2181_v27 = vpop.f32.mrb[119].mxu1 }
 0x2cd   : > { %v6573_v37 = vadd.f32 %v4726_v63, %v2629_v54  ;;  %v2631_v18 = vpop.f32.mrb[55].mxu0 }
 0x2d1   : > { %v6577_v4 = vpop.f32.mrb[120].mxu1 }
 0x2d2   : > { %6888 = vst [vmem:[#allocation15_spill] sm:$0xff] %v6577_v4  ;;  %v2634_v12 = vpop.f32.mrb[56].mxu0  ;;  %v2186_v44 = vpop.f32.mrb[121].mxu1 }
 0x2d3   : > { %v6581_v6 = vadd.f32 %v4728_v38, %v2634_v12  ;;  %v2636_v7 = vpop.f32.mrb[57].mxu0  ;;  %v6583_v5 = vpop.f32.mrb[122].mxu1  ;;  %v4734_v12 = vadd.f32 %v6325_v50, %v6320_v39 }
 0x2d4   : > { %6890 = vst [vmem:[#allocation17_spill] sm:$0xff] %v6583_v5  ;;  %v2637_v21 = vpop.f32.mrb[58].mxu0  ;;  %v2189_v27 = vpop.f32.mrb[123].mxu1  ;;  %v3132_v5 = vunpack.c.0.s8 %v3131_v22 }
 0x2d5   : > { %6889 = vst [vmem:[#allocation16_spill] sm:$0xff] %v6581_v6  ;;  %v6585_v54 = vadd.f32 %v4730_v60, %v2637_v21  ;;  %v2639_v63 = vpop.f32.mrb[59].mxu0 }
 0x2d7   : > { %6891 = vst [vmem:[#allocation18_spill] sm:$0xff] %v6585_v54 }
 0x2d9   : > { %v6589_v18 = vpop.f32.mrb[124].mxu1 }
 0x2da   : > { %6892 = vst [vmem:[#allocation19_spill] sm:$0xff] %v6589_v18  ;;  %v2642_v4 = vpop.f32.mrb[60].mxu0  ;;  %v2194_v44 = vpop.f32.mrb[125].mxu1  ;;  %v3134_v18 = vshrl.u32 %v3133_v20, 7 }
 0x2db   : > { %v6593_v38 = vadd.f32 %v4732_v57, %v2642_v4  ;;  %v2644_v7 = vpop.f32.mrb[61].mxu0  ;;  %v6595_v27 = vpop.f32.mrb[126].mxu1  ;;  %v4736_v44 = vadd.f32 %v6325_v50, %v6335_v24  ;;  %v4738_v57 = vadd.f32 %v6325_v50, %v6343_v23 }
 0x2dc   : > { %6894 = vst [vmem:[#allocation21_spill] sm:$0xff] %v6595_v27  ;;  %v2645_v21 = vpop.f32.mrb[62].mxu0  ;;  %v2197_v60 = vpop.f32.mrb[127].mxu1  ;;  %v6602_v39 = vsub.s32 %v3132_v5, %v3134_v18 }
 0x2dd   : > { %6893 = vst [vmem:[#allocation20_spill] sm:$0xff] %v6593_v38  ;;  %v6597_v63 = vadd.f32 %v4734_v12, %v2645_v21  ;;  %v2647_v45 = vpop.f32.mrb[63].mxu0 }
 0x2df   : > { %6895 = vst [vmem:[#allocation22_spill] sm:$0xff] %v6597_v63 }
 0x2e1   : > { %v4578_v34 = vpop.f32.mrb[128].mxu1 }
 0x2e2   : > { %v2650_v54 = vpop.f32.mrb[64].mxu0  ;;  %v2820_v6 = vadd.f32 %v6361_v33, %v4578_v34  ;;  %v2811_v4 = vpop.f32.mrb[129].mxu1 }
 0x2e3   : > { %v6606_v7 = vadd.f32 %v4736_v44, %v2650_v54  ;;  %v2652_v12 = vpop.f32.mrb[65].mxu0  ;;  %v2812_v21 = vadd.f32 %v6341_v40, %v2811_v4  ;;  %v4579_v22 = vpop.f32.mrb[130].mxu1 }
 0x2e4   : > { %v3068_v20 = vmax.f32 %v2820_v6, 0.0  ;;  %v2653_v60 = vpop.f32.mrb[66].mxu0  ;;  %v2823_v24 = vadd.f32 %v6365_v14, %v4579_v22  ;;  %v2814_v45 = vpop.f32.mrb[131].mxu1  ;;  %v4740_v6 = vadd.f32 %v6325_v50, %v6355_v11  ;;  %v4742_v12 = vadd.f32 %v6325_v50, %v6363_v25 }
 0x2e5   : > { %6896 = vst [vmem:[#allocation23_spill] sm:$0xff] %v6606_v7  ;;  %v3066_v27 = vmax.f32 %v2812_v21, 0.0  ;;  %v6610_v63 = vadd.f32 %v4738_v57, %v2653_v60  ;;  %v2655_v33 = vpop.f32.mrb[67].mxu0  ;;  %v2815_v5 = vadd.f32 %v6345_v41, %v2814_v45 }
 0x2e6   : > { %v3150_v18 = vrot.slane %v3068_v20, %v6602_v39  ;;  %v3069_v23 = vmax.f32 %v2823_v24, 0.0 }
 0x2e7   : > { %6897 = vst [vmem:[#allocation24_spill] sm:$0xff] %v6610_v63  ;;  %v3136_v54 = vrot.slane %v3066_v27, %v6602_v39  ;;  %v3067_v44 = vmax.f32 %v2815_v5, 0.0 }
 0x2e8   : > { %v3644_v34 = vrot.slane %v3150_v18, 4  ;;  %v3157_v40 = vrot.slane %v3069_v23, %v6602_v39 }
 0x2e9   : > { %v3642_v14 = vrot.slane %v3136_v54, 4  ;;  %v3143_v4 = vrot.slane %v3067_v44, %v6602_v39  ;;  %v4582_v57 = vpop.f32.mrb[132].mxu1 }
 0x2ea   : > { %v3772_v41 = vmax.f32 %v3150_v18, %v3644_v34  ;;  %v3645_v21 = vrot.slane %v3157_v40, 4  ;;  %v2658_v22 = vpop.f32.mrb[68].mxu0  ;;  %v2836_v20 = vadd.f32 %v6444_v61, %v4582_v57  ;;  %v2827_v27 = vpop.f32.mrb[133].mxu1 }
 0x2eb   : > { %v3770_v60 = vmax.f32 %v3136_v54, %v3642_v14  ;;  %v3643_v24 = vrot.slane %v3143_v4, 4  ;;  %v6622_v45 = vadd.f32 %v4740_v6, %v2658_v22  ;;  %v2660_v33 = vpop.f32.mrb[69].mxu0  ;;  %v2828_v11 = vadd.f32 %v6425_v30, %v2827_v27  ;;  %v4583_v5 = vpop.f32.mrb[134].mxu1 }
 0x2ec   : > { %v3773_v23 = vmax.f32 %v3157_v40, %v3645_v21  ;;  %v3072_v44 = vmax.f32 %v2836_v20, 0.0  ;;  %v2661_v63 = vpop.f32.mrb[70].mxu0  ;;  %v2839_v7 = vadd.f32 %v6448_v17, %v4583_v5  ;;  %v2830_v25 = vpop.f32.mrb[135].mxu1 }
 0x2ed   : > { %v3834_v18 = vmax.f32 %v3770_v60, %v3772_v41  ;;  %v3771_v34 = vmax.f32 %v3143_v4, %v3643_v24  ;;  %v3070_v38 = vmax.f32 %v2828_v11, 0.0  ;;  %v6626_v59 = vadd.f32 %v4742_v12, %v2661_v63  ;;  %v2663_v61 = vpop.f32.mrb[71].mxu0 }
 0x2ee   : > { %v3178_v54 = vrot.slane %v3072_v44, %v6602_v39  ;;  %v3073_v6 = vmax.f32 %v2839_v7, 0.0  ;;  %v2831_v14 = vadd.f32 %v6430_v58, %v2830_v25  ;;  %v4744_v4 = vadd.f32 %v6325_v50, %v6419_v56 }
 0x2ef   : > { %v3835_v57 = vmax.f32 %v3771_v34, %v3773_v23  ;;  %v3164_v30 = vrot.slane %v3070_v38, %v6602_v39  ;;  %v4746_v38 = vadd.f32 %v6325_v50, %v6427_v55 }
 0x2f0   : > { %v3648_v40 = vrot.slane %v3178_v54, 4  ;;  %v3185_v21 = vrot.slane %v3073_v6, %v6602_v39  ;;  %v3071_v17 = vmax.f32 %v2831_v14, 0.0 }
 0x2f1   : > { %v3934_v41 = vcombine.low %v3834_v18, %v3835_v57  ;;  %v3646_v63 = vrot.slane %v3164_v30, 4  ;;  %v4586_v12 = vpop.f32.mrb[136].mxu1 }
 0x2f2   : > { %v3776_v22 = vmax.f32 %v3178_v54, %v3648_v40  ;;  %v3649_v20 = vrot.slane %v3185_v21, 4  ;;  %v3171_v7 = vrot.slane %v3071_v17, %v6602_v39  ;;  %v2666_v27 = vpop.f32.mrb[72].mxu0  ;;  %v2852_v58 = vadd.f32 %v6473_v0, %v4586_v12  ;;  %v2843_v60 = vpop.f32.mrb[137].mxu1 }
 0x2f3   : > { %4502 = vst [vmem:[%s6376_s21 + $0x11] sm:$0xff] %v3934_v41  ;;  %v3774_v24 = vmax.f32 %v3164_v30, %v3646_v63  ;;  %v6639_v33 = vadd.f32 %v4744_v4, %v2666_v27  ;;  %v2668_v11 = vpop.f32.mrb[73].mxu0  ;;  %v2844_v56 = vadd.f32 %v6461_v62, %v2843_v60  ;;  %v4587_v5 = vpop.f32.mrb[138].mxu1  ;;  %v4750_v63 = vadd.f32 %v6325_v50, %v6446_v32 }
 0x2f4   : > { %v3777_v23 = vmax.f32 %v3185_v21, %v3649_v20  ;;  %v3647_v44 = vrot.slane %v3171_v7, 4  ;;  %v3076_v25 = vmax.f32 %v2852_v58, 0.0  ;;  %v2669_v18 = vpop.f32.mrb[74].mxu0  ;;  %v2855_v34 = vadd.f32 %v6477_v29, %v4587_v5  ;;  %v2846_v61 = vpop.f32.mrb[139].mxu1 }
 0x2f5   : > { %v3836_v0 = vmax.f32 %v3774_v24, %v3776_v22  ;;  %v3074_v54 = vmax.f32 %v2844_v56, 0.0  ;;  %v6643_v6 = vadd.f32 %v4746_v38, %v2669_v18  ;;  %v2671_v55 = vpop.f32.mrb[75].mxu0  ;;  %v2847_v14 = vadd.f32 %v6465_v26, %v2846_v61 }
 0x2f6   : > { %v3775_v57 = vmax.f32 %v3171_v7, %v3647_v44  ;;  %v3206_v30 = vrot.slane %v3076_v25, %v6602_v39  ;;  %v3077_v40 = vmax.f32 %v2855_v34, 0.0  ;;  %v4748_v29 = vadd.f32 %v6325_v50, %v6438_v28 }
 0x2f7   : > { %v3192_v62 = vrot.slane %v3074_v54, %v6602_v39  ;;  %v3075_v21 = vmax.f32 %v2847_v14, 0.0 }
 0x2f8   : > { %v3837_v17 = vmax.f32 %v3775_v57, %v3777_v23  ;;  %v3652_v4 = vrot.slane %v3206_v30, 4  ;;  %v3213_v41 = vrot.slane %v3077_v40, %v6602_v39 }
 0x2f9   : > { %v3650_v12 = vrot.slane %v3192_v62, 4  ;;  %v3199_v26 = vrot.slane %v3075_v21, %v6602_v39  ;;  %v4590_v22 = vpop.f32.mrb[140].mxu1 }
 0x2fa   : > { %v3935_v20 = vcombine.low %v3836_v0, %v3837_v17  ;;  %v3780_v7 = vmax.f32 %v3206_v30, %v3652_v4  ;;  %v3653_v27 = vrot.slane %v3213_v41, 4  ;;  %v2674_v58 = vpop.f32.mrb[76].mxu0  ;;  %v2868_v60 = vadd.f32 %v6497_v48, %v4590_v22  ;;  %v2859_v38 = vpop.f32.mrb[141].mxu1 }
 0x2fb   : > { %v3778_v24 = vmax.f32 %v3192_v62, %v3650_v12  ;;  %v3651_v11 = vrot.slane %v3199_v26, 4  ;;  %v6655_v56 = vadd.f32 %v4748_v29, %v2674_v58  ;;  %v2676_v28 = vpop.f32.mrb[77].mxu0  ;;  %v2860_v5 = vadd.f32 %v6485_v1, %v2859_v38  ;;  %v4591_v32 = vpop.f32.mrb[142].mxu1 }
 0x2fc   : > { %4503 = vst [vmem:[%s6376_s21 + $0x21] sm:$0xff] %v3935_v20  ;;  %v3781_v23 = vmax.f32 %v3213_v41, %v3653_v27  ;;  %v3080_v44 = vmax.f32 %v2868_v60, 0.0  ;;  %v2677_v25 = vpop.f32.mrb[78].mxu0  ;;  %v2871_v18 = vadd.f32 %v6501_v51, %v4591_v32  ;;  %v2862_v34 = vpop.f32.mrb[143].mxu1  ;;  %v4752_v17 = vadd.f32 %v6325_v50, %v6457_v2 }
 0x2fd   : > { %v3838_v61 = vmax.f32 %v3778_v24, %v3780_v7  ;;  %v3779_v0 = vmax.f32 %v3199_v26, %v3651_v11  ;;  %v3078_v54 = vmax.f32 %v2860_v5, 0.0  ;;  %v6660_v48 = vadd.f32 %v4750_v63, %v2677_v25  ;;  %v2679_v55 = vpop.f32.mrb[79].mxu0 }
 0x2fe   : > { %v3234_v14 = vrot.slane %v3080_v44, %v6602_v39  ;;  %v3081_v57 = vmax.f32 %v2871_v18, 0.0  ;;  %v2863_v30 = vadd.f32 %v6489_v15, %v2862_v34  ;;  %v4754_v7 = vadd.f32 %v6325_v50, %v6463_v53 }
 0x2ff   : > { %v3839_v1 = vmax.f32 %v3779_v0, %v3781_v23  ;;  %v3220_v40 = vrot.slane %v3078_v54, %v6602_v39 }
 0x300   : > { %v3656_v62 = vrot.slane %v3234_v14, 4  ;;  %v3241_v21 = vrot.slane %v3081_v57, %v6602_v39  ;;  %v3079_v51 = vmax.f32 %v2863_v30, 0.0  ;;  %v4758_v30 = vadd.f32 %v6325_v50, %v6475_v19 }
 0x301   : > { %v3936_v4 = vcombine.low %v3838_v61, %v3839_v1  ;;  %v3654_v41 = vrot.slane %v3220_v40, 4  ;;  %v4594_v29 = vpop.f32.mrb[144].mxu1 }
 0x302   : > { %v3784_v63 = vmax.f32 %v3234_v14, %v3656_v62  ;;  %v3657_v12 = vrot.slane %v3241_v21, 4  ;;  %v3227_v26 = vrot.slane %v3079_v51, %v6602_v39  ;;  %v2682_v22 = vpop.f32.mrb[80].mxu0  ;;  %v2884_v15 = vadd.f32 %v6521_v52, %v4594_v29  ;;  %v2875_v20 = vpop.f32.mrb[145].mxu1 }
 0x303   : > { %4504 = vst [vmem:[%s6376_s21 + $0x31] sm:$0xff] %v3936_v4  ;;  %v3782_v27 = vmax.f32 %v3220_v40, %v3654_v41  ;;  %v6673_v58 = vadd.f32 %v4752_v17, %v2682_v22  ;;  %v2684_v60 = vpop.f32.mrb[81].mxu0  ;;  %v2876_v2 = vadd.f32 %v6509_v36, %v2875_v20  ;;  %v4595_v38 = vpop.f32.mrb[146].mxu1 }
 0x304   : > { %v3785_v24 = vmax.f32 %v3241_v21, %v3657_v12  ;;  %v3655_v11 = vrot.slane %v3227_v26, 4  ;;  %v3084_v28 = vmax.f32 %v2884_v15, 0.0  ;;  %v2685_v5 = vpop.f32.mrb[82].mxu0  ;;  %v2887_v32 = vadd.f32 %v6525_v13, %v4595_v38  ;;  %v2878_v23 = vpop.f32.mrb[147].mxu1 }
 0x305   : > { %v3840_v52 = vmax.f32 %v3782_v27, %v3784_v63  ;;  %v3082_v44 = vmax.f32 %v2876_v2, 0.0  ;;  %v6677_v25 = vadd.f32 %v4754_v7, %v2685_v5  ;;  %v2687_v53 = vpop.f32.mrb[83].mxu0  ;;  %v2879_v18 = vadd.f32 %v6513_v43, %v2878_v23 }
 0x306   : > { %v3783_v34 = vmax.f32 %v3227_v26, %v3655_v11  ;;  %v3262_v61 = vrot.slane %v3084_v28, %v6602_v39  ;;  %v3085_v0 = vmax.f32 %v2887_v32, 0.0  ;;  %v4756_v13 = vadd.f32 %v6325_v50, %v6469_v3 }
 0x307   : > { %v3248_v36 = vrot.slane %v3082_v44, %v6602_v39  ;;  %v3083_v54 = vmax.f32 %v2879_v18, 0.0 }
 0x308   : > { %v3841_v55 = vmax.f32 %v3783_v34, %v3785_v24  ;;  %v3660_v14 = vrot.slane %v3262_v61, 4  ;;  %v3269_v57 = vrot.slane %v3085_v0, %v6602_v39 }
 0x309   : > { %v3658_v1 = vrot.slane %v3248_v36, 4  ;;  %v3255_v43 = vrot.slane %v3083_v54, %v6602_v39  ;;  %v4598_v40 = vpop.f32.mrb[148].mxu1 }
 0x30a   : > { %v3937_v62 = vcombine.low %v3840_v52, %v3841_v55  ;;  %v3788_v21 = vmax.f32 %v3262_v61, %v3660_v14  ;;  %v3661_v51 = vrot.slane %v3269_v57, 4  ;;  %v2690_v17 = vpop.f32.mrb[84].mxu0  ;;  %v2900_v4 = vadd.f32 %v6545_v31, %v4598_v40  ;;  %v2891_v41 = vpop.f32.mrb[149].mxu1  ;;  %v6703_v52 = vld [vmem:[%s6865_s2] ss:$0 sm:$0xff] }
 0x30b   : > { %v3786_v29 = vmax.f32 %v3248_v36, %v3658_v1  ;;  %v3659_v63 = vrot.slane %v3255_v43, 4  ;;  %v6689_v12 = vadd.f32 %v4756_v13, %v2690_v17  ;;  %v2692_v3 = vpop.f32.mrb[85].mxu0  ;;  %v2892_v26 = vadd.f32 %v6533_v10, %v2891_v41  ;;  %v4599_v50 = vpop.f32.mrb[150].mxu1 }
 0x30c   : > { %4505 = vst [vmem:[%s6376_s21 + $0x41] sm:$0xff] %v3937_v62  ;;  %v3789_v19 = vmax.f32 %v3269_v57, %v3661_v51  ;;  %v3088_v22 = vmax.f32 %v2900_v4, 0.0  ;;  %v2693_v15 = vpop.f32.mrb[86].mxu0  ;;  %v2903_v20 = vadd.f32 %v6549_v49, %v4599_v50  ;;  %v2894_v7 = vpop.f32.mrb[151].mxu1  ;;  %v4760_v44 = vadd.f32 %v6703_v52, %v6481_v16 }
 0x30d   : > { %v3842_v27 = vmax.f32 %v3786_v29, %v3788_v21  ;;  %v3787_v60 = vmax.f32 %v3255_v43, %v3659_v63  ;;  %v3086_v2 = vmax.f32 %v2892_v26, 0.0  ;;  %v6694_v31 = vadd.f32 %v4758_v30, %v2693_v15  ;;  %v2695_v38 = vpop.f32.mrb[87].mxu0 }
 0x30e   : > { %v3290_v24 = vrot.slane %v3088_v22, %v6602_v39  ;;  %v3089_v11 = vmax.f32 %v2903_v20, 0.0  ;;  %v2895_v28 = vadd.f32 %v6537_v42, %v2894_v7  ;;  %v4762_v14 = vadd.f32 %v6703_v52, %v6487_v8  ;;  %v6898_v20 = vld [vmem:[#allocation2_spill] sm:$0xff] }
 0x30f   : > { %v3843_v10 = vmax.f32 %v3787_v60, %v3789_v19  ;;  %v3276_v5 = vrot.slane %v3086_v2, %v6602_v39  ;;  %v4766_v7 = vadd.f32 %v6703_v52, %v6898_v20  ;;  %v6904_v20 = vld [vmem:[#allocation4_spill] sm:$0xff] }
 0x310   : > { %v3664_v32 = vrot.slane %v3290_v24, 4  ;;  %v3297_v23 = vrot.slane %v3089_v11, %v6602_v39  ;;  %v3087_v49 = vmax.f32 %v2895_v28, 0.0  ;;  %v6899_v28 = vld [vmem:[#allocation20_spill] sm:$0xff] }
 0x311   : > { %v3938_v53 = vcombine.low %v3842_v27, %v3843_v10  ;;  %v3662_v18 = vrot.slane %v3276_v5, 4  ;;  %v4602_v34 = vpop.f32.mrb[152].mxu1 }
 0x312   : > { %v3792_v42 = vmax.f32 %v3290_v24, %v3664_v32  ;;  %v3665_v61 = vrot.slane %v3297_v23, 4  ;;  %v3283_v0 = vrot.slane %v3087_v49, %v6602_v39  ;;  %v2698_v36 = vpop.f32.mrb[88].mxu0  ;;  %v2916_v54 = vadd.f32 %v6569_v47, %v4602_v34  ;;  %v2907_v55 = vpop.f32.mrb[153].mxu1 }
 0x313   : > { %4506 = vst [vmem:[%s6376_s21 + $0x51] sm:$0xff] %v3938_v53  ;;  %v3790_v57 = vmax.f32 %v3276_v5, %v3662_v18  ;;  %v6712_v13 = vadd.f32 %v4760_v44, %v2698_v36  ;;  %v2700_v30 = vpop.f32.mrb[89].mxu0  ;;  %v2908_v16 = vadd.f32 %v6557_v9, %v2907_v55  ;;  %v4603_v1 = vpop.f32.mrb[154].mxu1  ;;  %v6900_v44 = vld [vmem:[#allocation16_spill] sm:$0xff] }
 0x314   : > { %v3793_v43 = vmax.f32 %v3297_v23, %v3665_v61  ;;  %v3663_v40 = vrot.slane %v3283_v0, 4  ;;  %v3092_v62 = vmax.f32 %v2916_v54, 0.0  ;;  %v2701_v21 = vpop.f32.mrb[90].mxu0  ;;  %v2919_v51 = vadd.f32 %v6573_v37, %v4603_v1  ;;  %v2910_v17 = vpop.f32.mrb[155].mxu1 }
 0x315   : > { %v3844_v47 = vmax.f32 %v3790_v57, %v3792_v42  ;;  %v3090_v4 = vmax.f32 %v2908_v16, 0.0  ;;  %v6716_v41 = vadd.f32 %v4762_v14, %v2701_v21  ;;  %v2703_v8 = vpop.f32.mrb[91].mxu0  ;;  %v2911_v29 = vadd.f32 %v6561_v35, %v2910_v17 }
 0x316   : > { %v3791_v63 = vmax.f32 %v3283_v0, %v3663_v40  ;;  %v3318_v3 = vrot.slane %v3092_v62, %v6602_v39  ;;  %v3093_v26 = vmax.f32 %v2919_v51, 0.0  ;;  %v4764_v37 = vadd.f32 %v6703_v52, %v6493_v46  ;;  %v6901_v0 = vld [vmem:[#allocation22_spill] sm:$0xff]  ;;  %v6903_v8 = vld [vmem:[#allocation3_spill] sm:$0xff] }
 0x317   : > { %v3304_v9 = vrot.slane %v3090_v4, %v6602_v39  ;;  %v3091_v50 = vmax.f32 %v2911_v29, 0.0  ;;  %v6902_v40 = vld [vmem:[#allocation18_spill] sm:$0xff]  ;;  %v4768_v29 = vadd.f32 %v6703_v52, %v6903_v8 }
 0x318   : > { %v3845_v19 = vmax.f32 %v3791_v63, %v3793_v43  ;;  %v3668_v22 = vrot.slane %v3318_v3, 4  ;;  %v3325_v15 = vrot.slane %v3093_v26, %v6602_v39 }
 0x319   : > { %v3666_v27 = vrot.slane %v3304_v9, 4  ;;  %v3311_v35 = vrot.slane %v3091_v50, %v6602_v39  ;;  %v4606_v60 = vpop.f32.mrb[156].mxu1 }
 0x31a   : > { %v3939_v2 = vcombine.low %v3844_v47, %v3845_v19  ;;  %v3796_v38 = vmax.f32 %v3318_v3, %v3668_v22  ;;  %v3669_v24 = vrot.slane %v3325_v15, 4  ;;  %v2706_v11 = vpop.f32.mrb[92].mxu0  ;;  %v2932_v10 = vadd.f32 %v6899_v28, %v4606_v60  ;;  %v2923_v5 = vpop.f32.mrb[157].mxu1 }
 0x31b   : > { %v3794_v32 = vmax.f32 %v3304_v9, %v3666_v27  ;;  %v3667_v23 = vrot.slane %v3311_v35, 4  ;;  %v6728_v49 = vadd.f32 %v4764_v37, %v2706_v11  ;;  %v2708_v46 = vpop.f32.mrb[93].mxu0  ;;  %v2924_v53 = vadd.f32 %v6900_v44, %v2923_v5  ;;  %v4607_v18 = vpop.f32.mrb[158].mxu1 }
 0x31c   : > { %4507 = vst [vmem:[%s6376_s21 + $0x61] sm:$0xff] %v3939_v2  ;;  %v3797_v34 = vmax.f32 %v3325_v15, %v3669_v24  ;;  %v3096_v42 = vmax.f32 %v2932_v10, 0.0  ;;  %v2709_v61 = vpop.f32.mrb[94].mxu0  ;;  %v2935_v36 = vadd.f32 %v6901_v0, %v4607_v18  ;;  %v2926_v54 = vpop.f32.mrb[159].mxu1  ;;  %v6905_v2 = vld [vmem:[#allocation23_spill] sm:$0xff]  ;;  %v6906_v18 = vld [vmem:[#allocation24_spill] sm:$0xff] }
 0x31d   : > { %v3846_v55 = vmax.f32 %v3794_v32, %v3796_v38  ;;  %v3795_v14 = vmax.f32 %v3311_v35, %v3667_v23  ;;  %v3094_v57 = vmax.f32 %v2924_v53, 0.0  ;;  %v6733_v30 = vadd.f32 %v4766_v7, %v2709_v61  ;;  %v2711_v16 = vpop.f32.mrb[95].mxu0 }
 0x31e   : > { %v3346_v1 = vrot.slane %v3096_v42, %v6602_v39  ;;  %v3097_v43 = vmax.f32 %v2935_v36, 0.0  ;;  %v2927_v62 = vadd.f32 %v6902_v40, %v2926_v54  ;;  %v4770_v7 = vadd.f32 %v6703_v52, %v6904_v20 }
 0x31f   : > { %v3847_v21 = vmax.f32 %v3795_v14, %v3797_v34  ;;  %v3332_v51 = vrot.slane %v3094_v57, %v6602_v39 }
 0x320   : > { %v3672_v17 = vrot.slane %v3346_v1, 4  ;;  %v3353_v47 = vrot.slane %v3097_v43, %v6602_v39  ;;  %v3095_v4 = vmax.f32 %v2927_v62, 0.0 }
 0x321   : > { %v3940_v63 = vcombine.low %v3846_v55, %v3847_v21  ;;  %v3670_v3 = vrot.slane %v3332_v51, 4  ;;  %v4610_v26 = vpop.f32.mrb[160].mxu1 }
 0x322   : > { %v3800_v9 = vmax.f32 %v3346_v1, %v3672_v17  ;;  %v3673_v50 = vrot.slane %v3353_v47, 4  ;;  %v3339_v19 = vrot.slane %v3095_v4, %v6602_v39  ;;  %v2714_v22 = vpop.f32.mrb[96].mxu0  ;;  %v2948_v15 = vadd.f32 %v6622_v45, %v4610_v26  ;;  %v2939_v37 = vpop.f32.mrb[161].mxu1  ;;  %v6908_v1 = vld [vmem:[#allocation6_spill] sm:$0xff] }
 0x323   : > { %4508 = vst [vmem:[%s6376_s21 + $0x71] sm:$0xff] %v3940_v63  ;;  %v3798_v27 = vmax.f32 %v3332_v51, %v3670_v3  ;;  %v6746_v35 = vadd.f32 %v4768_v29, %v2714_v22  ;;  %v2716_v60 = vpop.f32.mrb[97].mxu0  ;;  %v2940_v38 = vadd.f32 %v6905_v2, %v2939_v37  ;;  %v4611_v24 = vpop.f32.mrb[162].mxu1  ;;  %v4774_v43 = vadd.f32 %v6703_v52, %v6908_v1 }
 0x324   : > { %v3801_v11 = vmax.f32 %v3353_v47, %v3673_v50  ;;  %v3671_v28 = vrot.slane %v3339_v19, 4  ;;  %v3100_v10 = vmax.f32 %v2948_v15, 0.0  ;;  %v2717_v5 = vpop.f32.mrb[98].mxu0  ;;  %v2951_v32 = vadd.f32 %v6626_v59, %v4611_v24  ;;  %v2942_v23 = vpop.f32.mrb[163].mxu1  ;;  %v6907_v59 = vld [vmem:[#allocation5_spill] sm:$0xff] }
 0x325   : > { %v3848_v45 = vmax.f32 %v3798_v27, %v3800_v9  ;;  %v3098_v46 = vmax.f32 %v2940_v38, 0.0  ;;  %v6750_v44 = vadd.f32 %v4770_v7, %v2717_v5  ;;  %v2719_v53 = vpop.f32.mrb[99].mxu0  ;;  %v2943_v34 = vadd.f32 %v6906_v18, %v2942_v23  ;;  %v6909_v23 = vld [vmem:[#allocation7_spill] sm:$0xff] }
 0x326   : > { %v3799_v42 = vmax.f32 %v3339_v19, %v3671_v28  ;;  %v3374_v61 = vrot.slane %v3100_v10, %v6602_v39  ;;  %v3101_v0 = vmax.f32 %v2951_v32, 0.0  ;;  %v4772_v16 = vadd.f32 %v6703_v52, %v6907_v59 }
 0x327   : > { %v3360_v36 = vrot.slane %v3098_v46, %v6602_v39  ;;  %v3099_v54 = vmax.f32 %v2943_v34, 0.0 }
 0x328   : > { %v3849_v55 = vmax.f32 %v3799_v42, %v3801_v11  ;;  %v3676_v14 = vrot.slane %v3374_v61, 4  ;;  %v3381_v57 = vrot.slane %v3101_v0, %v6602_v39 }
 0x329   : > { %v3674_v40 = vrot.slane %v3360_v36, 4  ;;  %v3367_v62 = vrot.slane %v3099_v54, %v6602_v39  ;;  %v4614_v21 = vpop.f32.mrb[164].mxu1  ;;  %v6910_v54 = vld [vmem:[#allocation8_spill] sm:$0xff] }
 0x32a   : > { %v3941_v51 = vcombine.low %v3848_v45, %v3849_v55  ;;  %v3804_v17 = vmax.f32 %v3374_v61, %v3676_v14  ;;  %v3677_v47 = vrot.slane %v3381_v57, 4  ;;  %v2722_v4 = vpop.f32.mrb[100].mxu0  ;;  %v2964_v8 = vadd.f32 %v6655_v56, %v4614_v21  ;;  %v2955_v29 = vpop.f32.mrb[165].mxu1 }
 0x32b   : > { %v3802_v63 = vmax.f32 %v3360_v36, %v3674_v40  ;;  %v3675_v3 = vrot.slane %v3367_v62, 4  ;;  %v6762_v26 = vadd.f32 %v4772_v16, %v2722_v4  ;;  %v2724_v9 = vpop.f32.mrb[101].mxu0  ;;  %v2956_v50 = vadd.f32 %v6639_v33, %v2955_v29  ;;  %v4615_v19 = vpop.f32.mrb[166].mxu1 }
 0x32c   : > { %4509 = vst [vmem:[%s6376_s21 + $0x81] sm:$0xff] %v3941_v51  ;;  %v3805_v22 = vmax.f32 %v3381_v57, %v3677_v47  ;;  %v3104_v15 = vmax.f32 %v2964_v8, 0.0  ;;  %v2725_v37 = vpop.f32.mrb[102].mxu0  ;;  %v2967_v20 = vadd.f32 %v6660_v48, %v4615_v19  ;;  %v2958_v7 = vpop.f32.mrb[167].mxu1  ;;  %v4776_v45 = vadd.f32 %v6703_v52, %v6909_v23 }
 0x32d   : > { %v3850_v27 = vmax.f32 %v3802_v63, %v3804_v17  ;;  %v3803_v60 = vmax.f32 %v3367_v62, %v3675_v3  ;;  %v3102_v2 = vmax.f32 %v2956_v50, 0.0  ;;  %v6767_v56 = vadd.f32 %v4774_v43, %v2725_v37  ;;  %v2727_v38 = vpop.f32.mrb[103].mxu0 }
 0x32e   : > { %v3402_v24 = vrot.slane %v3104_v15, %v6602_v39  ;;  %v3105_v11 = vmax.f32 %v2967_v20, 0.0  ;;  %v2959_v28 = vadd.f32 %v6643_v6, %v2958_v7  ;;  %v4778_v55 = vadd.f32 %v6703_v52, %v6910_v54  ;;  %v6912_v20 = vld [vmem:[#allocation10_spill] sm:$0xff] }
 0x32f   : > { %v3851_v33 = vmax.f32 %v3803_v60, %v3805_v22  ;;  %v3388_v10 = vrot.slane %v3102_v2, %v6602_v39  ;;  %v4782_v7 = vadd.f32 %v6703_v52, %v6912_v20 }
 0x330   : > { %v3680_v5 = vrot.slane %v3402_v24, 4  ;;  %v3409_v32 = vrot.slane %v3105_v11, %v6602_v39  ;;  %v3103_v48 = vmax.f32 %v2959_v28, 0.0 }
 0x331   : > { %v3942_v46 = vcombine.low %v3850_v27, %v3851_v33  ;;  %v3678_v53 = vrot.slane %v3388_v10, 4  ;;  %v4618_v18 = vpop.f32.mrb[168].mxu1 }
 0x332   : > { %v3808_v34 = vmax.f32 %v3402_v24, %v3680_v5  ;;  %v3681_v42 = vrot.slane %v3409_v32, 4  ;;  %v3395_v61 = vrot.slane %v3103_v48, %v6602_v39  ;;  %v2730_v0 = vpop.f32.mrb[104].mxu0  ;;  %v2980_v6 = vadd.f32 %v6689_v12, %v4618_v18  ;;  %v2971_v36 = vpop.f32.mrb[169].mxu1 }
 0x333   : > { %4510 = vst [vmem:[%s6376_s21 + $0x91] sm:$0xff] %v3942_v46  ;;  %v3806_v14 = vmax.f32 %v3388_v10, %v3678_v53  ;;  %v6780_v57 = vadd.f32 %v4776_v45, %v2730_v0  ;;  %v2732_v59 = vpop.f32.mrb[105].mxu0  ;;  %v2972_v16 = vadd.f32 %v6673_v58, %v2971_v36  ;;  %v4619_v1 = vpop.f32.mrb[170].mxu1 }
 0x334   : > { %v3809_v43 = vmax.f32 %v3409_v32, %v3681_v42  ;;  %v3679_v40 = vrot.slane %v3395_v61, 4  ;;  %v3108_v62 = vmax.f32 %v2980_v6, 0.0  ;;  %v2733_v21 = vpop.f32.mrb[106].mxu0  ;;  %v2983_v51 = vadd.f32 %v6694_v31, %v4619_v1  ;;  %v2974_v17 = vpop.f32.mrb[171].mxu1  ;;  %v6911_v31 = vld [vmem:[#allocation9_spill] sm:$0xff] }
 0x335   : > { %v3852_v12 = vmax.f32 %v3806_v14, %v3808_v34  ;;  %v3106_v47 = vmax.f32 %v2972_v16, 0.0  ;;  %v6784_v4 = vadd.f32 %v4778_v55, %v2733_v21  ;;  %v2735_v8 = vpop.f32.mrb[107].mxu0  ;;  %v2975_v29 = vadd.f32 %v6677_v25, %v2974_v17 }
 0x336   : > { %v3807_v63 = vmax.f32 %v3395_v61, %v3679_v40  ;;  %v3430_v3 = vrot.slane %v3108_v62, %v6602_v39  ;;  %v3109_v9 = vmax.f32 %v2983_v51, 0.0  ;;  %v4780_v37 = vadd.f32 %v6703_v52, %v6911_v31 }
 0x337   : > { %v3416_v58 = vrot.slane %v3106_v47, %v6602_v39  ;;  %v3107_v50 = vmax.f32 %v2975_v29, 0.0 }
 0x338   : > { %v3853_v19 = vmax.f32 %v3807_v63, %v3809_v43  ;;  %v3684_v22 = vrot.slane %v3430_v3, 4  ;;  %v3437_v15 = vrot.slane %v3109_v9, %v6602_v39  ;;  %v6913_v43 = vld [vmem:[#allocation11_spill] sm:$0xff]  ;;  %v6914_v63 = vld [vmem:[#allocation12_spill] sm:$0xff] }
 0x339   : > { %v3682_v27 = vrot.slane %v3416_v58, 4  ;;  %v3423_v25 = vrot.slane %v3107_v50, %v6602_v39  ;;  %v4622_v60 = vpop.f32.mrb[172].mxu1  ;;  %v4784_v40 = vadd.f32 %v6703_v52, %v6913_v43 }
 0x33a   : > { %v3943_v2 = vcombine.low %v3852_v12, %v3853_v19  ;;  %v3812_v38 = vmax.f32 %v3430_v3, %v3684_v22  ;;  %v3685_v24 = vrot.slane %v3437_v15, 4  ;;  %v2738_v11 = vpop.f32.mrb[108].mxu0  ;;  %v2996_v28 = vadd.f32 %v6728_v49, %v4622_v60  ;;  %v2987_v33 = vpop.f32.mrb[173].mxu1 }
 0x33b   : > { %v3810_v10 = vmax.f32 %v3416_v58, %v3682_v27  ;;  %v3683_v5 = vrot.slane %v3423_v25, 4  ;;  %v6796_v32 = vadd.f32 %v4780_v37, %v2738_v11  ;;  %v2740_v48 = vpop.f32.mrb[109].mxu0  ;;  %v2988_v23 = vadd.f32 %v6712_v13, %v2987_v33  ;;  %v4623_v45 = vpop.f32.mrb[174].mxu1 }
 0x33c   : > { %4511 = vst [vmem:[%s6376_s21 + $0xa1] sm:$0xff] %v3943_v2  ;;  %v3813_v46 = vmax.f32 %v3437_v15, %v3685_v24  ;;  %v3112_v53 = vmax.f32 %v2996_v28, 0.0  ;;  %v2741_v18 = vpop.f32.mrb[110].mxu0  ;;  %v2999_v34 = vadd.f32 %v6733_v30, %v4623_v45  ;;  %v2990_v42 = vpop.f32.mrb[175].mxu1  ;;  %v4786_v3 = vadd.f32 %v6703_v52, %v6914_v63  ;;  %v6916_v45 = vld [vmem:[#allocation14_spill] sm:$0xff] }
 0x33d   : > { %v3854_v61 = vmax.f32 %v3810_v10, %v3812_v38  ;;  %v3811_v0 = vmax.f32 %v3423_v25, %v3683_v5  ;;  %v3110_v6 = vmax.f32 %v2988_v23, 0.0  ;;  %v6801_v49 = vadd.f32 %v4782_v7, %v2741_v18  ;;  %v2743_v36 = vpop.f32.mrb[111].mxu0 }
 0x33e   : > { %v3458_v54 = vrot.slane %v3112_v53, %v6602_v39  ;;  %v3113_v55 = vmax.f32 %v2999_v34, 0.0  ;;  %v2991_v14 = vadd.f32 %v6716_v41, %v2990_v42 }
 0x33f   : > { %v3855_v13 = vmax.f32 %v3811_v0, %v3813_v46  ;;  %v3444_v59 = vrot.slane %v3110_v6, %v6602_v39  ;;  %v4790_v46 = vadd.f32 %v6703_v52, %v6916_v45 }
 0x340   : > { %v3688_v16 = vrot.slane %v3458_v54, 4  ;;  %v3465_v1 = vrot.slane %v3113_v55, %v6602_v39  ;;  %v3111_v30 = vmax.f32 %v2991_v14, 0.0 }
 0x341   : > { %v3944_v62 = vcombine.low %v3854_v61, %v3855_v13  ;;  %v3686_v21 = vrot.slane %v3444_v59, 4  ;;  %v4626_v51 = vpop.f32.mrb[176].mxu1 }
 0x342   : > { %v3816_v17 = vmax.f32 %v3458_v54, %v3688_v16  ;;  %v3689_v12 = vrot.slane %v3465_v1, 4  ;;  %v3451_v47 = vrot.slane %v3111_v30, %v6602_v39  ;;  %v2746_v8 = vpop.f32.mrb[112].mxu0  ;;  %v3012_v41 = vadd.f32 %v6762_v26, %v4626_v51  ;;  %v3003_v29 = vpop.f32.mrb[177].mxu1 }
 0x343   : > { %4512 = vst [vmem:[%s6376_s21 + $0xb1] sm:$0xff] %v3944_v62  ;;  %v3814_v9 = vmax.f32 %v3444_v59, %v3686_v21  ;;  %v6814_v58 = vadd.f32 %v4784_v40, %v2746_v8  ;;  %v2748_v50 = vpop.f32.mrb[113].mxu0  ;;  %v3004_v19 = vadd.f32 %v6746_v35, %v3003_v29  ;;  %v4627_v22 = vpop.f32.mrb[178].mxu1 }
 0x344   : > { %v3817_v15 = vmax.f32 %v3465_v1, %v3689_v12  ;;  %v3687_v31 = vrot.slane %v3451_v47, 4  ;;  %v3116_v37 = vmax.f32 %v3012_v41, 0.0  ;;  %v2749_v20 = vpop.f32.mrb[114].mxu0  ;;  %v3015_v7 = vadd.f32 %v6767_v56, %v4627_v22  ;;  %v3006_v27 = vpop.f32.mrb[179].mxu1  ;;  %v6915_v56 = vld [vmem:[#allocation13_spill] sm:$0xff] }
 0x345   : > { %v3856_v26 = vmax.f32 %v3814_v9, %v3816_v17  ;;  %v3114_v25 = vmax.f32 %v3004_v19, 0.0  ;;  %v6818_v60 = vadd.f32 %v4786_v3, %v2749_v20  ;;  %v2751_v2 = vpop.f32.mrb[115].mxu0  ;;  %v3007_v38 = vadd.f32 %v6750_v44, %v3006_v27 }
 0x346   : > { %v3815_v24 = vmax.f32 %v3451_v47, %v3687_v31  ;;  %v3486_v11 = vrot.slane %v3116_v37, %v6602_v39  ;;  %v3117_v28 = vmax.f32 %v3015_v7, 0.0  ;;  %v4788_v23 = vadd.f32 %v6703_v52, %v6915_v56 }
 0x347   : > { %v3472_v35 = vrot.slane %v3114_v25, %v6602_v39  ;;  %v3115_v33 = vmax.f32 %v3007_v38, 0.0 }
 0x348   : > { %v3857_v10 = vmax.f32 %v3815_v24, %v3817_v15  ;;  %v3692_v5 = vrot.slane %v3486_v11, 4  ;;  %v3493_v48 = vrot.slane %v3117_v28, %v6602_v39 }
 0x349   : > { %v3690_v53 = vrot.slane %v3472_v35, 4  ;;  %v3479_v44 = vrot.slane %v3115_v33, %v6602_v39  ;;  %v4630_v18 = vpop.f32.mrb[180].mxu1 }
 0x34a   : > { %v3945_v34 = vcombine.low %v3856_v26, %v3857_v10  ;;  %v3820_v42 = vmax.f32 %v3486_v11, %v3692_v5  ;;  %v3693_v61 = vrot.slane %v3493_v48, 4  ;;  %v2754_v0 = vpop.f32.mrb[116].mxu0  ;;  %v3028_v6 = vadd.f32 %v6796_v32, %v4630_v18  ;;  %v3019_v36 = vpop.f32.mrb[181].mxu1  ;;  %v6918_v26 = vld [vmem:[#allocation17_spill] sm:$0xff] }
 0x34b   : > { %v3818_v54 = vmax.f32 %v3472_v35, %v3690_v53  ;;  %v3691_v55 = vrot.slane %v3479_v44, 4  ;;  %v4789_v14 = vadd.f32 %v4788_v23, %v2754_v0  ;;  %v2756_v13 = vpop.f32.mrb[117].mxu0  ;;  %v3020_v59 = vadd.f32 %v6780_v57, %v3019_v36  ;;  %v4631_v16 = vpop.f32.mrb[182].mxu1 }
 0x34c   : > { %4513 = vst [vmem:[%s6376_s21 + $0xc1] sm:$0xff] %v3945_v34  ;;  %v3821_v1 = vmax.f32 %v3493_v48, %v3693_v61  ;;  %v3120_v30 = vmax.f32 %v3028_v6, 0.0  ;;  %v2757_v43 = vpop.f32.mrb[118].mxu0  ;;  %v3031_v40 = vadd.f32 %v6801_v49, %v4631_v16  ;;  %v3022_v62 = vpop.f32.mrb[183].mxu1  ;;  %v6917_v49 = vld [vmem:[#allocation15_spill] sm:$0xff]  ;;  %v4794_v25 = vadd.f32 %v6703_v52, %v6918_v26 }
 0x34d   : > { %v3858_v21 = vmax.f32 %v3818_v54, %v3820_v42  ;;  %v3819_v51 = vmax.f32 %v3479_v44, %v3691_v55  ;;  %v3118_v17 = vmax.f32 %v3020_v59, 0.0  ;;  %v4791_v12 = vadd.f32 %v4790_v46, %v2757_v43  ;;  %v2759_v32 = vpop.f32.mrb[119].mxu0  ;;  %v6919_v54 = vld [vmem:[#allocation19_spill] sm:$0xff] }
 0x34e   : > { %v3514_v47 = vrot.slane %v3120_v30, %v6602_v39  ;;  %v3121_v8 = vmax.f32 %v3031_v40, 0.0  ;;  %v3023_v41 = vadd.f32 %v6784_v4, %v3022_v62  ;;  %v4792_v50 = vadd.f32 %v6703_v52, %v6917_v49  ;;  %v6920_v32 = vld [vmem:[#allocation21_spill] sm:$0xff] }
 0x34f   : > { %v3859_v29 = vmax.f32 %v3819_v51, %v3821_v1  ;;  %v3500_v57 = vrot.slane %v3118_v17, %v6602_v39  ;;  %v4796_v55 = vadd.f32 %v6703_v52, %v6919_v54 }
 0x350   : > { %v3696_v63 = vrot.slane %v3514_v47, 4  ;;  %v3521_v3 = vrot.slane %v3121_v8, %v6602_v39  ;;  %v3119_v9 = vmax.f32 %v3023_v41, 0.0 }
 0x351   : > { %v3946_v19 = vcombine.low %v3858_v21, %v3859_v29  ;;  %v3694_v22 = vrot.slane %v3500_v57, 4  ;;  %v4634_v15 = vpop.f32.mrb[184].mxu1 }
 0x352   : > { %v3824_v31 = vmax.f32 %v3514_v47, %v3696_v63  ;;  %v3697_v37 = vrot.slane %v3521_v3, 4  ;;  %v3507_v20 = vrot.slane %v3119_v9, %v6602_v39  ;;  %v2762_v7 = vpop.f32.mrb[120].mxu0  ;;  %v3044_v4 = vadd.f32 %v4789_v14, %v4634_v15  ;;  %v3035_v27 = vpop.f32.mrb[185].mxu1 }
 0x353   : > { %4514 = vst [vmem:[%s6376_s21 + $0xd1] sm:$0xff] %v3946_v19  ;;  %v3822_v2 = vmax.f32 %v3500_v57, %v3694_v22  ;;  %v4793_v38 = vadd.f32 %v4792_v50, %v2762_v7  ;;  %v2764_v24 = vpop.f32.mrb[121].mxu0  ;;  %v3036_v11 = vadd.f32 %v6814_v58, %v3035_v27  ;;  %v4635_v28 = vpop.f32.mrb[186].mxu1  ;;  %v4798_v47 = vadd.f32 %v6703_v52, %v6920_v32 }
 0x354   : > { %v3825_v35 = vmax.f32 %v3521_v3, %v3697_v37  ;;  %v3695_v33 = vrot.slane %v3507_v20, 4  ;;  %v3124_v10 = vmax.f32 %v3044_v4, 0.0  ;;  %v2765_v5 = vpop.f32.mrb[122].mxu0  ;;  %v3047_v48 = vadd.f32 %v4791_v12, %v4635_v28  ;;  %v3038_v56 = vpop.f32.mrb[187].mxu1 }
 0x355   : > { %v3860_v23 = vmax.f32 %v3822_v2, %v3824_v31  ;;  %v3122_v45 = vmax.f32 %v3036_v11, 0.0  ;;  %v4795_v46 = vadd.f32 %v4794_v25, %v2765_v5  ;;  %v2767_v53 = vpop.f32.mrb[123].mxu0  ;;  %v3039_v44 = vadd.f32 %v6818_v60, %v3038_v56 }
 0x356   : > { %v3823_v18 = vmax.f32 %v3507_v20, %v3695_v33  ;;  %v3542_v34 = vrot.slane %v3124_v10, %v6602_v39  ;;  %v3125_v42 = vmax.f32 %v3047_v48, 0.0 }
 0x357   : > { %v3528_v61 = vrot.slane %v3122_v45, %v6602_v39  ;;  %v3123_v58 = vmax.f32 %v3039_v44, 0.0 }
 0x358   : > { %v3861_v0 = vmax.f32 %v3823_v18, %v3825_v35  ;;  %v3700_v6 = vrot.slane %v3542_v34, 4  ;;  %v3549_v36 = vrot.slane %v3125_v42, %v6602_v39 }
 0x359   : > { %v3698_v14 = vrot.slane %v3528_v61, 4  ;;  %v3535_v13 = vrot.slane %v3123_v58, %v6602_v39  ;;  %v4638_v59 = vpop.f32.mrb[188].mxu1 }
 0x35a   : > { %v3947_v60 = vcombine.low %v3860_v23, %v3861_v0  ;;  %v3828_v16 = vmax.f32 %v3542_v34, %v3700_v6  ;;  %v3701_v1 = vrot.slane %v3549_v36, 4  ;;  %v2770_v30 = vpop.f32.mrb[124].mxu0  ;;  %v3051_v43 = vpop.f32.mrb[189].mxu1 }
 0x35b   : > { %v3826_v40 = vmax.f32 %v3528_v61, %v3698_v14  ;;  %v3699_v62 = vrot.slane %v3535_v13, 4  ;;  %v4797_v21 = vadd.f32 %v4796_v55, %v2770_v30  ;;  %v2772_v51 = vpop.f32.mrb[125].mxu0  ;;  %v3052_v17 = vadd.f32 %v4793_v38, %v3051_v43  ;;  %v4639_v12 = vpop.f32.mrb[190].mxu1 }
 0x35c   : > { %4515 = vst [vmem:[%s6376_s21 + $0xe1] sm:$0xff] %v3947_v60  ;;  %v3829_v8 = vmax.f32 %v3549_v36, %v3701_v1  ;;  %v2773_v41 = vpop.f32.mrb[126].mxu0  ;;  %v3054_v29 = vpop.f32.mrb[191].mxu1 }
 0x35d   : > { %v3862_v57 = vmax.f32 %v3826_v40, %v3828_v16  ;;  %v3827_v63 = vmax.f32 %v3535_v13, %v3699_v62  ;;  %v3060_v3 = vadd.f32 %v4797_v21, %v4638_v59  ;;  %v3126_v9 = vmax.f32 %v3052_v17, 0.0  ;;  %v2775_v49 = vpop.f32.mrb[127].mxu0 }
 0x35e   : > { %v4799_v50 = vadd.f32 %v4798_v47, %v2773_v41  ;;  %v3055_v19 = vadd.f32 %v4795_v46, %v3054_v29 }
 0x35f   : > { %v3863_v22 = vmax.f32 %v3827_v63, %v3829_v8  ;;  %v3128_v15 = vmax.f32 %v3060_v3, 0.0  ;;  %v3556_v31 = vrot.slane %v3126_v9, %v6602_v39 }
 0x360   : > { %v3063_v37 = vadd.f32 %v4799_v50, %v4639_v12  ;;  %v3127_v20 = vmax.f32 %v3055_v19, 0.0 }
 0x361   : > { %v3948_v7 = vcombine.low %v3862_v57, %v3863_v22  ;;  %v3570_v52 = vrot.slane %v3128_v15, %v6602_v39  ;;  %v3702_v4 = vrot.slane %v3556_v31, 4 }
 0x362   : > { %v3129_v27 = vmax.f32 %v3063_v37, 0.0  ;;  %v3563_v26 = vrot.slane %v3127_v20, %v6602_v39 }
 0x363   : > { %4516 = vst [vmem:[%s6376_s21 + $0xf1] sm:$0xff] %v3948_v7  ;;  %v3704_v25 = vrot.slane %v3570_v52, 4  ;;  %v3830_v2 = vmax.f32 %v3556_v31, %v3702_v4 }
 0x364   : > { %v3577_v38 = vrot.slane %v3129_v27, %v6602_v39  ;;  %v3703_v24 = vrot.slane %v3563_v26, 4 }
 0x365   : > { %v3832_v11 = vmax.f32 %v3570_v52, %v3704_v25 }
 0x366   : > { %v3705_v28 = vrot.slane %v3577_v38, 4  ;;  %v3831_v35 = vmax.f32 %v3563_v26, %v3703_v24 }
 0x367   : > { %v3864_v33 = vmax.f32 %v3830_v2, %v3832_v11 }
 0x368   : > { %v3833_v10 = vmax.f32 %v3577_v38, %v3705_v28 }
 0x36a   : > { %v3865_v5 = vmax.f32 %v3831_v35, %v3833_v10 }
 0x36c   : > { %v3949_v48 = vcombine.low %v3864_v33, %v3865_v5 }
 0x36e   : > { %4517 = vst [vmem:[%s6376_s21 + $0x101] sm:$0xff] %v3949_v48 }
 0x36f PF: > { %s13_s12 = sadd.s32 1, %s5148_s12  }
 0x370   : > { %p10_p4 = scmp.ge.s32.totalorder %s13_s12, 4  }
 0x372   :  { %12 = sbr.rel (!%p10_p4) target bundleno = 1 (0x1), region = 65 }

</bundles_post_ra>
